<compile_context>
chip_gen: v7x
topology: tpu7x:2x2x1
jax: 0.10.0
libtpu: 0.0.40
codegen_flags: <defaults>
</compile_context>

<pallas_src>
import numpy as np
import jax
import jax.numpy as jnp
from jax.experimental import pallas as pl
from jax.experimental.pallas import tpu as pltpu


def _simple_cnn_kernel(col1_ref, w1_ref, b1_ref, w2_ref, b2_ref,
                       wfc1_ref, fb1_ref, wfc2_ref, fb2_ref,
                       out_ref, pad2_ref):
    f32 = jnp.float32
    cdt = w1_ref.dtype                              # matmul-operand dtype (bf16/f32)
    Bt, L, kc = col1_ref.shape
    L1, L2 = L // 2, L // 4
    o1 = b1_ref.shape[-1]
    o2 = b2_ref.shape[-1]

    # ---- conv1 (k=3, stride=1, pad=1) + ReLU: one batched im2col matmul -------
    # im2col was done in the wrapper, so this is a single lane-dense load + dot.
    c1 = jnp.dot(col1_ref[...].reshape(Bt * L, kc), w1_ref[...],
                 preferred_element_type=f32)                      # (Bt*L, o1)
    c1 = jnp.maximum(c1 + b1_ref[...], 0.0)

    # ---- maxpool1 (kernel=2, stride=2): reshape+reduce on the register value --
    p1 = jnp.max(c1.reshape(Bt, L1, 2, o1), axis=2)               # (Bt, L1, o1)

    # ---- conv2 (k=3, stride=1, pad=1) + ReLU: halo scratch + 3 tap matmuls -----
    zero_row = jnp.zeros((Bt, 1, o1), f32)
    pad2_ref[:, pl.ds(0, 1), :] = zero_row                        # left halo
    pad2_ref[:, pl.ds(L1 + 1, 1), :] = zero_row                   # right halo
    pad2_ref[:, pl.ds(1, L1), :] = p1
    c2 = None
    for k in range(3):                                            # 3 small MXU pushes
        tap = pad2_ref[:, pl.ds(k, L1), :].reshape(Bt * L1, o1)
        d = jnp.dot(tap.astype(cdt), w2_ref[k], preferred_element_type=f32)
        c2 = d if c2 is None else c2 + d
    c2 = jnp.maximum(c2 + b2_ref[...], 0.0)                       # (Bt*L1, o2)

    # ---- maxpool2 fused with the (C, L') flatten (ordering folded into wfc1) --
    p2 = jnp.max(c2.reshape(Bt, L2, 2, o2), axis=2)               # (Bt, L2, o2)
    p2_flat = p2.reshape(Bt, L2 * o2)                             # (Bt, L2*o2)

    # ---- fc1 + ReLU ------------------------------------------------------------
    h = jnp.maximum(jnp.dot(p2_flat.astype(cdt), wfc1_ref[...],
                            preferred_element_type=f32) + fb1_ref[...], 0.0)

    # TODO(synk): Dropout(p=0.5) is identity in eval mode; train-mode masking omitted.

    # ---- fc2: lane-dense (128-column padded) single full-block store -----------
    out_ref[...] = jnp.dot(h.astype(cdt), wfc2_ref[...],
                           preferred_element_type=f32) + fb2_ref[...]


def _round_up(x, m):
    return ((x + m - 1) // m) * m


def _pick_batch_tile(B, per_sample_bytes, max_tile):
    """Large, generation-aware batch tile: bounded by VMEM capacity, and at
    least 2 grid steps when B allows so v7x's two TensorCores both run."""
    try:
        vmem_bytes = int(pltpu.get_tpu_info().vmem_capacity_bytes)
    except Exception:
        vmem_bytes = 64 * 1024 * 1024               # conservative (v7x per-core)
    budget = vmem_bytes // 3                        # headroom for compiler temps
    cap = int(budget // max(per_sample_bytes, 1))
    cap = max(8, min(max_tile, (cap // 8) * 8))
    if B <= 16:
        bt = B                                      # tiny batch: one full block
    else:
        half = _round_up((B + 1) // 2, 8)           # >=2 steps for megacore
        bt = min(half, cap)
    vmem_limit = min(int(vmem_bytes * 3 // 4), 112 * 1024 * 1024)
    return bt, vmem_limit


def simple_cnn_forward(x, params, *, batch_tile=None, max_batch_tile=2048,
                       compute_dtype=jnp.bfloat16):
    """x: (B, max_length, 2) float32, like the PyTorch module's input."""
    w1, b1, w2, b2, fw1, fb1, fw2, fb2 = params
    B, L, cin = x.shape
    assert L % 4 == 0, "two stride-2 pools require max_length % 4 == 0"
    o1, o2 = w1.shape[0], w2.shape[0]
    l1, l2 = L // 2, L // 4
    d1, nc = fw1.shape[0], fw2.shape[0]
    ncp = _round_up(nc, 128)                        # lane-dense logits
    cdt = compute_dtype
    isz = jnp.dtype(cdt).itemsize

    # Rough per-sample VMEM bytes (double-buffered I/O blocks + scratch + the
    # large f32 intermediates the compiler stages) used to size the batch tile.
    per_sample = (2 * L * 3 * cin * isz             # col1 input block x2
                  + (l1 + 2) * o1 * 4               # pad2 scratch (f32)
                  + 2 * ncp * 4                     # logits block x2
                  + L * o1 * 4 + l1 * o2 * 4        # c1 / c2 f32 temporaries
                  + l1 * o1 * 4 + l2 * o2 * 4 + d1 * 4)

    if batch_tile is None:
        bt, vmem_limit = _pick_batch_tile(B, per_sample, max_batch_tile)
    else:
        bt = B if B <= batch_tile else _round_up(batch_tile, 8)
        _, vmem_limit = _pick_batch_tile(B, per_sample, max_batch_tile)
    b_pad = _round_up(B, bt)

    # conv1 zero-padding + im2col once here (XLA); kernel input is lane-dense.
    xp = jnp.pad(x.astype(jnp.float32), ((0, b_pad - B), (1, 1), (0, 0)))
    col1 = jnp.concatenate([xp[:, k:k + L, :] for k in range(3)],
                           axis=-1).astype(cdt)                   # (b_pad, L, 3*cin)

    # Weights re-laid-out for the (L, C) kernel layout; bf16 operands, f32 bias.
    w1_col = jnp.transpose(w1, (2, 1, 0)).reshape(3 * cin, o1).astype(cdt)
    w2_taps = jnp.transpose(w2, (2, 1, 0)).astype(cdt)            # (3, o1, o2)
    # torch flattens (C, L') as c*l2 + l; the kernel flattens as l*o2 + c.
    wfc1_f = jnp.transpose(fw1.reshape(d1, o2, l2),
                           (2, 1, 0)).reshape(l2 * o2, d1).astype(cdt)
    wfc2_p = jnp.zeros((d1, ncp), cdt).at[:, :nc].set(jnp.transpose(fw2).astype(cdt))
    b1_r = b1[None, :].astype(jnp.float32)
    b2_r = b2[None, :].astype(jnp.float32)
    fb1_r = fb1[None, :].astype(jnp.float32)
    fb2_p = jnp.zeros((1, ncp), jnp.float32).at[0, :nc].set(fb2.astype(jnp.float32))

    def full_spec(a):
        nd = a.ndim
        return pl.BlockSpec(a.shape, lambda i, _nd=nd: (0,) * _nd)

    out = pl.pallas_call(
        _simple_cnn_kernel,
        out_shape=jax.ShapeDtypeStruct((b_pad, ncp), jnp.float32),
        grid=(b_pad // bt,),
        in_specs=[
            pl.BlockSpec((bt, L, 3 * cin), lambda i: (i, 0, 0)),
            full_spec(w1_col), full_spec(b1_r),
            full_spec(w2_taps), full_spec(b2_r),
            full_spec(wfc1_f), full_spec(fb1_r),
            full_spec(wfc2_p), full_spec(fb2_p),
        ],
        out_specs=pl.BlockSpec((bt, ncp), lambda i: (i, 0)),
        scratch_shapes=[
            pltpu.VMEM((bt, l1 + 2, o1), jnp.float32),   # zero-halo conv2 input
        ],
        compiler_params=pltpu.CompilerParams(
            dimension_semantics=("parallel",),
            vmem_limit_bytes=vmem_limit),
    )(col1, w1_col, b1_r, w2_taps, b2_r, wfc1_f, fb1_r, wfc2_p, fb2_p)
    return out[:B, :nc]


def _ref_forward(x, params):
    """Pure-JAX mirror of the PyTorch forward (eval mode) for validation."""
    w1, b1, w2, b2, fw1, fb1, fw2, fb2 = params
    h = jnp.transpose(x, (0, 2, 1))                                # (B, C, L)

    def conv1d(h, w, b):
        _, _, L = h.shape
        hp = jnp.pad(h, ((0, 0), (0, 0), (1, 1)))
        out = b[None, :, None]
        for k in range(w.shape[2]):
            out = out + jnp.einsum('bcl,oc->bol', hp[:, :, k:k + L], w[:, :, k])
        return out

    def pool(h):
        B, C, L = h.shape
        return jnp.max(h.reshape(B, C, L // 2, 2), axis=-1)

    h = pool(jnp.maximum(conv1d(h, w1, b1), 0.0))
    h = pool(jnp.maximum(conv1d(h, w2, b2), 0.0))
    flat = h.reshape(h.shape[0], -1)
    h = jnp.maximum(flat @ fw1.T + fb1, 0.0)
    return h @ fw2.T + fb2


if __name__ == "__main__":
    B, L, CIN, NUM_CLASSES = 2, 16, 2, 2       # input_channels=2, max_length=16
    O1, O2, D1 = 16, 32, 128
    fc_in = O2 * (L // 4)                      # matches SimpleCNN._calculate_fc_input

    key = jax.random.PRNGKey(0)
    ks = jax.random.split(key, 10)
    params = (
        0.2 * jax.random.normal(ks[0], (O1, CIN, 3), jnp.float32),       # conv1.weight
        0.1 * jax.random.normal(ks[1], (O1,), jnp.float32),              # conv1.bias
        0.2 * jax.random.normal(ks[2], (O2, O1, 3), jnp.float32),        # conv2.weight
        0.1 * jax.random.normal(ks[3], (O2,), jnp.float32),              # conv2.bias
        0.1 * jax.random.normal(ks[4], (D1, fc_in), jnp.float32),        # fc1.weight
        0.1 * jax.random.normal(ks[5], (D1,), jnp.float32),              # fc1.bias
        0.1 * jax.random.normal(ks[6], (NUM_CLASSES, D1), jnp.float32),  # fc2.weight
        0.1 * jax.random.normal(ks[7], (NUM_CLASSES,), jnp.float32),     # fc2.bias
    )
    x_small = jax.random.normal(ks[8], (B, L, CIN), jnp.float32)
    x_big = jax.random.normal(ks[9], (40, L, CIN), jnp.float32)

    # f32-operand path on a batch large enough for >=2 grid steps + padding:
    # validates the tiled/padded path and all kernel math to tight tolerance.
    out_f32 = simple_cnn_forward(x_big, params, compute_dtype=jnp.float32)
    jax.block_until_ready(out_f32)
    np.testing.assert_allclose(np.asarray(out_f32), np.asarray(_ref_forward(x_big, params)),
                               rtol=2e-3, atol=2e-3)

    # Default bf16-operand path (f32 accumulation): looser tolerance.
    out_bf16 = simple_cnn_forward(x_small, params)
    jax.block_until_ready(out_bf16)
    np.testing.assert_allclose(np.asarray(out_bf16), np.asarray(_ref_forward(x_small, params)),
                               rtol=5e-2, atol=5e-2)

    print("KERNEL_OK")
</pallas_src>

<mosaic_0001>
module attributes {stable_mosaic.version = 11 : i64} {
  func.func @_simple_cnn_kernel(%arg0: i32, %arg1: memref<24x16x6xf32, #tpu.memory_space<vmem>>, %arg2: memref<6x16xf32, #tpu.memory_space<vmem>>, %arg3: memref<1x16xf32, #tpu.memory_space<vmem>>, %arg4: memref<3x16x32xf32, #tpu.memory_space<vmem>>, %arg5: memref<1x32xf32, #tpu.memory_space<vmem>>, %arg6: memref<128x128xf32, #tpu.memory_space<vmem>>, %arg7: memref<1x128xf32, #tpu.memory_space<vmem>>, %arg8: memref<128x128xf32, #tpu.memory_space<vmem>>, %arg9: memref<1x128xf32, #tpu.memory_space<vmem>>, %arg10: memref<24x128xf32, #tpu.memory_space<vmem>>, %arg11: memref<24x10x16xf32, #tpu.memory_space<vmem>>) attributes {dimension_semantics = [#tpu.dimension_semantics<parallel>], iteration_bounds = array<i64: 2>, scalar_prefetch = 0 : i64, scratch_operands = 1 : i64, tpu.core_type = #tpu.core_type<tc>, window_params = [{transform_indices = @transform_0, window_bounds = array<i64: 24, 16, 6>}, {pipeline_mode = #tpu.pipeline_mode<synchronous>, transform_indices = @transform_1, window_bounds = array<i64: 6, 16>}, {pipeline_mode = #tpu.pipeline_mode<synchronous>, transform_indices = @transform_2, window_bounds = array<i64: 1, 16>}, {pipeline_mode = #tpu.pipeline_mode<synchronous>, transform_indices = @transform_3, window_bounds = array<i64: 3, 16, 32>}, {pipeline_mode = #tpu.pipeline_mode<synchronous>, transform_indices = @transform_4, window_bounds = array<i64: 1, 32>}, {pipeline_mode = #tpu.pipeline_mode<synchronous>, transform_indices = @transform_5, window_bounds = array<i64: 128, 128>}, {pipeline_mode = #tpu.pipeline_mode<synchronous>, transform_indices = @transform_6, window_bounds = array<i64: 1, 128>}, {pipeline_mode = #tpu.pipeline_mode<synchronous>, transform_indices = @transform_7, window_bounds = array<i64: 128, 128>}, {pipeline_mode = #tpu.pipeline_mode<synchronous>, transform_indices = @transform_8, window_bounds = array<i64: 1, 128>}, {transform_indices = @transform_9, window_bounds = array<i64: 24, 128>}]} {
    %c0 = arith.constant 0 : index
    %c0_0 = arith.constant 0 : index
    %c0_1 = arith.constant 0 : index
    %0 = vector.load %arg1[%c0, %c0_0, %c0_1] : memref<24x16x6xf32, #tpu.memory_space<vmem>>, vector<24x16x6xf32>
    %1 = vector.shape_cast %0 : vector<24x16x6xf32> to vector<384x6xf32>
    %c0_2 = arith.constant 0 : index
    %c0_3 = arith.constant 0 : index
    %2 = vector.load %arg2[%c0_2, %c0_3] : memref<6x16xf32, #tpu.memory_space<vmem>>, vector<6x16xf32>
    %cst = arith.constant dense<0.000000e+00> : vector<384x16xf32>
    %3 = tpu.matmul %1, %2, %cst {dimension_numbers = #tpu.dot_dimension_numbers<[1], [0], [0], [1], [0, 0, 1, 1], [], []>} : vector<384x6xf32>, vector<6x16xf32>, vector<384x16xf32> -> vector<384x16xf32>
    %c0_4 = arith.constant 0 : index
    %c0_5 = arith.constant 0 : index
    %4 = vector.load %arg3[%c0_4, %c0_5] : memref<1x16xf32, #tpu.memory_space<vmem>>, vector<1x16xf32>
    %5 = vector.broadcast %4 : vector<1x16xf32> to vector<384x16xf32>
    %6 = arith.addf %3, %5 : vector<384x16xf32>
    %cst_6 = arith.constant 0.000000e+00 : f32
    %7 = vector.broadcast %cst_6 : f32 to vector<384x16xf32>
    %8 = arith.maximumf %6, %7 : vector<384x16xf32>
    %9 = vector.shape_cast %8 : vector<384x16xf32> to vector<24x8x2x16xf32>
    %cst_7 = arith.constant dense<0xFF800000> : vector<24x8x16xf32>
    %10 = vector.multi_reduction <maximumf>, %9, %cst_7 [2] : vector<24x8x2x16xf32> to vector<24x8x16xf32>
    %cst_8 = arith.constant 0.000000e+00 : f32
    %11 = vector.broadcast %cst_8 : f32 to vector<24x1x16xf32>
    %c0_9 = arith.constant 0 : index
    %c0_10 = arith.constant 0 : index
    %c0_11 = arith.constant 0 : index
    %12 = vector.load %arg11[%c0_9, %c0_10, %c0_11] : memref<24x10x16xf32, #tpu.memory_space<vmem>>, vector<24x1x16xf32>
    tpu.vector_store %arg11[%c0_9, %c0_10, %c0_11], %11 {strides = array<i32>} : memref<24x10x16xf32, #tpu.memory_space<vmem>>, vector<24x1x16xf32>,
    %c0_12 = arith.constant 0 : index
    %c9 = arith.constant 9 : index
    %c0_13 = arith.constant 0 : index
    %13 = vector.load %arg11[%c0_12, %c9, %c0_13] : memref<24x10x16xf32, #tpu.memory_space<vmem>>, vector<24x1x16xf32>
    tpu.vector_store %arg11[%c0_12, %c9, %c0_13], %11 {strides = array<i32>} : memref<24x10x16xf32, #tpu.memory_space<vmem>>, vector<24x1x16xf32>,
    %c0_14 = arith.constant 0 : index
    %c1 = arith.constant 1 : index
    %c0_15 = arith.constant 0 : index
    %14 = vector.load %arg11[%c0_14, %c1, %c0_15] : memref<24x10x16xf32, #tpu.memory_space<vmem>>, vector<24x8x16xf32>
    tpu.vector_store %arg11[%c0_14, %c1, %c0_15], %10 {strides = array<i32>} : memref<24x10x16xf32, #tpu.memory_space<vmem>>, vector<24x8x16xf32>,
    %c0_16 = arith.constant 0 : index
    %c0_17 = arith.constant 0 : index
    %c0_18 = arith.constant 0 : index
    %15 = vector.load %arg11[%c0_16, %c0_17, %c0_18] : memref<24x10x16xf32, #tpu.memory_space<vmem>>, vector<24x8x16xf32>
    %16 = vector.shape_cast %15 : vector<24x8x16xf32> to vector<192x16xf32>
    %c0_19 = arith.constant 0 : index
    %c0_20 = arith.constant 0 : index
    %c0_21 = arith.constant 0 : index
    %17 = vector.load %arg4[%c0_19, %c0_20, %c0_21] : memref<3x16x32xf32, #tpu.memory_space<vmem>>, vector<1x16x32xf32>
    %18 = vector.shape_cast %17 : vector<1x16x32xf32> to vector<16x32xf32>
    %cst_22 = arith.constant dense<0.000000e+00> : vector<192x32xf32>
    %19 = tpu.matmul %16, %18, %cst_22 {dimension_numbers = #tpu.dot_dimension_numbers<[1], [0], [0], [1], [0, 0, 1, 1], [], []>} : vector<192x16xf32>, vector<16x32xf32>, vector<192x32xf32> -> vector<192x32xf32>
    %c0_23 = arith.constant 0 : index
    %c1_24 = arith.constant 1 : index
    %c0_25 = arith.constant 0 : index
    %20 = vector.load %arg11[%c0_23, %c1_24, %c0_25] : memref<24x10x16xf32, #tpu.memory_space<vmem>>, vector<24x8x16xf32>
    %21 = vector.shape_cast %20 : vector<24x8x16xf32> to vector<192x16xf32>
    %c1_26 = arith.constant 1 : index
    %c0_27 = arith.constant 0 : index
    %c0_28 = arith.constant 0 : index
    %22 = vector.load %arg4[%c1_26, %c0_27, %c0_28] : memref<3x16x32xf32, #tpu.memory_space<vmem>>, vector<1x16x32xf32>
    %23 = vector.shape_cast %22 : vector<1x16x32xf32> to vector<16x32xf32>
    %cst_29 = arith.constant dense<0.000000e+00> : vector<192x32xf32>
    %24 = tpu.matmul %21, %23, %cst_29 {dimension_numbers = #tpu.dot_dimension_numbers<[1], [0], [0], [1], [0, 0, 1, 1], [], []>} : vector<192x16xf32>, vector<16x32xf32>, vector<192x32xf32> -> vector<192x32xf32>
    %25 = arith.addf %19, %24 : vector<192x32xf32>
    %c0_30 = arith.constant 0 : index
    %c2 = arith.constant 2 : index
    %c0_31 = arith.constant 0 : index
    %26 = vector.load %arg11[%c0_30, %c2, %c0_31] : memref<24x10x16xf32, #tpu.memory_space<vmem>>, vector<24x8x16xf32>
    %27 = vector.shape_cast %26 : vector<24x8x16xf32> to vector<192x16xf32>
    %c2_32 = arith.constant 2 : index
    %c0_33 = arith.constant 0 : index
    %c0_34 = arith.constant 0 : index
    %28 = vector.load %arg4[%c2_32, %c0_33, %c0_34] : memref<3x16x32xf32, #tpu.memory_space<vmem>>, vector<1x16x32xf32>
    %29 = vector.shape_cast %28 : vector<1x16x32xf32> to vector<16x32xf32>
    %cst_35 = arith.constant dense<0.000000e+00> : vector<192x32xf32>
    %30 = tpu.matmul %27, %29, %cst_35 {dimension_numbers = #tpu.dot_dimension_numbers<[1], [0], [0], [1], [0, 0, 1, 1], [], []>} : vector<192x16xf32>, vector<16x32xf32>, vector<192x32xf32> -> vector<192x32xf32>
    %31 = arith.addf %25, %30 : vector<192x32xf32>
    %c0_36 = arith.constant 0 : index
    %c0_37 = arith.constant 0 : index
    %32 = vector.load %arg5[%c0_36, %c0_37] : memref<1x32xf32, #tpu.memory_space<vmem>>, vector<1x32xf32>
    %33 = vector.broadcast %32 : vector<1x32xf32> to vector<192x32xf32>
    %34 = arith.addf %31, %33 : vector<192x32xf32>
    %cst_38 = arith.constant 0.000000e+00 : f32
    %35 = vector.broadcast %cst_38 : f32 to vector<192x32xf32>
    %36 = arith.maximumf %34, %35 : vector<192x32xf32>
    %37 = vector.shape_cast %36 : vector<192x32xf32> to vector<24x4x2x32xf32>
    %cst_39 = arith.constant dense<0xFF800000> : vector<24x4x32xf32>
    %38 = vector.multi_reduction <maximumf>, %37, %cst_39 [2] : vector<24x4x2x32xf32> to vector<24x4x32xf32>
    %39 = vector.shape_cast %38 : vector<24x4x32xf32> to vector<24x128xf32>
    %c0_40 = arith.constant 0 : index
    %c0_41 = arith.constant 0 : index
    %40 = vector.load %arg6[%c0_40, %c0_41] : memref<128x128xf32, #tpu.memory_space<vmem>>, vector<128x128xf32>
    %cst_42 = arith.constant dense<0.000000e+00> : vector<24x128xf32>
    %41 = tpu.matmul %39, %40, %cst_42 {dimension_numbers = #tpu.dot_dimension_numbers<[1], [0], [0], [1], [0, 0, 1, 1], [], []>} : vector<24x128xf32>, vector<128x128xf32>, vector<24x128xf32> -> vector<24x128xf32>
    %c0_43 = arith.constant 0 : index
    %c0_44 = arith.constant 0 : index
    %42 = vector.load %arg7[%c0_43, %c0_44] : memref<1x128xf32, #tpu.memory_space<vmem>>, vector<1x128xf32>
    %43 = vector.broadcast %42 : vector<1x128xf32> to vector<24x128xf32>
    %44 = arith.addf %41, %43 : vector<24x128xf32>
    %cst_45 = arith.constant 0.000000e+00 : f32
    %45 = vector.broadcast %cst_45 : f32 to vector<24x128xf32>
    %46 = arith.maximumf %44, %45 : vector<24x128xf32>
    %c0_46 = arith.constant 0 : index
    %c0_47 = arith.constant 0 : index
    %47 = vector.load %arg8[%c0_46, %c0_47] : memref<128x128xf32, #tpu.memory_space<vmem>>, vector<128x128xf32>
    %cst_48 = arith.constant dense<0.000000e+00> : vector<24x128xf32>
    %48 = tpu.matmul %46, %47, %cst_48 {dimension_numbers = #tpu.dot_dimension_numbers<[1], [0], [0], [1], [0, 0, 1, 1], [], []>} : vector<24x128xf32>, vector<128x128xf32>, vector<24x128xf32> -> vector<24x128xf32>
    %c0_49 = arith.constant 0 : index
    %c0_50 = arith.constant 0 : index
    %49 = vector.load %arg9[%c0_49, %c0_50] : memref<1x128xf32, #tpu.memory_space<vmem>>, vector<1x128xf32>
    %50 = vector.broadcast %49 : vector<1x128xf32> to vector<24x128xf32>
    %51 = arith.addf %48, %50 : vector<24x128xf32>
    %c0_51 = arith.constant 0 : index
    %c0_52 = arith.constant 0 : index
    %52 = vector.load %arg10[%c0_51, %c0_52] : memref<24x128xf32, #tpu.memory_space<vmem>>, vector<24x128xf32>
    tpu.vector_store %arg10[%c0_51, %c0_52], %51 {strides = array<i32>} : memref<24x128xf32, #tpu.memory_space<vmem>>, vector<24x128xf32>,
    return
  }
  func.func @transform_0(%arg0: i32) -> (i32, i32, i32) {
    %c0_i32 = arith.constant 0 : i32
    %c0_i32_0 = arith.constant 0 : i32
    %c0_i32_1 = arith.constant 0 : i32
    return %arg0, %c0_i32, %c0_i32_0 : i32, i32, i32
  }
  func.func @transform_1(%arg0: i32) -> (i32, i32) {
    %c0_i32 = arith.constant 0 : i32
    %c0_i32_0 = arith.constant 0 : i32
    %c0_i32_1 = arith.constant 0 : i32
    return %c0_i32, %c0_i32_0 : i32, i32
  }
  func.func @transform_2(%arg0: i32) -> (i32, i32) {
    %c0_i32 = arith.constant 0 : i32
    %c0_i32_0 = arith.constant 0 : i32
    %c0_i32_1 = arith.constant 0 : i32
    return %c0_i32, %c0_i32_0 : i32, i32
  }
  func.func @transform_3(%arg0: i32) -> (i32, i32, i32) {
    %c0_i32 = arith.constant 0 : i32
    %c0_i32_0 = arith.constant 0 : i32
    %c0_i32_1 = arith.constant 0 : i32
    %c0_i32_2 = arith.constant 0 : i32
    return %c0_i32, %c0_i32_0, %c0_i32_1 : i32, i32, i32
  }
  func.func @transform_4(%arg0: i32) -> (i32, i32) {
    %c0_i32 = arith.constant 0 : i32
    %c0_i32_0 = arith.constant 0 : i32
    %c0_i32_1 = arith.constant 0 : i32
    return %c0_i32, %c0_i32_0 : i32, i32
  }
  func.func @transform_5(%arg0: i32) -> (i32, i32) {
    %c0_i32 = arith.constant 0 : i32
    %c0_i32_0 = arith.constant 0 : i32
    %c0_i32_1 = arith.constant 0 : i32
    return %c0_i32, %c0_i32_0 : i32, i32
  }
  func.func @transform_6(%arg0: i32) -> (i32, i32) {
    %c0_i32 = arith.constant 0 : i32
    %c0_i32_0 = arith.constant 0 : i32
    %c0_i32_1 = arith.constant 0 : i32
    return %c0_i32, %c0_i32_0 : i32, i32
  }
  func.func @transform_7(%arg0: i32) -> (i32, i32) {
    %c0_i32 = arith.constant 0 : i32
    %c0_i32_0 = arith.constant 0 : i32
    %c0_i32_1 = arith.constant 0 : i32
    return %c0_i32, %c0_i32_0 : i32, i32
  }
  func.func @transform_8(%arg0: i32) -> (i32, i32) {
    %c0_i32 = arith.constant 0 : i32
    %c0_i32_0 = arith.constant 0 : i32
    %c0_i32_1 = arith.constant 0 : i32
    return %c0_i32, %c0_i32_0 : i32, i32
  }
  func.func @transform_9(%arg0: i32) -> (i32, i32) {
    %c0_i32 = arith.constant 0 : i32
    %c0_i32_0 = arith.constant 0 : i32
    return %arg0, %c0_i32 : i32, i32
  }
}

</mosaic_0001>

<bundles_post_ra>
// kernel: tpu_custom_call.1
= control target key start
LH: loop header
LB: loop body
LE: loop exit
PB: predicated region body
PF: predicated region fallthrough
CT: control target
= control target key end

     0   :  { %14 = vsyncpa [#allocation4], 0  ;;  %s9585_s0 = inlined_call_operand.vmem [shape: f32[48,16,6], index: 0, kind: input, shape index: {}]   ;;  %s9586_s1 = inlined_call_operand.vmem [shape: f32[6,16], index: 1, kind: input, shape index: {}]   ;;  %s9587_s2 = inlined_call_operand.vmem [shape: f32[1,16], index: 2, kind: input, shape index: {}]   ;;  %s9588_s3 = inlined_call_operand.vmem [shape: f32[3,16,32], index: 3, kind: input, shape index: {}]   ;;  %s9589_s4 = inlined_call_operand.vmem [shape: f32[1,32], index: 4, kind: input, shape index: {}]   ;;  %s9590_s5 = inlined_call_operand.vmem [shape: f32[128,128], index: 5, kind: input, shape index: {}]   ;;  %s9591_s6 = inlined_call_operand.vmem [shape: f32[1,128], index: 6, kind: input, shape index: {}]   ;;  %s9592_s7 = inlined_call_operand.vmem [shape: f32[128,128], index: 7, kind: input, shape index: {}]   ;;  %s9593_s8 = inlined_call_operand.vmem [shape: f32[1,128], index: 8, kind: input, shape index: {}]   ;;  %s9594_s9 = inlined_call_operand.hbm [shape: f32[48,128], index: 9, kind: output, shape index: {}]  }
   0x1   :  { %16 = vsyncpa [#allocation4 + $0x1], 0  ;;  %s7502_s30 = smov 0   ;;  %s7504_s10 = smov 0  }
   0x2   :  { %s7506_s11 = smov 0   ;;  %s7508_s12 = smov 0  }
   0x3 LB: > { %s7523_s13 = sadd.s32 4294967295, %s7439_s12   ;;  %s6624_s14 = sadd.s32 4294967294, %s7439_s12   ;;  %s7439_s12 = sphi %s7508_s12, %s9670_s12   ;;  %s7435_s11 = sphi %s7506_s11, %s9669_s11   ;;  %s7431_s10 = sphi %s7504_s10, %s9668_s10   ;;  %s7427_s30 = sphi %s7502_s30, %s9667_s30  }
   0x4   : > { %s7527_s15 = sadd.s32 1, %s7439_s12   ;;  %s223_s16 = sadd.s32 1, %s7435_s11 }
   0x5   : > { %s220_s17 = ssub.s32 %s7439_s12, %s7527_s15  ;;  %p233_p0 = scmp.ne.s32.totalorder %s7435_s11, %s7431_s10 }
   0x6   : > { %p221_p1 = scmp.eq.s32.totalorder %s220_s17, 0  ;;  %p234_p2 = scmp.eq.s32.totalorder %s7523_s13, 1 }
   0x7   : > { %p239_p3 = scmp.ne.s32.totalorder %s7431_s10, %s7427_s30  ;;  %p240_p4 = scmp.eq.s32.totalorder %s6624_s14, 1 }
   0x8   : > { %s7538_s18 = scalar_select %p221_p1, %s7435_s11, %s223_s16  }
   0x9   : > { %p7540_p5 = por %p234_p2, %p233_p0  ;;  %p7544_p6 = por %p240_p4, %p239_p3 }
   0xa   : > { %p6627_p7 = scmp.ge.s32.totalorder %s7439_s12, 1  ;;  %p292_p8 = scmp.lt.s32.totalorder %s7439_s12, 3 }
   0xc   : > { %p293_p9 = pnand %p6627_p7, %p292_p8 }
   0xe   : > { %296 = sbr.rel (%p293_p9) target bundleno = 1817 (0x719), region = 56 }
  0x15   : > { %v385_v0 = vld [vmem:[%s9586_s1] sm:$0x3f]  ;;  %vm538_vm0 = vcmask 1045504   ;;  %s329_s23 = smul.u32 24, %s7523_s13  ;;  %vm393_vm1 = vcmask 48128   ;;  %v947_v51 = vlaneseq  ;;  %vm1951_vm2 = vcmask 123904  }
  0x16   : > { %6929 = vmatprep.subr.msk.mxu0 %vm538_vm0, %v385_v0  ;;  %v7441_v49 = vmov 1983009808   ;;  %v7660_v54 = vld [vmem:[%s9587_s2] ss:$0 sm:$0xff]  ;;  %vm3537_vm3 = vcmask 1041409   ;;  %vm3539_vm4 = vcmask 1042434  }
  0x17   : > { %6930 = vmatpush3.msk.msra.mxu0 %vm538_vm0, %v385_v0  ;;  %p330_p10 = scmp.lt.s32.totalorder %s329_s23, 47  ;;  %v945_v50 = vunpack.c.l.s4 %v7441_v49  ;;  %v7655_v53 = vshrl.u32 %v947_v51, 7  ;;  %vm3541_vm5 = vcmask 1043459   ;;  %vm3543_vm6 = vcmask 1044484   ;;  %s7444_s28 = smov 96  }
  0x18   : > { %vm3545_vm7 = vcmask 1045509   ;;  %vm3547_vm8 = vcmask 1046534   ;;  %vm3549_vm9 = vcmask 1047559   ;;  %vm3736_vm10 = vcmask 130048   ;;  %s7445_s25 = smov 32   ;;  %s7447_s16 = smov 64  }
  0x19   : > { %s9672_s23 = smov (!%p330_p10, %s329_s23), 47  ;;  %v946_v52 = vunpack.c.0.s8 %v945_v50  ;;  %9600 = vst [vmem:[#allocation6_spill] sm:$0xff] %v7655_v53  ;;  %vm3296_vm11 = vcmask 122880   ;;  %vm5219_vm12 = vcmask 254976   ;;  %vm7448_vm13 = vmmov 0   ;;  %s6763_s21 = smul.u32 384, %s7523_s13 }
  0x1a   : > { %s6762_s24 = sshll.u32 %s9672_s23, 4  ;;  %vm6324_vm14 = vcmask 261120   ;;  %vm6328_vm15 = vcmask 523264   ;;  %vm6332_vm0 = vcmask 785408   ;;  %s7449_s13 = smov [#allocation3]  }
  0x1b   : > { %s7557_s27 = scalar_lea.vmem %s9585_s0, %s6762_s24  ;;  %v7664_v57 = vsub.s32 %v946_v52, %v7655_v53  ;;  %s9542_s23 = scalar_lea.hbm %s9594_s9, %s6763_s21 }
  0x1c   : > { %v337_v1 = vld [vmem:[%s7557_s27] sm:$0xff]  ;;  %v338_v2 = vld [vmem:[%s7557_s27 + $0x8] sm:$0xff]  ;;  %v339_v3 = vld [vmem:[%s7557_s27 + $0x10] sm:$0xff] }
  0x1d   : > { %6931 = vmatprep.mubr.msk.f32.mxu0 %vm393_vm1, %v337_v1  ;;  %v340_v4 = vld [vmem:[%s7557_s27 + $0x18] sm:$0xff]  ;;  %v341_v5 = vld [vmem:[%s7557_s27 + $0x20] sm:$0xff]  ;;  %v342_v6 = vld [vmem:[%s7557_s27 + $0x28] sm:$0xff] }
  0x1e   : > { %6932 = vmatmul.mubr.msk.f32.vlgmr.msra.gmra.mrb[0].mxu0 %vm393_vm1, %v338_v2  ;;  %v343_v7 = vld [vmem:[%s7557_s27 + $0x30] sm:$0xff]  ;;  %v344_v8 = vld [vmem:[%s7557_s27 + $0x38] sm:$0xff]  ;;  %v345_v9 = vld [vmem:[%s7557_s27 + $0x40] sm:$0xff] }
  0x1f   : > { %6934 = vmatprep.mubr.msk.f32.mxu0 %vm393_vm1, %v339_v3  ;;  %v346_v10 = vld [vmem:[%s7557_s27 + $0x48] sm:$0xff]  ;;  %v347_v11 = vld [vmem:[%s7557_s27 + $0x50] sm:$0xff]  ;;  %v348_v12 = vld [vmem:[%s7557_s27 + $0x58] sm:$0xff] }
  0x20   : > { %v349_v13 = vld [vmem:[%s7557_s27 + $0x60] sm:$0xff]  ;;  %v350_v14 = vld [vmem:[%s7557_s27 + $0x68] sm:$0xff]  ;;  %v351_v15 = vld [vmem:[%s7557_s27 + $0x70] sm:$0xff] }
  0x21   : > { %v352_v16 = vld [vmem:[%s7557_s27 + $0x78] sm:$0xff]  ;;  %v353_v17 = vld [vmem:[%s7557_s27 + $0x80] sm:$0xff]  ;;  %v354_v18 = vld [vmem:[%s7557_s27 + $0x88] sm:$0xff] }
  0x22   : > { %6935 = vmatmul.mubr.msk.f32.gmra.mrb[2].mxu0 %vm393_vm1, %v340_v4  ;;  %v355_v19 = vld [vmem:[%s7557_s27 + $0x90] sm:$0xff]  ;;  %v356_v20 = vld [vmem:[%s7557_s27 + $0x98] sm:$0xff]  ;;  %v357_v21 = vld [vmem:[%s7557_s27 + $0xa0] sm:$0xff] }
  0x23   : > { %6937 = vmatprep.mubr.msk.f32.mxu0 %vm393_vm1, %v341_v5  ;;  %v358_v22 = vld [vmem:[%s7557_s27 + $0xa8] sm:$0xff]  ;;  %v359_v23 = vld [vmem:[%s7557_s27 + $0xb0] sm:$0xff]  ;;  %v360_v24 = vld [vmem:[%s7557_s27 + $0xb8] sm:$0xff] }
  0x24   : > { %v361_v25 = vld [vmem:[%s7557_s27 + $0xc0] sm:$0xff]  ;;  %v362_v26 = vld [vmem:[%s7557_s27 + $0xc8] sm:$0xff]  ;;  %v363_v27 = vld [vmem:[%s7557_s27 + $0xd0] sm:$0xff] }
  0x25   : > { %v364_v28 = vld [vmem:[%s7557_s27 + $0xd8] sm:$0xff]  ;;  %v365_v29 = vld [vmem:[%s7557_s27 + $0xe0] sm:$0xff]  ;;  %v366_v30 = vld [vmem:[%s7557_s27 + $0xe8] sm:$0xff] }
  0x26   : > { %6938 = vmatmul.mubr.msk.f32.gmra.mrb[4].mxu0 %vm393_vm1, %v342_v6  ;;  %v367_v31 = vld [vmem:[%s7557_s27 + $0xf0] sm:$0xff]  ;;  %v368_v32 = vld [vmem:[%s7557_s27 + $0xf8] sm:$0xff]  ;;  %v369_v33 = vld [vmem:[%s7557_s27 + $0x100] sm:$0xff] }
  0x27   : > { %6940 = vmatprep.mubr.msk.f32.mxu0 %vm393_vm1, %v343_v7  ;;  %v370_v34 = vld [vmem:[%s7557_s27 + $0x108] sm:$0xff]  ;;  %v371_v35 = vld [vmem:[%s7557_s27 + $0x110] sm:$0xff]  ;;  %v372_v36 = vld [vmem:[%s7557_s27 + $0x118] sm:$0xff] }
  0x28   : > { %v373_v37 = vld [vmem:[%s7557_s27 + $0x120] sm:$0xff]  ;;  %v374_v38 = vld [vmem:[%s7557_s27 + $0x128] sm:$0xff]  ;;  %v375_v39 = vld [vmem:[%s7557_s27 + $0x130] sm:$0xff] }
  0x29   : > { %v376_v40 = vld [vmem:[%s7557_s27 + $0x138] sm:$0xff]  ;;  %v377_v41 = vld [vmem:[%s7557_s27 + $0x140] sm:$0xff]  ;;  %v378_v42 = vld [vmem:[%s7557_s27 + $0x148] sm:$0xff] }
  0x2a   : > { %6941 = vmatmul.mubr.msk.f32.gmra.mrb[6].mxu0 %vm393_vm1, %v344_v8  ;;  %v379_v43 = vld [vmem:[%s7557_s27 + $0x150] sm:$0xff]  ;;  %v380_v44 = vld [vmem:[%s7557_s27 + $0x158] sm:$0xff]  ;;  %v381_v45 = vld [vmem:[%s7557_s27 + $0x160] sm:$0xff] }
  0x2b   : > { %6943 = vmatprep.mubr.msk.f32.mxu0 %vm393_vm1, %v345_v9  ;;  %v382_v46 = vld [vmem:[%s7557_s27 + $0x168] sm:$0xff]  ;;  %v383_v47 = vld [vmem:[%s7557_s27 + $0x170] sm:$0xff]  ;;  %v384_v48 = vld [vmem:[%s7557_s27 + $0x178] sm:$0xff]  ;;  %s326_s27 = sand.u32 1, %s7431_s10  }
  0x2c   : > { %s7313_s29 = smul.u32 24, %s326_s27  ;;  %s9544_s24 = scalar_lea.sflag [#allocation4], %s326_s27 }
  0x2e   : > { %6944 = vmatmul.mubr.msk.f32.gmra.mrb[8].mxu0 %vm393_vm1, %v346_v10 }
  0x2f   : > { %6946 = vmatprep.mubr.msk.f32.mxu0 %vm393_vm1, %v347_v11 }
  0x32   : > { %6947 = vmatmul.mubr.msk.f32.gmra.mrb[10].mxu0 %vm393_vm1, %v348_v12 }
  0x33   : > { %6949 = vmatprep.mubr.msk.f32.mxu0 %vm393_vm1, %v349_v13 }
  0x36   : > { %6950 = vmatmul.mubr.msk.f32.gmra.mrb[12].mxu0 %vm393_vm1, %v350_v14 }
  0x37   : > { %6952 = vmatprep.mubr.msk.f32.mxu0 %vm393_vm1, %v351_v15 }
  0x3a   : > { %6953 = vmatmul.mubr.msk.f32.gmra.mrb[14].mxu0 %vm393_vm1, %v352_v16 }
  0x3b   : > { %6955 = vmatprep.mubr.msk.f32.mxu0 %vm393_vm1, %v353_v17 }
  0x3e   : > { %6956 = vmatmul.mubr.msk.f32.gmra.mrb[16].mxu0 %vm393_vm1, %v354_v18 }
  0x3f   : > { %6958 = vmatprep.mubr.msk.f32.mxu0 %vm393_vm1, %v355_v19 }
  0x42   : > { %6959 = vmatmul.mubr.msk.f32.gmra.mrb[18].mxu0 %vm393_vm1, %v356_v20 }
  0x43   : > { %6961 = vmatprep.mubr.msk.f32.mxu0 %vm393_vm1, %v357_v21 }
  0x46   : > { %6962 = vmatmul.mubr.msk.f32.gmra.mrb[20].mxu0 %vm393_vm1, %v358_v22 }
  0x47   : > { %6964 = vmatprep.mubr.msk.f32.mxu0 %vm393_vm1, %v359_v23 }
  0x4a   : > { %6965 = vmatmul.mubr.msk.f32.gmra.mrb[22].mxu0 %vm393_vm1, %v360_v24 }
  0x4b   : > { %6967 = vmatprep.mubr.msk.f32.mxu0 %vm393_vm1, %v361_v25 }
  0x4e   : > { %6968 = vmatmul.mubr.msk.f32.gmra.mrb[24].mxu0 %vm393_vm1, %v362_v26 }
  0x4f   : > { %6970 = vmatprep.mubr.msk.f32.mxu0 %vm393_vm1, %v363_v27 }
  0x52   : > { %6971 = vmatmul.mubr.msk.f32.gmra.mrb[26].mxu0 %vm393_vm1, %v364_v28 }
  0x53   : > { %6973 = vmatprep.mubr.msk.f32.mxu0 %vm393_vm1, %v365_v29 }
  0x56   : > { %6974 = vmatmul.mubr.msk.f32.gmra.mrb[28].mxu0 %vm393_vm1, %v366_v30 }
  0x57   : > { %6976 = vmatprep.mubr.msk.f32.mxu0 %vm393_vm1, %v367_v31 }
  0x5a   : > { %6977 = vmatmul.mubr.msk.f32.gmra.mrb[30].mxu0 %vm393_vm1, %v368_v32 }
  0x5b   : > { %6979 = vmatprep.mubr.msk.f32.mxu0 %vm393_vm1, %v369_v33 }
  0x5e   : > { %6980 = vmatmul.mubr.msk.f32.gmra.mrb[32].mxu0 %vm393_vm1, %v370_v34 }
  0x5f   : > { %6982 = vmatprep.mubr.msk.f32.mxu0 %vm393_vm1, %v371_v35 }
  0x62   : > { %6983 = vmatmul.mubr.msk.f32.gmra.mrb[34].mxu0 %vm393_vm1, %v372_v36 }
  0x63   : > { %6985 = vmatprep.mubr.msk.f32.mxu0 %vm393_vm1, %v373_v37 }
  0x66   : > { %6986 = vmatmul.mubr.msk.f32.gmra.mrb[36].mxu0 %vm393_vm1, %v374_v38 }
  0x67   : > { %6988 = vmatprep.mubr.msk.f32.mxu0 %vm393_vm1, %v375_v39 }
  0x6a   : > { %6989 = vmatmul.mubr.msk.f32.gmra.mrb[38].mxu0 %vm393_vm1, %v376_v40 }
  0x6b   : > { %6991 = vmatprep.mubr.msk.f32.mxu0 %vm393_vm1, %v377_v41 }
  0x6e   : > { %6992 = vmatmul.mubr.msk.f32.gmra.mrb[40].mxu0 %vm393_vm1, %v378_v42 }
  0x6f   : > { %6994 = vmatprep.mubr.msk.f32.mxu0 %vm393_vm1, %v379_v43 }
  0x72   : > { %6995 = vmatmul.mubr.msk.f32.gmra.mrb[42].mxu0 %vm393_vm1, %v380_v44 }
  0x73   : > { %6997 = vmatprep.mubr.msk.f32.mxu0 %vm393_vm1, %v381_v45 }
  0x76   : > { %6998 = vmatmul.mubr.msk.f32.gmra.mrb[44].mxu0 %vm393_vm1, %v382_v46 }
  0x77   : > { %7000 = vmatprep.mubr.msk.f32.mxu0 %vm393_vm1, %v383_v47 }
  0x7a   : > { %7001 = vmatmul.mubr.msk.f32.gmra.mrb[46].mxu0 %vm393_vm1, %v384_v48 }
  0xf1   : > { %v6933_v55 = vpop.f32.mrb[0].mxu0 }
  0xf2   : > { %v614_v56 = vadd.f32 %v6933_v55, %v7660_v54  ;;  %v608_v58 = vpop.f32.mrb[1].mxu0 }
  0xf3   : > { %v609_v59 = vadd.f32 %v7660_v54, %v608_v58 }
  0xf4   : > { %v848_v60 = vmax.f32 %v614_v56, 0.0 }
  0xf5   : > { %v847_v61 = vmax.f32 %v609_v59, 0.0  ;;  %v6936_v62 = vpop.f32.mrb[2].mxu0 }
  0xf6   : > { %v960_v63 = vcombine.high %v848_v60, %v848_v60  ;;  %v967_v0 = vrot.slane %v848_v60, %v7664_v57  ;;  %v624_v1 = vadd.f32 %v6936_v62, %v7660_v54  ;;  %v618_v2 = vpop.f32.mrb[3].mxu0 }
  0xf7   : > { %v943_v3 = vcombine.high %v847_v61, %v847_v61  ;;  %v950_v4 = vrot.slane %v847_v61, %v7664_v57  ;;  %v7671_v5 = vadd.f32 %v7660_v54, %v618_v2 }
  0xf8   : > { %v974_v6 = vrot.slane %v960_v63, %v7664_v57  ;;  %v975_v7 = vcombine.high %v967_v0, %v967_v0  ;;  %v1980_v8 = vsel %vm1951_vm2, %v967_v0, -inf  ;;  %v7675_v9 = vmax.f32 %v624_v1, 0.0 }
  0xf9   : > { %v1981_v10 = vrot.slane %v1980_v8, 4  ;;  %v957_v11 = vrot.slane %v943_v3, %v7664_v57  ;;  %v958_v12 = vcombine.high %v950_v4, %v950_v4  ;;  %v1952_v13 = vsel %vm1951_vm2, %v950_v4, -inf  ;;  %v7679_v14 = vpop.f32.mrb[4].mxu0 }
  0xfa   : > { %v976_v15 = vcombine.high %v974_v6, %v974_v6  ;;  %v1987_v16 = vsel %vm1951_vm2, %v975_v7, -inf  ;;  %v1994_v17 = vsel %vm1951_vm2, %v974_v6, -inf  ;;  %v1953_v18 = vrot.slane %v1952_v13, 4  ;;  %v7683_v19 = vpop.f32.mrb[5].mxu0 }
  0xfb   : > { %v1982_v20 = vmax.f32 %v1980_v8, %v1981_v10  ;;  %v1988_v21 = vrot.slane %v1987_v16, 4  ;;  %v1995_v22 = vrot.slane %v1994_v17, 4  ;;  %v959_v23 = vcombine.high %v957_v11, %v957_v11 }
  0xfc   : > { %v2001_v24 = vsel %vm1951_vm2, %v976_v15, -inf  ;;  %v1954_v25 = vmax.f32 %v1952_v13, %v1953_v18  ;;  %v1959_v26 = vsel %vm1951_vm2, %v958_v12, -inf  ;;  %v1966_v27 = vsel %vm1951_vm2, %v957_v11, -inf }
  0xfd   : > { %v1983_v28 = vrot.slane %v1982_v20, 2  ;;  %v1989_v29 = vmax.f32 %v1987_v16, %v1988_v21  ;;  %v1996_v30 = vmax.f32 %v1994_v17, %v1995_v22  ;;  %v2002_v31 = vrot.slane %v2001_v24, 4  ;;  %v7688_v32 = vpop.f32.mrb[6].mxu0 }
  0xfe   : > { %v1955_v33 = vrot.slane %v1954_v25, 2  ;;  %v1960_v34 = vrot.slane %v1959_v26, 4  ;;  %v1967_v35 = vrot.slane %v1966_v27, 4  ;;  %v1973_v36 = vsel %vm1951_vm2, %v959_v23, -inf  ;;  %v7691_v37 = vpop.f32.mrb[7].mxu0 }
  0xff   : > { %v1984_v38 = vmax.f32 %v1982_v20, %v1983_v28  ;;  %v1990_v39 = vrot.slane %v1989_v29, 2  ;;  %v1997_v40 = vrot.slane %v1996_v30, 2  ;;  %v2003_v41 = vmax.f32 %v2001_v24, %v2002_v31 }
 0x100   : > { %v1956_v42 = vmax.f32 %v1954_v25, %v1955_v33  ;;  %v1961_v43 = vmax.f32 %v1959_v26, %v1960_v34  ;;  %v1968_v44 = vmax.f32 %v1966_v27, %v1967_v35  ;;  %v1974_v45 = vrot.slane %v1973_v36, 4 }
 0x101   : > { %v1985_v46 = vrot.slane %v1984_v38, 1  ;;  %v1991_v47 = vmax.f32 %v1989_v29, %v1990_v39  ;;  %v1998_v48 = vmax.f32 %v1996_v30, %v1997_v40  ;;  %v2004_v49 = vrot.slane %v2003_v41, 2  ;;  %v7693_v50 = vpop.f32.mrb[8].mxu0 }
 0x102   : > { %v1957_v51 = vrot.slane %v1956_v42, 1  ;;  %v1962_v52 = vrot.slane %v1961_v43, 2  ;;  %v1969_v55 = vrot.slane %v1968_v44, 2  ;;  %v1975_v56 = vmax.f32 %v1973_v36, %v1974_v45  ;;  %v7695_v58 = vpop.f32.mrb[9].mxu0 }
 0x103   : > { %v1986_v59 = vmax.f32 %v1984_v38, %v1985_v46  ;;  %v1992_v60 = vrot.slane %v1991_v47, 1  ;;  %v1999_v61 = vrot.slane %v1998_v48, 1  ;;  %v2005_v62 = vmax.f32 %v2003_v41, %v2004_v49 }
 0x104   : > { %v1958_v63 = vmax.f32 %v1956_v42, %v1957_v51  ;;  %v1963_v0 = vmax.f32 %v1961_v43, %v1962_v52  ;;  %v1970_v1 = vmax.f32 %v1968_v44, %v1969_v55  ;;  %v1976_v2 = vrot.slane %v1975_v56, 2 }
 0x105   : > { %v1993_v3 = vmax.f32 %v1991_v47, %v1992_v60  ;;  %v2000_v4 = vmax.f32 %v1998_v48, %v1999_v61  ;;  %v2006_v6 = vrot.slane %v2005_v62, 1  ;;  %v994_v7 = vcombine.high %v7675_v9, %v7675_v9  ;;  %v7699_v8 = vpop.f32.mrb[10].mxu0 }
 0x106   : > { %v1964_v10 = vrot.slane %v1963_v0, 1  ;;  %v1971_v11 = vrot.slane %v1970_v1, 1  ;;  %v1977_v12 = vmax.f32 %v1975_v56, %v1976_v2  ;;  %v1001_v13 = vrot.slane %v7675_v9, %v7664_v57  ;;  %v7703_v15 = vpop.f32.mrb[11].mxu0 }
 0x107   : > { %v2007_v16 = vmax.f32 %v2005_v62, %v2006_v6  ;;  %v1008_v17 = vrot.slane %v994_v7, %v7664_v57  ;;  %v849_v18 = vmax.f32 %v7671_v5, 0.0  ;;  %v7709_v20 = vadd.f32 %v7679_v14, %v7660_v54 }
 0x108   : > { %v1965_v21 = vmax.f32 %v1963_v0, %v1964_v10  ;;  %v1972_v22 = vmax.f32 %v1970_v1, %v1971_v11  ;;  %v1978_v23 = vrot.slane %v1977_v12, 1  ;;  %v1009_v24 = vcombine.high %v1001_v13, %v1001_v13 }
 0x109   : > { %v1010_v25 = vcombine.high %v1008_v17, %v1008_v17  ;;  %v2036_v26 = vsel %vm1951_vm2, %v1001_v13, -inf  ;;  %v2050_v9 = vsel %vm1951_vm2, %v1008_v17, -inf  ;;  %v977_v27 = vcombine.high %v849_v18, %v849_v18  ;;  %v7713_v28 = vpop.f32.mrb[12].mxu0 }
 0x10a   : > { %v1979_v29 = vmax.f32 %v1977_v12, %v1978_v23  ;;  %v3538_v30 = vsel %vm3537_vm3, %v1965_v21, %v1958_v63  ;;  %v2037_v5 = vrot.slane %v2036_v26, 4  ;;  %v2043_v31 = vsel %vm1951_vm2, %v1009_v24, -inf  ;;  %v7717_v14 = vpop.f32.mrb[13].mxu0 }
 0x10b   : > { %v3540_v33 = vsel %vm3539_vm4, %v1972_v22, %v3538_v30  ;;  %v2044_v34 = vrot.slane %v2043_v31, 4  ;;  %v2051_v35 = vrot.slane %v2050_v9, 4  ;;  %v2057_v36 = vsel %vm1951_vm2, %v1010_v25, -inf }
 0x10c   : > { %v3542_v38 = vsel %vm3541_vm5, %v1979_v29, %v3540_v33  ;;  %v2038_v39 = vmax.f32 %v2036_v26, %v2037_v5  ;;  %v2058_v40 = vrot.slane %v2057_v36, 4  ;;  %v984_v41 = vrot.slane %v849_v18, %v7664_v57 }
 0x10d   : > { %v3544_v42 = vsel %vm3543_vm6, %v1986_v59, %v3542_v38  ;;  %v2045_v43 = vmax.f32 %v2043_v31, %v2044_v34  ;;  %v2052_v44 = vmax.f32 %v2050_v9, %v2051_v35  ;;  %v991_v45 = vrot.slane %v977_v27, %v7664_v57  ;;  %v7725_v46 = vpop.f32.mrb[14].mxu0 }
 0x10e   : > { %v3546_v47 = vsel %vm3545_vm7, %v1993_v3, %v3544_v42  ;;  %v2039_v48 = vrot.slane %v2038_v39, 2  ;;  %v2059_v49 = vmax.f32 %v2057_v36, %v2058_v40  ;;  %v992_v51 = vcombine.high %v984_v41, %v984_v41  ;;  %v7728_v52 = vpop.f32.mrb[15].mxu0 }
 0x10f   : > { %v3548_v55 = vsel %vm3547_vm8, %v2000_v4, %v3546_v47  ;;  %v2046_v56 = vrot.slane %v2045_v43, 2  ;;  %v2053_v60 = vrot.slane %v2052_v44, 2  ;;  %v993_v61 = vcombine.high %v991_v45, %v991_v45 }
 0x110   : > { %v3550_v59 = vsel %vm3549_vm9, %v2007_v16, %v3548_v55  ;;  %v2040_v62 = vmax.f32 %v2038_v39, %v2039_v48  ;;  %v2060_v63 = vrot.slane %v2059_v49, 2  ;;  %v2008_v0 = vsel %vm1951_vm2, %v984_v41, -inf }
 0x111   : > { %3737 = vst.msk [vmem:[#allocation2 + $0x1] sm:$0xff] %vm3736_vm10, %v3550_v59  ;;  %v2047_v1 = vmax.f32 %v2045_v43, %v2046_v56  ;;  %v2054_v2 = vmax.f32 %v2052_v44, %v2053_v60  ;;  %v2009_v3 = vrot.slane %v2008_v0, 4  ;;  %v2015_v6 = vsel %vm1951_vm2, %v992_v51, -inf  ;;  %v7735_v7 = vpop.f32.mrb[16].mxu0 }
 0x112   : > { %v2041_v10 = vrot.slane %v2040_v62, 1  ;;  %v2061_v4 = vmax.f32 %v2059_v49, %v2060_v63  ;;  %v2016_v11 = vrot.slane %v2015_v6, 4  ;;  %v2022_v12 = vsel %vm1951_vm2, %v991_v45, -inf  ;;  %v7738_v13 = vpop.f32.mrb[17].mxu0 }
 0x113   : > { %v2048_v16 = vrot.slane %v2047_v1, 1  ;;  %v2055_v17 = vrot.slane %v2054_v2, 1  ;;  %v2010_v18 = vmax.f32 %v2008_v0, %v2009_v3  ;;  %v2023_v21 = vrot.slane %v2022_v12, 4 }
 0x114   : > { %v7740_v22 = vmax.f32 %v2040_v62, %v2041_v10  ;;  %v2062_v23 = vrot.slane %v2061_v4, 1  ;;  %v2017_v24 = vmax.f32 %v2015_v6, %v2016_v11  ;;  %v2029_v25 = vsel %vm1951_vm2, %v993_v61, -inf }
 0x115   : > { %v7743_v26 = vmax.f32 %v2047_v1, %v2048_v16  ;;  %v7745_v9 = vmax.f32 %v2054_v2, %v2055_v17  ;;  %v2011_v27 = vrot.slane %v2010_v18, 2  ;;  %v2024_v29 = vmax.f32 %v2022_v12, %v2023_v21  ;;  %v7747_v30 = vpop.f32.mrb[18].mxu0 }
 0x116   : > { %v7749_v5 = vmax.f32 %v2061_v4, %v2062_v23  ;;  %v2018_v31 = vrot.slane %v2017_v24, 2  ;;  %v2030_v33 = vrot.slane %v2029_v25, 4  ;;  %v852_v34 = vmax.f32 %v7709_v20, 0.0  ;;  %v7761_v61 = vpop.f32.mrb[19].mxu0 }
 0x117   : > { %v2012_v35 = vmax.f32 %v2010_v18, %v2011_v27  ;;  %v2025_v36 = vrot.slane %v2024_v29, 2  ;;  %v629_v38 = vadd.f32 %v7660_v54, %v7683_v19  ;;  %v644_v39 = vadd.f32 %v7688_v32, %v7660_v54 }
 0x118   : > { %v2019_v40 = vmax.f32 %v2017_v24, %v2018_v31  ;;  %v2031_v41 = vmax.f32 %v2029_v25, %v2030_v33  ;;  %v1028_v42 = vcombine.high %v852_v34, %v852_v34  ;;  %v1035_v43 = vrot.slane %v852_v34, %v7664_v57 }
 0x119   : > { %v2013_v44 = vrot.slane %v2012_v35, 1  ;;  %v2026_v45 = vmax.f32 %v2024_v29, %v2025_v36  ;;  %v851_v47 = vmax.f32 %v629_v38, 0.0  ;;  %v7757_v48 = vmax.f32 %v644_v39, 0.0 }
 0x11a   : > { %v2020_v49 = vrot.slane %v2019_v40, 1  ;;  %v2032_v20 = vrot.slane %v2031_v41, 2  ;;  %v1042_v51 = vrot.slane %v1028_v42, %v7664_v57  ;;  %v1043_v55 = vcombine.high %v1035_v43, %v1035_v43 }
 0x11b   : > { %v2014_v56 = vmax.f32 %v2012_v35, %v2013_v44  ;;  %v2027_v19 = vrot.slane %v2026_v45, 1  ;;  %v2092_v60 = vsel %vm1951_vm2, %v1035_v43, -inf  ;;  %v1011_v32 = vcombine.high %v851_v47, %v851_v47 }
 0x11c   : > { %v2021_v59 = vmax.f32 %v2019_v40, %v2020_v49  ;;  %v2033_v62 = vmax.f32 %v2031_v41, %v2032_v20  ;;  %v1044_v63 = vcombine.high %v1042_v51, %v1042_v51  ;;  %v2093_v0 = vrot.slane %v2092_v60, 4 }
 0x11d   : > { %v2028_v1 = vmax.f32 %v2026_v45, %v2027_v19  ;;  %v2099_v2 = vsel %vm1951_vm2, %v1043_v55, -inf  ;;  %v2106_v3 = vsel %vm1951_vm2, %v1042_v51, -inf  ;;  %v1018_v6 = vrot.slane %v851_v47, %v7664_v57  ;;  %v3787_v19 = vld [vmem:[#allocation2 + $0x1] sm:$0xff] }
 0x11e   : > { %v2034_v10 = vrot.slane %v2033_v62, 1  ;;  %v3551_v4 = vsel %vm3537_vm3, %v2021_v59, %v2014_v56  ;;  %v2094_v11 = vmax.f32 %v2092_v60, %v2093_v0  ;;  %v2100_v12 = vrot.slane %v2099_v2, 4  ;;  %7007 = vmatprep.mubr.msk.f32.mxu1 %vm3736_vm10, %v3787_v19 }
 0x11f   : > { %v3552_v16 = vsel %vm3539_vm4, %v2028_v1, %v3551_v4  ;;  %v2107_v17 = vrot.slane %v2106_v3, 4  ;;  %v2113_v18 = vsel %vm1951_vm2, %v1044_v63, -inf  ;;  %v1025_v21 = vrot.slane %v1011_v32, %v7664_v57 }
 0x120   : > { %v2035_v23 = vmax.f32 %v2033_v62, %v2034_v10  ;;  %v2095_v24 = vrot.slane %v2094_v11, 2  ;;  %v2101_v25 = vmax.f32 %v2099_v2, %v2100_v12  ;;  %v2114_v27 = vrot.slane %v2113_v18, 4 }
 0x121   : > { %v2108_v29 = vmax.f32 %v2106_v3, %v2107_v17  ;;  %v1026_v31 = vcombine.high %v1018_v6, %v1018_v6  ;;  %v1027_v33 = vcombine.high %v1025_v21, %v1025_v21  ;;  %v2064_v34 = vsel %vm1951_vm2, %v1018_v6, -inf }
 0x122   : > { %v3553_v35 = vsel %vm3541_vm5, %v2035_v23, %v3552_v16  ;;  %v2096_v36 = vmax.f32 %v2094_v11, %v2095_v24  ;;  %v2102_v38 = vrot.slane %v2101_v25, 2  ;;  %v2115_v39 = vmax.f32 %v2113_v18, %v2114_v27 }
 0x123   : > { %v3554_v40 = vsel %vm3543_vm6, %v7740_v22, %v3553_v35  ;;  %v2109_v41 = vrot.slane %v2108_v29, 2  ;;  %v2065_v42 = vrot.slane %v2064_v34, 4  ;;  %v2071_v43 = vsel %vm1951_vm2, %v1026_v31, -inf }
 0x124   : > { %v3555_v44 = vsel %vm3545_vm7, %v7743_v26, %v3554_v40  ;;  %v2097_v45 = vrot.slane %v2096_v36, 1  ;;  %v2103_v47 = vmax.f32 %v2101_v25, %v2102_v38  ;;  %v2116_v49 = vrot.slane %v2115_v39, 2 }
 0x125   : > { %v3556_v20 = vsel %vm3547_vm8, %v7745_v9, %v3555_v44  ;;  %v2110_v51 = vmax.f32 %v2108_v29, %v2109_v41  ;;  %v2066_v55 = vmax.f32 %v2064_v34, %v2065_v42  ;;  %v2072_v56 = vrot.slane %v2071_v43, 4 }
 0x126   : > { %v3557_v22 = vsel %vm3549_vm9, %v7749_v5, %v3556_v20  ;;  %v7781_v60 = vmax.f32 %v2096_v36, %v2097_v45  ;;  %v2104_v32 = vrot.slane %v2103_v47, 1  ;;  %v2117_v59 = vmax.f32 %v2115_v39, %v2116_v49  ;;  %v7789_v5 = vpop.f32.mrb[20].mxu0 }
 0x127   : > { %3738 = vst.msk [vmem:[#allocation2 + $0x11] sm:$0xff] %vm3736_vm10, %v3557_v22  ;;  %v2111_v26 = vrot.slane %v2110_v51, 1  ;;  %v2067_v62 = vrot.slane %v2066_v55, 2  ;;  %v2073_v63 = vmax.f32 %v2071_v43, %v2072_v56  ;;  %v2078_v9 = vsel %vm1951_vm2, %v1025_v21, -inf }
 0x128   : > { %v7786_v0 = vmax.f32 %v2103_v47, %v2104_v32  ;;  %v2118_v1 = vrot.slane %v2117_v59, 1  ;;  %v2079_v2 = vrot.slane %v2078_v9, 4  ;;  %v2085_v3 = vsel %vm1951_vm2, %v1027_v33, -inf }
 0x129   : > { %v2112_v6 = vmax.f32 %v2110_v51, %v2111_v26  ;;  %v2068_v10 = vmax.f32 %v2066_v55, %v2067_v62  ;;  %v2074_v4 = vrot.slane %v2073_v63, 2  ;;  %v2086_v11 = vrot.slane %v2085_v3, 4  ;;  %v7802_v51 = vpop.f32.mrb[21].mxu0 }
 0x12a   : > { %v2119_v12 = vmax.f32 %v2117_v59, %v2118_v1  ;;  %v2080_v16 = vmax.f32 %v2078_v9, %v2079_v2  ;;  %v1062_v17 = vcombine.high %v7757_v48, %v7757_v48  ;;  %v1069_v18 = vrot.slane %v7757_v48, %v7664_v57 }
 0x12b   : > { %v2069_v21 = vrot.slane %v2068_v10, 1  ;;  %v2075_v23 = vmax.f32 %v2073_v63, %v2074_v4  ;;  %v2087_v24 = vmax.f32 %v2085_v3, %v2086_v11  ;;  %v639_v25 = vadd.f32 %v7660_v54, %v7691_v37 }
 0x12c   : > { %v2081_v27 = vrot.slane %v2080_v16, 2  ;;  %v1076_v29 = vrot.slane %v1062_v17, %v7664_v57  ;;  %v1077_v31 = vcombine.high %v1069_v18, %v1069_v18  ;;  %v2148_v33 = vsel %vm1951_vm2, %v1069_v18, -inf }
 0x12d   : > { %v2070_v34 = vmax.f32 %v2068_v10, %v2069_v21  ;;  %v2076_v35 = vrot.slane %v2075_v23, 1  ;;  %v2088_v36 = vrot.slane %v2087_v24, 2  ;;  %v2149_v38 = vrot.slane %v2148_v33, 4 }
 0x12e   : > { %v2082_v39 = vmax.f32 %v2080_v16, %v2081_v27  ;;  %v1078_v40 = vcombine.high %v1076_v29, %v1076_v29  ;;  %v2155_v48 = vsel %vm1951_vm2, %v1077_v31, -inf  ;;  %v2162_v41 = vsel %vm1951_vm2, %v1076_v29, -inf }
 0x12f   : > { %v2077_v42 = vmax.f32 %v2075_v23, %v2076_v35  ;;  %v2089_v43 = vmax.f32 %v2087_v24, %v2088_v36  ;;  %v2150_v44 = vmax.f32 %v2148_v33, %v2149_v38  ;;  %v2156_v37 = vrot.slane %v2155_v48, 4 }
 0x130   : > { %v2083_v45 = vrot.slane %v2082_v39, 1  ;;  %v2163_v47 = vrot.slane %v2162_v41, 4  ;;  %v2169_v49 = vsel %vm1951_vm2, %v1078_v40, -inf  ;;  %v853_v20 = vmax.f32 %v639_v25, 0.0 }
 0x131   : > { %v2090_v55 = vrot.slane %v2089_v43, 1  ;;  %v3558_v56 = vsel %vm3537_vm3, %v2077_v42, %v2070_v34  ;;  %v2151_v19 = vrot.slane %v2150_v44, 2  ;;  %v2157_v22 = vmax.f32 %v2155_v48, %v2156_v37 }
 0x132   : > { %v2084_v32 = vmax.f32 %v2082_v39, %v2083_v45  ;;  %v2164_v59 = vmax.f32 %v2162_v41, %v2163_v47  ;;  %v2170_v26 = vrot.slane %v2169_v49, 4  ;;  %v1045_v62 = vcombine.high %v853_v20, %v853_v20  ;;  %v7830_v47 = vpop.f32.mrb[22].mxu0 }
 0x133   : > { %v2091_v63 = vmax.f32 %v2089_v43, %v2090_v55  ;;  %v2152_v9 = vmax.f32 %v2150_v44, %v2151_v19  ;;  %v2158_v1 = vrot.slane %v2157_v22, 2  ;;  %v1052_v2 = vrot.slane %v853_v20, %v7664_v57 }
 0x134   : > { %v3559_v3 = vsel %vm3539_vm4, %v2084_v32, %v3558_v56  ;;  %v2165_v10 = vrot.slane %v2164_v59, 2  ;;  %v2171_v4 = vmax.f32 %v2169_v49, %v2170_v26  ;;  %v1059_v11 = vrot.slane %v1045_v62, %v7664_v57 }
 0x135   : > { %v3560_v16 = vsel %vm3541_vm5, %v2091_v63, %v3559_v3  ;;  %v2153_v17 = vrot.slane %v2152_v9, 1  ;;  %v2159_v18 = vmax.f32 %v2157_v22, %v2158_v1  ;;  %v1060_v21 = vcombine.high %v1052_v2, %v1052_v2 }
 0x136   : > { %v3561_v23 = vsel %vm3543_vm6, %v7781_v60, %v3560_v16  ;;  %v2166_v24 = vmax.f32 %v2164_v59, %v2165_v10  ;;  %v2172_v25 = vrot.slane %v2171_v4, 2  ;;  %v1061_v27 = vcombine.high %v1059_v11, %v1059_v11 }
 0x137   : > { %v3562_v29 = vsel %vm3545_vm7, %v7786_v0, %v3561_v23  ;;  %v7813_v31 = vmax.f32 %v2152_v9, %v2153_v17  ;;  %v2160_v33 = vrot.slane %v2159_v18, 1  ;;  %v2120_v34 = vsel %vm1951_vm2, %v1052_v2, -inf }
 0x138   : > { %v3563_v35 = vsel %vm3547_vm8, %v2112_v6, %v3562_v29  ;;  %v2167_v36 = vrot.slane %v2166_v24, 1  ;;  %v2173_v38 = vmax.f32 %v2171_v4, %v2172_v25  ;;  %v2121_v39 = vrot.slane %v2120_v34, 4  ;;  %v7846_v25 = vpop.f32.mrb[23].mxu0 }
 0x139   : > { %v3564_v40 = vsel %vm3549_vm9, %v2119_v12, %v3563_v35  ;;  %v7818_v48 = vmax.f32 %v2159_v18, %v2160_v33  ;;  %v2127_v60 = vsel %vm1951_vm2, %v1060_v21, -inf  ;;  %v2134_v41 = vsel %vm1951_vm2, %v1059_v11, -inf }
 0x13a   : > { %3739 = vst.msk [vmem:[#allocation2 + $0x21] sm:$0xff] %vm3736_vm10, %v3564_v40  ;;  %v7823_v0 = vmax.f32 %v2166_v24, %v2167_v36  ;;  %v2174_v42 = vrot.slane %v2173_v38, 1  ;;  %v2122_v43 = vmax.f32 %v2120_v34, %v2121_v39  ;;  %v2128_v44 = vrot.slane %v2127_v60, 4 }
 0x13b   : > { %v2135_v37 = vrot.slane %v2134_v41, 4  ;;  %v2141_v6 = vsel %vm1951_vm2, %v1061_v27, -inf  ;;  %v654_v45 = vadd.f32 %v7693_v50, %v7660_v54  ;;  %v649_v12 = vadd.f32 %v7660_v54, %v7695_v58 }
 0x13c   : > { %v7832_v49 = vmax.f32 %v2173_v38, %v2174_v42  ;;  %v2123_v20 = vrot.slane %v2122_v43, 2  ;;  %v2129_v55 = vmax.f32 %v2127_v60, %v2128_v44  ;;  %v2142_v56 = vrot.slane %v2141_v6, 4 }
 0x13d   : > { %v2136_v19 = vmax.f32 %v2134_v41, %v2135_v37  ;;  %v856_v22 = vmax.f32 %v654_v45, 0.0  ;;  %v855_v32 = vmax.f32 %v649_v12, 0.0  ;;  %v7836_v59 = vadd.f32 %v7699_v8, %v7660_v54 }
 0x13e   : > { %v2124_v26 = vmax.f32 %v2122_v43, %v2123_v20  ;;  %v2130_v62 = vrot.slane %v2129_v55, 2  ;;  %v2143_v50 = vmax.f32 %v2141_v6, %v2142_v56  ;;  %v7840_v58 = vadd.f32 %v7660_v54, %v7703_v15 }
 0x13f   : > { %v2137_v63 = vrot.slane %v2136_v19, 2  ;;  %v1096_v9 = vcombine.high %v856_v22, %v856_v22  ;;  %v1103_v1 = vrot.slane %v856_v22, %v7664_v57  ;;  %v1079_v2 = vcombine.high %v855_v32, %v855_v32 }
 0x140   : > { %v2125_v3 = vrot.slane %v2124_v26, 1  ;;  %v2131_v10 = vmax.f32 %v2129_v55, %v2130_v62  ;;  %v2144_v4 = vrot.slane %v2143_v50, 2  ;;  %v1086_v11 = vrot.slane %v855_v32, %v7664_v57 }
 0x141   : > { %v2138_v16 = vmax.f32 %v2136_v19, %v2137_v63  ;;  %v1110_v8 = vrot.slane %v1096_v9, %v7664_v57  ;;  %v1111_v17 = vcombine.high %v1103_v1, %v1103_v1  ;;  %v2204_v18 = vsel %vm1951_vm2, %v1103_v1, -inf }
 0x142   : > { %v2126_v21 = vmax.f32 %v2124_v26, %v2125_v3  ;;  %v2132_v23 = vrot.slane %v2131_v10, 1  ;;  %v2145_v15 = vmax.f32 %v2143_v50, %v2144_v4  ;;  %v2205_v24 = vrot.slane %v2204_v18, 4 }
 0x143   : > { %v2139_v27 = vrot.slane %v2138_v16, 1  ;;  %v1112_v29 = vcombine.high %v1110_v8, %v1110_v8  ;;  %v2211_v33 = vsel %vm1951_vm2, %v1111_v17, -inf  ;;  %v2218_v34 = vsel %vm1951_vm2, %v1110_v8, -inf }
 0x144   : > { %v2133_v35 = vmax.f32 %v2131_v10, %v2132_v23  ;;  %v2146_v36 = vrot.slane %v2145_v15, 1  ;;  %v2206_v38 = vmax.f32 %v2204_v18, %v2205_v24  ;;  %v2212_v39 = vrot.slane %v2211_v33, 4 }
 0x145   : > { %v2140_v40 = vmax.f32 %v2138_v16, %v2139_v27  ;;  %v2219_v60 = vrot.slane %v2218_v34, 4  ;;  %v2225_v41 = vsel %vm1951_vm2, %v1112_v29, -inf  ;;  %v1093_v42 = vrot.slane %v1079_v2, %v7664_v57 }
 0x146   : > { %v2147_v43 = vmax.f32 %v2145_v15, %v2146_v36  ;;  %v3565_v44 = vsel %vm3537_vm3, %v2133_v35, %v2126_v21  ;;  %v2207_v37 = vrot.slane %v2206_v38, 2  ;;  %v2213_v6 = vmax.f32 %v2211_v33, %v2212_v39  ;;  %v7872_v33 = vpop.f32.mrb[24].mxu0 }
 0x147   : > { %v3566_v45 = vsel %vm3539_vm4, %v2140_v40, %v3565_v44  ;;  %v2220_v12 = vmax.f32 %v2218_v34, %v2219_v60  ;;  %v2226_v20 = vrot.slane %v2225_v41, 4  ;;  %v1094_v55 = vcombine.high %v1086_v11, %v1086_v11 }
 0x148   : > { %v3567_v56 = vsel %vm3541_vm5, %v2147_v43, %v3566_v45  ;;  %v2208_v19 = vmax.f32 %v2206_v38, %v2207_v37  ;;  %v2214_v22 = vrot.slane %v2213_v6, 2  ;;  %v1095_v32 = vcombine.high %v1093_v42, %v1093_v42 }
 0x149   : > { %v3568_v26 = vsel %vm3543_vm6, %v7813_v31, %v3567_v56  ;;  %v2221_v62 = vrot.slane %v2220_v12, 2  ;;  %v2227_v50 = vmax.f32 %v2225_v41, %v2226_v20  ;;  %v2176_v63 = vsel %vm1951_vm2, %v1086_v11, -inf }
 0x14a   : > { %v3569_v9 = vsel %vm3545_vm7, %v7818_v48, %v3568_v26  ;;  %v2209_v1 = vrot.slane %v2208_v19, 1  ;;  %v2215_v2 = vmax.f32 %v2213_v6, %v2214_v22  ;;  %v2177_v3 = vrot.slane %v2176_v63, 4 }
 0x14b   : > { %v3570_v10 = vsel %vm3547_vm8, %v7823_v0, %v3569_v9  ;;  %v2222_v4 = vmax.f32 %v2220_v12, %v2221_v62  ;;  %v2228_v16 = vrot.slane %v2227_v50, 2  ;;  %v2183_v8 = vsel %vm1951_vm2, %v1094_v55, -inf }
 0x14c   : > { %v3571_v31 = vsel %vm3549_vm9, %v7832_v49, %v3570_v10  ;;  %v7865_v17 = vmax.f32 %v2208_v19, %v2209_v1  ;;  %v2216_v18 = vrot.slane %v2215_v2, 1  ;;  %v2178_v11 = vmax.f32 %v2176_v63, %v2177_v3  ;;  %v7886_v3 = vpop.f32.mrb[25].mxu0 }
 0x14d   : > { %3740 = vst.msk [vmem:[#allocation2 + $0x31] sm:$0xff] %vm3736_vm10, %v3571_v31  ;;  %v2223_v48 = vrot.slane %v2222_v4, 1  ;;  %v2229_v21 = vmax.f32 %v2227_v50, %v2228_v16  ;;  %v2184_v23 = vrot.slane %v2183_v8, 4  ;;  %v2190_v15 = vsel %vm1951_vm2, %v1093_v42, -inf }
 0x14e   : > { %v7869_v24 = vmax.f32 %v2215_v2, %v2216_v18  ;;  %v2179_v0 = vrot.slane %v2178_v11, 2  ;;  %v2191_v27 = vrot.slane %v2190_v15, 4  ;;  %v2197_v29 = vsel %vm1951_vm2, %v1095_v32, -inf }
 0x14f   : > { %v2224_v49 = vmax.f32 %v2222_v4, %v2223_v48  ;;  %v2230_v34 = vrot.slane %v2229_v21, 1  ;;  %v2185_v35 = vmax.f32 %v2183_v8, %v2184_v23  ;;  %v2198_v36 = vrot.slane %v2197_v29, 4 }
 0x150   : > { %v2180_v38 = vmax.f32 %v2178_v11, %v2179_v0  ;;  %v2192_v39 = vmax.f32 %v2190_v15, %v2191_v27  ;;  %v858_v40 = vmax.f32 %v7836_v59, 0.0  ;;  %v857_v60 = vmax.f32 %v7840_v58, 0.0 }
 0x151   : > { %v2231_v41 = vmax.f32 %v2229_v21, %v2230_v34  ;;  %v2186_v42 = vrot.slane %v2185_v35, 2  ;;  %v2199_v43 = vmax.f32 %v2197_v29, %v2198_v36  ;;  %v7878_v44 = vadd.f32 %v7713_v28, %v7660_v54 }
 0x152   : > { %v2181_v37 = vrot.slane %v2180_v38, 1  ;;  %v2193_v6 = vrot.slane %v2192_v39, 2  ;;  %v1130_v45 = vcombine.high %v858_v40, %v858_v40  ;;  %v1137_v12 = vrot.slane %v858_v40, %v7664_v57 }
 0x153   : > { %v2187_v20 = vmax.f32 %v2185_v35, %v2186_v42  ;;  %v2200_v55 = vrot.slane %v2199_v43, 2  ;;  %v1113_v56 = vcombine.high %v857_v60, %v857_v60  ;;  %v1120_v19 = vrot.slane %v857_v60, %v7664_v57 }
 0x154   : > { %v2182_v59 = vmax.f32 %v2180_v38, %v2181_v37  ;;  %v2194_v22 = vmax.f32 %v2192_v39, %v2193_v6  ;;  %v1144_v58 = vrot.slane %v1130_v45, %v7664_v57  ;;  %v1145_v32 = vcombine.high %v1137_v12, %v1137_v12 }
 0x155   : > { %v2188_v26 = vrot.slane %v2187_v20, 1  ;;  %v2201_v62 = vmax.f32 %v2199_v43, %v2200_v55  ;;  %v2260_v28 = vsel %vm1951_vm2, %v1137_v12, -inf  ;;  %v1127_v50 = vrot.slane %v1113_v56, %v7664_v57 }
 0x156   : > { %v2195_v63 = vrot.slane %v2194_v22, 1  ;;  %v1146_v9 = vcombine.high %v1144_v58, %v1144_v58  ;;  %v2261_v1 = vrot.slane %v2260_v28, 4  ;;  %v2267_v2 = vsel %vm1951_vm2, %v1145_v32, -inf }
 0x157   : > { %v2189_v10 = vmax.f32 %v2187_v20, %v2188_v26  ;;  %v2202_v4 = vrot.slane %v2201_v62, 1  ;;  %v2268_v16 = vrot.slane %v2267_v2, 4  ;;  %v2274_v8 = vsel %vm1951_vm2, %v1144_v58, -inf }
 0x158   : > { %v2196_v31 = vmax.f32 %v2194_v22, %v2195_v63  ;;  %v2262_v18 = vmax.f32 %v2260_v28, %v2261_v1  ;;  %v2275_v11 = vrot.slane %v2274_v8, 4  ;;  %v2281_v48 = vsel %vm1951_vm2, %v1146_v9, -inf }
 0x159   : > { %v2203_v21 = vmax.f32 %v2201_v62, %v2202_v4  ;;  %v3572_v23 = vsel %vm3537_vm3, %v2189_v10, %v2182_v59  ;;  %v2269_v15 = vmax.f32 %v2267_v2, %v2268_v16  ;;  %v2282_v0 = vrot.slane %v2281_v48, 4 }
 0x15a   : > { %v3573_v27 = vsel %vm3539_vm4, %v2196_v31, %v3572_v23  ;;  %v2263_v29 = vrot.slane %v2262_v18, 2  ;;  %v2276_v34 = vmax.f32 %v2274_v8, %v2275_v11  ;;  %v1128_v35 = vcombine.high %v1120_v19, %v1120_v19  ;;  %v7913_v11 = vpop.f32.mrb[26].mxu0 }
 0x15b   : > { %v3574_v36 = vsel %vm3541_vm5, %v2203_v21, %v3573_v27  ;;  %v2270_v38 = vrot.slane %v2269_v15, 2  ;;  %v2283_v39 = vmax.f32 %v2281_v48, %v2282_v0  ;;  %v1129_v40 = vcombine.high %v1127_v50, %v1127_v50 }
 0x15c   : > { %v3575_v60 = vsel %vm3543_vm6, %v7865_v17, %v3574_v36  ;;  %v2264_v42 = vmax.f32 %v2262_v18, %v2263_v29  ;;  %v2277_v43 = vrot.slane %v2276_v34, 2  ;;  %v2232_v37 = vsel %vm1951_vm2, %v1120_v19, -inf }
 0x15d   : > { %v3576_v6 = vsel %vm3545_vm7, %v7869_v24, %v3575_v60  ;;  %v2271_v45 = vmax.f32 %v2269_v15, %v2270_v38  ;;  %v2284_v12 = vrot.slane %v2283_v39, 2  ;;  %v2233_v20 = vrot.slane %v2232_v37, 4 }
 0x15e   : > { %v3577_v55 = vsel %vm3547_vm8, %v2224_v49, %v3576_v6  ;;  %v2265_v56 = vrot.slane %v2264_v42, 1  ;;  %v2278_v59 = vmax.f32 %v2276_v34, %v2277_v43  ;;  %v2239_v22 = vsel %vm1951_vm2, %v1128_v35, -inf }
 0x15f   : > { %v3578_v58 = vsel %vm3549_vm9, %v2231_v41, %v3577_v55  ;;  %v2272_v32 = vrot.slane %v2271_v45, 1  ;;  %v2285_v17 = vmax.f32 %v2283_v39, %v2284_v12  ;;  %v2234_v26 = vmax.f32 %v2232_v37, %v2233_v20 }
 0x160   : > { %3741 = vst.msk [vmem:[#allocation2 + $0x41] sm:$0xff] %vm3736_vm10, %v3578_v58  ;;  %v7902_v19 = vmax.f32 %v2264_v42, %v2265_v56  ;;  %v2279_v62 = vrot.slane %v2278_v59, 1  ;;  %v2240_v24 = vrot.slane %v2239_v22, 4  ;;  %v2246_v28 = vsel %vm1951_vm2, %v1127_v50, -inf  ;;  %v7922_v42 = vpop.f32.mrb[27].mxu0 }
 0x161   : > { %v7905_v63 = vmax.f32 %v2271_v45, %v2272_v32  ;;  %v2286_v49 = vrot.slane %v2285_v17, 1  ;;  %v2235_v9 = vrot.slane %v2234_v26, 2  ;;  %v2247_v1 = vrot.slane %v2246_v28, 4 }
 0x162   : > { %v7907_v2 = vmax.f32 %v2278_v59, %v2279_v62  ;;  %v2241_v10 = vmax.f32 %v2239_v22, %v2240_v24  ;;  %v2253_v41 = vsel %vm1951_vm2, %v1129_v40, -inf  ;;  %v860_v4 = vmax.f32 %v7878_v44, 0.0 }
 0x163   : > { %v7911_v16 = vmax.f32 %v2285_v17, %v2286_v49  ;;  %v2236_v8 = vmax.f32 %v2234_v26, %v2235_v9  ;;  %v2248_v31 = vmax.f32 %v2246_v28, %v2247_v1  ;;  %v2254_v18 = vrot.slane %v2253_v41, 4 }
 0x164   : > { %v2242_v50 = vrot.slane %v2241_v10, 2  ;;  %v1164_v48 = vcombine.high %v860_v4, %v860_v4  ;;  %v1171_v21 = vrot.slane %v860_v4, %v7664_v57  ;;  %v669_v23 = vadd.f32 %v7660_v54, %v7717_v14 }
 0x165   : > { %v2237_v15 = vrot.slane %v2236_v8, 1  ;;  %v2249_v0 = vrot.slane %v2248_v31, 2  ;;  %v2255_v27 = vmax.f32 %v2253_v41, %v2254_v18  ;;  %v684_v44 = vadd.f32 %v7725_v46, %v7660_v54 }
 0x166   : > { %v2243_v29 = vmax.f32 %v2241_v10, %v2242_v50  ;;  %v1178_v34 = vrot.slane %v1164_v48, %v7664_v57  ;;  %v1179_v35 = vcombine.high %v1171_v21, %v1171_v21  ;;  %v2316_v36 = vsel %vm1951_vm2, %v1171_v21, -inf }
 0x167   : > { %v2238_v38 = vmax.f32 %v2236_v8, %v2237_v15  ;;  %v2250_v39 = vmax.f32 %v2248_v31, %v2249_v0  ;;  %v2256_v40 = vrot.slane %v2255_v27, 2  ;;  %v2317_v60 = vrot.slane %v2316_v36, 4 }
 0x168   : > { %v2244_v43 = vrot.slane %v2243_v29, 1  ;;  %v1180_v14 = vcombine.high %v1178_v34, %v1178_v34  ;;  %v2323_v37 = vsel %vm1951_vm2, %v1179_v35, -inf  ;;  %v2330_v6 = vsel %vm1951_vm2, %v1178_v34, -inf }
 0x169   : > { %v2251_v45 = vrot.slane %v2250_v39, 1  ;;  %v2257_v54 = vmax.f32 %v2255_v27, %v2256_v40  ;;  %v2318_v46 = vmax.f32 %v2316_v36, %v2317_v60  ;;  %v2324_v12 = vrot.slane %v2323_v37, 4 }
 0x16a   : > { %v2245_v20 = vmax.f32 %v2243_v29, %v2244_v43  ;;  %v2331_v55 = vrot.slane %v2330_v6, 4  ;;  %v2337_v56 = vsel %vm1951_vm2, %v1180_v14, -inf  ;;  %v859_v59 = vmax.f32 %v669_v23, 0.0 }
 0x16b   : > { %v2252_v22 = vmax.f32 %v2250_v39, %v2251_v45  ;;  %v2258_v58 = vrot.slane %v2257_v54, 1  ;;  %v2319_v32 = vrot.slane %v2318_v46, 2  ;;  %v2325_v17 = vmax.f32 %v2323_v37, %v2324_v12 }
 0x16c   : > { %v3579_v26 = vsel %vm3537_vm3, %v2245_v20, %v2238_v38  ;;  %v2332_v62 = vmax.f32 %v2330_v6, %v2331_v55  ;;  %v2338_v24 = vrot.slane %v2337_v56, 4  ;;  %v1147_v28 = vcombine.high %v859_v59, %v859_v59 }
 0x16d   : > { %v2259_v49 = vmax.f32 %v2257_v54, %v2258_v58  ;;  %v3580_v9 = vsel %vm3539_vm4, %v2252_v22, %v3579_v26  ;;  %v2320_v1 = vmax.f32 %v2318_v46, %v2319_v32  ;;  %v2326_v10 = vrot.slane %v2325_v17, 2 }
 0x16e   : > { %v2333_v41 = vrot.slane %v2332_v62, 2  ;;  %v2339_v4 = vmax.f32 %v2337_v56, %v2338_v24  ;;  %v1154_v8 = vrot.slane %v859_v59, %v7664_v57  ;;  %v1161_v31 = vrot.slane %v1147_v28, %v7664_v57  ;;  %v7954_v59 = vpop.f32.mrb[28].mxu0 }
 0x16f   : > { %v3581_v18 = vsel %vm3541_vm5, %v2259_v49, %v3580_v9  ;;  %v2321_v50 = vrot.slane %v2320_v1, 1  ;;  %v2327_v48 = vmax.f32 %v2325_v17, %v2326_v10  ;;  %v862_v21 = vmax.f32 %v684_v44, 0.0  ;;  %v7960_v17 = vld [vmem:[%s9587_s2] ss:$0 sm:$0xff] }
 0x170   : > { %v3582_v23 = vsel %vm3543_vm6, %v7902_v19, %v3581_v18  ;;  %v2334_v15 = vmax.f32 %v2332_v62, %v2333_v41  ;;  %v2340_v0 = vrot.slane %v2339_v4, 2  ;;  %v1162_v27 = vcombine.high %v1154_v8, %v1154_v8 }
 0x171   : > { %v3583_v29 = vsel %vm3545_vm7, %v7905_v63, %v3582_v23  ;;  %v7936_v34 = vmax.f32 %v2320_v1, %v2321_v50  ;;  %v2328_v35 = vrot.slane %v2327_v48, 1  ;;  %v1163_v36 = vcombine.high %v1161_v31, %v1161_v31 }
 0x172   : > { %v3584_v38 = vsel %vm3547_vm8, %v7907_v2, %v3583_v29  ;;  %v2335_v39 = vrot.slane %v2334_v15, 1  ;;  %v2341_v40 = vmax.f32 %v2339_v4, %v2340_v0  ;;  %v2288_v44 = vsel %vm1951_vm2, %v1154_v8, -inf }
 0x173   : > { %v3585_v19 = vsel %vm3549_vm9, %v7911_v16, %v3584_v38  ;;  %v7943_v60 = vmax.f32 %v2327_v48, %v2328_v35  ;;  %v2289_v43 = vrot.slane %v2288_v44, 4  ;;  %v2295_v14 = vsel %vm1951_vm2, %v1162_v27, -inf }
 0x174   : > { %3742 = vst.msk [vmem:[#allocation2 + $0x51] sm:$0xff] %vm3736_vm10, %v3585_v19  ;;  %v7947_v63 = vmax.f32 %v2334_v15, %v2335_v39  ;;  %v2342_v37 = vrot.slane %v2341_v40, 1  ;;  %v2296_v6 = vrot.slane %v2295_v14, 4  ;;  %v2302_v2 = vsel %vm1951_vm2, %v1161_v31, -inf }
 0x175   : > { %v2290_v45 = vmax.f32 %v2288_v44, %v2289_v43  ;;  %v2303_v54 = vrot.slane %v2302_v2, 4  ;;  %v2309_v46 = vsel %vm1951_vm2, %v1163_v36, -inf  ;;  %v1198_v12 = vcombine.high %v862_v21, %v862_v21 }
 0x176   : > { %v7951_v20 = vmax.f32 %v2341_v40, %v2342_v37  ;;  %v2297_v16 = vmax.f32 %v2295_v14, %v2296_v6  ;;  %v2310_v55 = vrot.slane %v2309_v46, 4  ;;  %v1205_v56 = vrot.slane %v862_v21, %v7664_v57 }
 0x177   : > { %v2291_v22 = vrot.slane %v2290_v45, 2  ;;  %v2304_v58 = vmax.f32 %v2302_v2, %v2303_v54  ;;  %v1212_v32 = vrot.slane %v1198_v12, %v7664_v57  ;;  %v679_v26 = vadd.f32 %v7960_v17, %v7728_v52  ;;  %v7967_v52 = vpop.f32.mrb[29].mxu0 }
 0x178   : > { %v2298_v62 = vrot.slane %v2297_v16, 2  ;;  %v2311_v24 = vmax.f32 %v2309_v46, %v2310_v55  ;;  %v1213_v28 = vcombine.high %v1205_v56, %v1205_v56  ;;  %v2372_v49 = vsel %vm1951_vm2, %v1205_v56, -inf }
 0x179   : > { %v2292_v9 = vmax.f32 %v2290_v45, %v2291_v22  ;;  %v2305_v1 = vrot.slane %v2304_v58, 2  ;;  %v1214_v10 = vcombine.high %v1212_v32, %v1212_v32  ;;  %v2373_v41 = vrot.slane %v2372_v49, 4 }
 0x17a   : > { %v2299_v4 = vmax.f32 %v2297_v16, %v2298_v62  ;;  %v2312_v8 = vrot.slane %v2311_v24, 2  ;;  %v2379_v31 = vsel %vm1951_vm2, %v1213_v28, -inf  ;;  %v2386_v18 = vsel %vm1951_vm2, %v1212_v32, -inf }
 0x17b   : > { %v2293_v50 = vrot.slane %v2292_v9, 1  ;;  %v2306_v48 = vmax.f32 %v2304_v58, %v2305_v1  ;;  %v2374_v21 = vmax.f32 %v2372_v49, %v2373_v41  ;;  %v2380_v23 = vrot.slane %v2379_v31, 4 }
 0x17c   : > { %v2300_v15 = vrot.slane %v2299_v4, 1  ;;  %v2313_v0 = vmax.f32 %v2311_v24, %v2312_v8  ;;  %v2387_v27 = vrot.slane %v2386_v18, 4  ;;  %v2393_v29 = vsel %vm1951_vm2, %v1214_v10, -inf }
 0x17d   : > { %v2294_v35 = vmax.f32 %v2292_v9, %v2293_v50  ;;  %v2307_v36 = vrot.slane %v2306_v48, 1  ;;  %v2375_v38 = vrot.slane %v2374_v21, 2  ;;  %v2381_v39 = vmax.f32 %v2379_v31, %v2380_v23 }
 0x17e   : > { %v2301_v40 = vmax.f32 %v2299_v4, %v2300_v15  ;;  %v2314_v44 = vrot.slane %v2313_v0, 1  ;;  %v2388_v19 = vmax.f32 %v2386_v18, %v2387_v27  ;;  %v2394_v43 = vrot.slane %v2393_v29, 4 }
 0x17f   : > { %v2308_v14 = vmax.f32 %v2306_v48, %v2307_v36  ;;  %v2376_v37 = vmax.f32 %v2374_v21, %v2375_v38  ;;  %v2382_v6 = vrot.slane %v2381_v39, 2  ;;  %v861_v2 = vmax.f32 %v679_v26, 0.0 }
 0x180   : > { %v2315_v45 = vmax.f32 %v2313_v0, %v2314_v44  ;;  %v3586_v54 = vsel %vm3537_vm3, %v2301_v40, %v2294_v35  ;;  %v2389_v46 = vrot.slane %v2388_v19, 2  ;;  %v2395_v12 = vmax.f32 %v2393_v29, %v2394_v43  ;;  %v8002_v44 = vpop.f32.mrb[30].mxu0 }
 0x181   : > { %v3587_v16 = vsel %vm3539_vm4, %v2308_v14, %v3586_v54  ;;  %v2377_v55 = vrot.slane %v2376_v37, 1  ;;  %v2383_v56 = vmax.f32 %v2381_v39, %v2382_v6  ;;  %v1181_v22 = vcombine.high %v861_v2, %v861_v2 }
 0x182   : > { %v3588_v58 = vsel %vm3541_vm5, %v2315_v45, %v3587_v16  ;;  %v2390_v32 = vmax.f32 %v2388_v19, %v2389_v46  ;;  %v2396_v62 = vrot.slane %v2395_v12, 2  ;;  %v1188_v24 = vrot.slane %v861_v2, %v7664_v57 }
 0x183   : > { %v3589_v28 = vsel %vm3543_vm6, %v7936_v34, %v3588_v58  ;;  %v7976_v26 = vmax.f32 %v2376_v37, %v2377_v55  ;;  %v2384_v49 = vrot.slane %v2383_v56, 1  ;;  %v1195_v9 = vrot.slane %v1181_v22, %v7664_v57  ;;  %v8013_v22 = vpop.f32.mrb[31].mxu0 }
 0x184   : > { %v3590_v1 = vsel %vm3545_vm7, %v7943_v60, %v3589_v28  ;;  %v2391_v10 = vrot.slane %v2390_v32, 1  ;;  %v2397_v41 = vmax.f32 %v2395_v12, %v2396_v62  ;;  %v1196_v4 = vcombine.high %v1188_v24, %v1188_v24 }
 0x185   : > { %v3591_v8 = vsel %vm3547_vm8, %v7947_v63, %v3590_v1  ;;  %v7983_v31 = vmax.f32 %v2383_v56, %v2384_v49  ;;  %v1197_v18 = vcombine.high %v1195_v9, %v1195_v9  ;;  %v2344_v50 = vsel %vm1951_vm2, %v1188_v24, -inf }
 0x186   : > { %v3592_v34 = vsel %vm3549_vm9, %v7951_v20, %v3591_v8  ;;  %v7988_v48 = vmax.f32 %v2390_v32, %v2391_v10  ;;  %v2398_v21 = vrot.slane %v2397_v41, 1  ;;  %v2345_v23 = vrot.slane %v2344_v50, 4 }
 0x187   : > { %3743 = vst.msk [vmem:[#allocation2 + $0x61] sm:$0xff] %vm3736_vm10, %v3592_v34  ;;  %v2351_v60 = vsel %vm1951_vm2, %v1196_v4, -inf  ;;  %v2358_v15 = vsel %vm1951_vm2, %v1195_v9, -inf  ;;  %v2365_v63 = vsel %vm1951_vm2, %v1197_v18, -inf  ;;  %v694_v0 = vadd.f32 %v7960_v17, %v7735_v7 }
 0x188   : > { %v7996_v27 = vmax.f32 %v2397_v41, %v2398_v21  ;;  %v2346_v29 = vmax.f32 %v2344_v50, %v2345_v23  ;;  %v2352_v35 = vrot.slane %v2351_v60, 4  ;;  %v2359_v20 = vrot.slane %v2358_v15, 4 }
 0x189   : > { %v2366_v36 = vrot.slane %v2365_v63, 4  ;;  %v864_v38 = vmax.f32 %v694_v0, 0.0  ;;  %v689_v39 = vadd.f32 %v7960_v17, %v7738_v13  ;;  %v704_v40 = vadd.f32 %v7960_v17, %v7747_v30 }
 0x18a   : > { %v2347_v19 = vrot.slane %v2346_v29, 2  ;;  %v2353_v43 = vmax.f32 %v2351_v60, %v2352_v35  ;;  %v2360_v14 = vmax.f32 %v2358_v15, %v2359_v20  ;;  %v8006_v7 = vadd.f32 %v7960_v17, %v7761_v61 }
 0x18b   : > { %v2367_v37 = vmax.f32 %v2365_v63, %v2366_v36  ;;  %v1232_v6 = vcombine.high %v864_v38, %v864_v38  ;;  %v1239_v2 = vrot.slane %v864_v38, %v7664_v57  ;;  %v863_v45 = vmax.f32 %v689_v39, 0.0 }
 0x18c   : > { %v2348_v54 = vmax.f32 %v2346_v29, %v2347_v19  ;;  %v2354_v46 = vrot.slane %v2353_v43, 2  ;;  %v2361_v13 = vrot.slane %v2360_v14, 2  ;;  %v8009_v12 = vmax.f32 %v704_v40, 0.0 }
 0x18d   : > { %v2368_v30 = vrot.slane %v2367_v37, 2  ;;  %v1246_v16 = vrot.slane %v1232_v6, %v7664_v57  ;;  %v1247_v55 = vcombine.high %v1239_v2, %v1239_v2  ;;  %v2428_v56 = vsel %vm1951_vm2, %v1239_v2, -inf }
 0x18e   : > { %v2349_v61 = vrot.slane %v2348_v54, 1  ;;  %v2355_v58 = vmax.f32 %v2353_v43, %v2354_v46  ;;  %v2362_v32 = vmax.f32 %v2360_v14, %v2361_v13  ;;  %v2429_v62 = vrot.slane %v2428_v56, 4 }
 0x18f   : > { %v2369_v24 = vmax.f32 %v2367_v37, %v2368_v30  ;;  %v1248_v28 = vcombine.high %v1246_v16, %v1246_v16  ;;  %v2435_v49 = vsel %vm1951_vm2, %v1247_v55, -inf  ;;  %v2442_v9 = vsel %vm1951_vm2, %v1246_v16, -inf }
 0x190   : > { %v2350_v1 = vmax.f32 %v2348_v54, %v2349_v61  ;;  %v2356_v10 = vrot.slane %v2355_v58, 1  ;;  %v2363_v41 = vrot.slane %v2362_v32, 1  ;;  %v2430_v4 = vmax.f32 %v2428_v56, %v2429_v62 }
 0x191   : > { %v2370_v8 = vrot.slane %v2369_v24, 1  ;;  %v2436_v18 = vrot.slane %v2435_v49, 4  ;;  %v2443_v50 = vrot.slane %v2442_v9, 4  ;;  %v2449_v34 = vsel %vm1951_vm2, %v1248_v28, -inf }
 0x192   : > { %v2357_v21 = vmax.f32 %v2355_v58, %v2356_v10  ;;  %v2364_v23 = vmax.f32 %v2362_v32, %v2363_v41  ;;  %v2431_v60 = vrot.slane %v2430_v4, 2  ;;  %v2450_v15 = vrot.slane %v2449_v34, 4 }
 0x193   : > { %v2371_v63 = vmax.f32 %v2369_v24, %v2370_v8  ;;  %v2437_v0 = vmax.f32 %v2435_v49, %v2436_v18  ;;  %v2444_v29 = vmax.f32 %v2442_v9, %v2443_v50  ;;  %v1215_v35 = vcombine.high %v863_v45, %v863_v45 }
 0x194   : > { %v3593_v20 = vsel %vm3537_vm3, %v2357_v21, %v2350_v1  ;;  %v2432_v36 = vmax.f32 %v2430_v4, %v2431_v60  ;;  %v2451_v38 = vmax.f32 %v2449_v34, %v2450_v15  ;;  %v1222_v39 = vrot.slane %v863_v45, %v7664_v57  ;;  %v8052_v34 = vpop.f32.mrb[32].mxu0 }
 0x195   : > { %v3594_v40 = vsel %vm3539_vm4, %v2364_v23, %v3593_v20  ;;  %v2438_v19 = vrot.slane %v2437_v0, 2  ;;  %v2445_v43 = vrot.slane %v2444_v29, 2  ;;  %v1229_v14 = vrot.slane %v1215_v35, %v7664_v57 }
 0x196   : > { %v3595_v37 = vsel %vm3541_vm5, %v2371_v63, %v3594_v40  ;;  %v2433_v6 = vrot.slane %v2432_v36, 1  ;;  %v2452_v2 = vrot.slane %v2451_v38, 2  ;;  %v1230_v54 = vcombine.high %v1222_v39, %v1222_v39 }
 0x197   : > { %v3596_v46 = vsel %vm3543_vm6, %v7976_v26, %v3595_v37  ;;  %v2439_v13 = vmax.f32 %v2437_v0, %v2438_v19  ;;  %v2446_v30 = vmax.f32 %v2444_v29, %v2445_v43  ;;  %v1231_v16 = vcombine.high %v1229_v14, %v1229_v14 }
 0x198   : > { %v3597_v45 = vsel %vm3545_vm7, %v7983_v31, %v3596_v46  ;;  %v8027_v55 = vmax.f32 %v2432_v36, %v2433_v6  ;;  %v2453_v56 = vmax.f32 %v2451_v38, %v2452_v2  ;;  %v2400_v61 = vsel %vm1951_vm2, %v1222_v39, -inf }
 0x199   : > { %v3598_v58 = vsel %vm3547_vm8, %v7988_v48, %v3597_v45  ;;  %v2440_v32 = vrot.slane %v2439_v13, 1  ;;  %v2447_v62 = vrot.slane %v2446_v30, 1  ;;  %v2401_v24 = vrot.slane %v2400_v61, 4  ;;  %v6680_v48 = vld [vmem:[%s9588_s3 + $0x10] sm:$0xff] }
 0x19a   : > { %v3599_v26 = vsel %vm3549_vm9, %v7996_v27, %v3598_v58  ;;  %v2454_v28 = vrot.slane %v2453_v56, 1  ;;  %v2407_v49 = vsel %vm1951_vm2, %v1230_v54, -inf  ;;  %v2414_v9 = vsel %vm1951_vm2, %v1229_v14, -inf  ;;  %v6681_v27 = vld [vmem:[%s9588_s3 + $0x18] sm:$0xff] }
 0x19b   : > { %3744 = vst.msk [vmem:[#allocation2 + $0x71] sm:$0xff] %vm3736_vm10, %v3599_v26  ;;  %v8037_v31 = vmax.f32 %v2439_v13, %v2440_v32  ;;  %v8039_v1 = vmax.f32 %v2446_v30, %v2447_v62  ;;  %v2402_v10 = vmax.f32 %v2400_v61, %v2401_v24  ;;  %v2408_v41 = vrot.slane %v2407_v49, 4  ;;  %v3788_v54 = vld [vmem:[#allocation2 + $0x11] sm:$0xff]  ;;  %v8062_v32 = vpop.f32.mrb[33].mxu0 }
 0x19c   : > { %v8047_v4 = vmax.f32 %v2453_v56, %v2454_v28  ;;  %v2415_v8 = vrot.slane %v2414_v9, 4  ;;  %v2421_v18 = vsel %vm1951_vm2, %v1231_v16, -inf  ;;  %v1266_v50 = vcombine.high %v8009_v12, %v8009_v12  ;;  %v3789_v16 = vld [vmem:[#allocation2 + $0x21] sm:$0xff] }
 0x19d   : > { %v2403_v21 = vrot.slane %v2402_v10, 2  ;;  %v2409_v23 = vmax.f32 %v2407_v49, %v2408_v41  ;;  %v2422_v60 = vrot.slane %v2421_v18, 4  ;;  %v1273_v15 = vrot.slane %v8009_v12, %v7664_v57 }
 0x19e   : > { %v2416_v63 = vmax.f32 %v2414_v9, %v2415_v8  ;;  %v1280_v0 = vrot.slane %v1266_v50, %v7664_v57  ;;  %v865_v29 = vmax.f32 %v8006_v7, 0.0  ;;  %v7205_v35 = vpack.c.bf16 %v6681_v27, %v6680_v48  ;;  %v3790_v48 = vld [vmem:[#allocation2 + $0x31] sm:$0xff] }
 0x19f   : > { %v2404_v20 = vmax.f32 %v2402_v10, %v2403_v21  ;;  %v2410_v36 = vrot.slane %v2409_v23, 2  ;;  %v2423_v38 = vmax.f32 %v2421_v18, %v2422_v60  ;;  %v1281_v39 = vcombine.high %v1273_v15, %v1273_v15  ;;  %v3791_v21 = vld [vmem:[#allocation2 + $0x41] sm:$0xff] }
 0x1a0   : > { %v2417_v40 = vrot.slane %v2416_v63, 2  ;;  %v1282_v19 = vcombine.high %v1280_v0, %v1280_v0  ;;  %v2484_v43 = vsel %vm1951_vm2, %v1273_v15, -inf  ;;  %v2498_v14 = vsel %vm1951_vm2, %v1280_v0, -inf  ;;  %7206 = vmatprep.subr.bf16.mxu1 %v7205_v35 }
 0x1a1   : > { %v2405_v37 = vrot.slane %v2404_v20, 1  ;;  %v2411_v6 = vmax.f32 %v2409_v23, %v2410_v36  ;;  %v2424_v12 = vrot.slane %v2423_v38, 2  ;;  %v2485_v2 = vrot.slane %v2484_v43, 4  ;;  %7208 = vmatpush3.bf16.msra.mxu1 %v7205_v35 }
 0x1a2   : > { %v2418_v46 = vmax.f32 %v2416_v63, %v2417_v40  ;;  %v2491_v7 = vsel %vm1951_vm2, %v1281_v39, -inf  ;;  %v2499_v13 = vrot.slane %v2498_v14, 4  ;;  %v2505_v30 = vsel %vm1951_vm2, %v1282_v19, -inf }
 0x1a3   : > { %v2406_v45 = vmax.f32 %v2404_v20, %v2405_v37  ;;  %v2412_v56 = vrot.slane %v2411_v6, 1  ;;  %v2425_v61 = vmax.f32 %v2423_v38, %v2424_v12  ;;  %v2486_v58 = vmax.f32 %v2484_v43, %v2485_v2  ;;  %v3792_v43 = vld [vmem:[#allocation2 + $0x51] sm:$0xff]  ;;  %v3793_v12 = vld [vmem:[#allocation2 + $0x61] sm:$0xff] }
 0x1a4   : > { %v2419_v62 = vrot.slane %v2418_v46, 1  ;;  %v2492_v24 = vrot.slane %v2491_v7, 4  ;;  %v2500_v26 = vmax.f32 %v2498_v14, %v2499_v13  ;;  %v2506_v28 = vrot.slane %v2505_v30, 4  ;;  %7008 = vmatmul.mubr.msk.f32.vlgmr.msra.gmra.mrb[0].mxu1 %vm3736_vm10, %v3788_v54 }
 0x1a5   : > { %v2413_v49 = vmax.f32 %v2411_v6, %v2412_v56  ;;  %v2426_v9 = vrot.slane %v2425_v61, 1  ;;  %v2487_v10 = vrot.slane %v2486_v58, 2  ;;  %v1249_v41 = vcombine.high %v865_v29, %v865_v29  ;;  %7010 = vmatprep.mubr.msk.f32.mxu1 %vm3736_vm10, %v3789_v16 }
 0x1a6   : > { %v2420_v27 = vmax.f32 %v2418_v46, %v2419_v62  ;;  %v2493_v8 = vmax.f32 %v2491_v7, %v2492_v24  ;;  %v2501_v18 = vrot.slane %v2500_v26, 2  ;;  %v2507_v50 = vmax.f32 %v2505_v30, %v2506_v28 }
 0x1a7   : > { %v2427_v23 = vmax.f32 %v2425_v61, %v2426_v9  ;;  %v3600_v60 = vsel %vm3537_vm3, %v2413_v49, %v2406_v45  ;;  %v2488_v15 = vmax.f32 %v2486_v58, %v2487_v10  ;;  %v1256_v63 = vrot.slane %v865_v29, %v7664_v57  ;;  %v3794_v58 = vld [vmem:[#allocation2 + $0x71] sm:$0xff]  ;;  %v8100_v10 = vpop.f32.mrb[34].mxu0 }
 0x1a8   : > { %v3601_v0 = vsel %vm3539_vm4, %v2420_v27, %v3600_v60  ;;  %v2494_v35 = vrot.slane %v2493_v8, 2  ;;  %v2502_v20 = vmax.f32 %v2500_v26, %v2501_v18  ;;  %v2508_v36 = vrot.slane %v2507_v50, 2  ;;  %7011 = vmatmul.mubr.msk.f32.gmra.mrb[2].mxu1 %vm3736_vm10, %v3790_v48 }
 0x1a9   : > { %v3602_v38 = vsel %vm3541_vm5, %v2427_v23, %v3601_v0  ;;  %v2489_v39 = vrot.slane %v2488_v15, 1  ;;  %v1263_v40 = vrot.slane %v1249_v41, %v7664_v57  ;;  %v1264_v19 = vcombine.high %v1256_v63, %v1256_v63  ;;  %7013 = vmatprep.mubr.msk.f32.mxu1 %vm3736_vm10, %v3791_v21 }
 0x1aa   : > { %v3603_v14 = vsel %vm3543_vm6, %v8027_v55, %v3602_v38  ;;  %v2495_v29 = vmax.f32 %v2493_v8, %v2494_v35  ;;  %v2503_v37 = vrot.slane %v2502_v20, 1  ;;  %v2509_v6 = vmax.f32 %v2507_v50, %v2508_v36 }
 0x1ab   : > { %v3604_v2 = vsel %vm3545_vm7, %v8037_v31, %v3603_v14  ;;  %v8077_v54 = vmax.f32 %v2488_v15, %v2489_v39  ;;  %v1265_v46 = vcombine.high %v1263_v40, %v1263_v40  ;;  %v2456_v7 = vsel %vm1951_vm2, %v1256_v63, -inf }
 0x1ac   : > { %v3605_v13 = vsel %vm3547_vm8, %v8039_v1, %v3604_v2  ;;  %v2496_v30 = vrot.slane %v2495_v29, 1  ;;  %v8082_v16 = vmax.f32 %v2502_v20, %v2503_v37  ;;  %v2510_v45 = vrot.slane %v2509_v6, 1  ;;  %7014 = vmatmul.mubr.msk.f32.gmra.mrb[4].mxu1 %vm3736_vm10, %v3792_v43 }
 0x1ad   : > { %v3606_v55 = vsel %vm3549_vm9, %v8047_v4, %v3605_v13  ;;  %v2457_v56 = vrot.slane %v2456_v7, 4  ;;  %v2463_v31 = vsel %vm1951_vm2, %v1264_v19, -inf  ;;  %v2470_v61 = vsel %vm1951_vm2, %v1263_v40, -inf  ;;  %7016 = vmatprep.mubr.msk.f32.mxu1 %vm3736_vm10, %v3793_v12  ;;  %v8113_v40 = vpop.f32.mrb[35].mxu0 }
 0x1ae   : > { %3745 = vst.msk [vmem:[#allocation2 + $0x81] sm:$0xff] %vm3736_vm10, %v3606_v55  ;;  %v8091_v1 = vmax.f32 %v2495_v29, %v2496_v30  ;;  %v8093_v62 = vmax.f32 %v2509_v6, %v2510_v45  ;;  %v2464_v24 = vrot.slane %v2463_v31, 4  ;;  %v2471_v26 = vrot.slane %v2470_v61, 4 }
 0x1af   : > { %v2458_v28 = vmax.f32 %v2456_v7, %v2457_v56  ;;  %v2477_v49 = vsel %vm1951_vm2, %v1265_v46, -inf  ;;  %v714_v4 = vadd.f32 %v7960_v17, %v7789_v5  ;;  %v709_v9 = vadd.f32 %v7960_v17, %v7802_v51 }
 0x1b0   : > { %v2465_v41 = vmax.f32 %v2463_v31, %v2464_v24  ;;  %v2472_v48 = vmax.f32 %v2470_v61, %v2471_v26  ;;  %v2478_v27 = vrot.slane %v2477_v49, 4  ;;  %v724_v8 = vadd.f32 %v7960_v17, %v7830_v47  ;;  %7017 = vmatmul.mubr.msk.f32.gmra.mrb[6].mxu1 %vm3736_vm10, %v3794_v58 }
 0x1b1   : > { %v2459_v18 = vrot.slane %v2458_v28, 2  ;;  %v868_v50 = vmax.f32 %v714_v4, 0.0  ;;  %v867_v21 = vmax.f32 %v709_v9, 0.0  ;;  %v8107_v23 = vadd.f32 %v7960_v17, %v7846_v25 }
 0x1b2   : > { %v2466_v5 = vrot.slane %v2465_v41, 2  ;;  %v2473_v60 = vrot.slane %v2472_v48, 2  ;;  %v2479_v51 = vmax.f32 %v2477_v49, %v2478_v27  ;;  %v8109_v15 = vmax.f32 %v724_v8, 0.0 }
 0x1b3   : > { %v2460_v63 = vmax.f32 %v2458_v28, %v2459_v18  ;;  %v1300_v0 = vcombine.high %v868_v50, %v868_v50  ;;  %v1307_v35 = vrot.slane %v868_v50, %v7664_v57  ;;  %v1283_v20 = vcombine.high %v867_v21, %v867_v21 }
 0x1b4   : > { %v2467_v47 = vmax.f32 %v2465_v41, %v2466_v5  ;;  %v2474_v36 = vmax.f32 %v2472_v48, %v2473_v60  ;;  %v2480_v38 = vrot.slane %v2479_v51, 2  ;;  %v1290_v39 = vrot.slane %v867_v21, %v7664_v57 }
 0x1b5   : > { %v2461_v19 = vrot.slane %v2460_v63, 1  ;;  %v1314_v25 = vrot.slane %v1300_v0, %v7664_v57  ;;  %v1315_v43 = vcombine.high %v1307_v35, %v1307_v35  ;;  %v2540_v14 = vsel %vm1951_vm2, %v1307_v35, -inf }
 0x1b6   : > { %v2468_v29 = vrot.slane %v2467_v47, 1  ;;  %v2475_v37 = vrot.slane %v2474_v36, 1  ;;  %v2481_v6 = vmax.f32 %v2479_v51, %v2480_v38  ;;  %v2541_v12 = vrot.slane %v2540_v14, 4 }
 0x1b7   : > { %v2462_v2 = vmax.f32 %v2460_v63, %v2461_v19  ;;  %v1316_v46 = vcombine.high %v1314_v25, %v1314_v25  ;;  %v2547_v7 = vsel %vm1951_vm2, %v1315_v43, -inf  ;;  %v2554_v13 = vsel %vm1951_vm2, %v1314_v25, -inf }
 0x1b8   : > { %v2469_v30 = vmax.f32 %v2467_v47, %v2468_v29  ;;  %v2476_v45 = vmax.f32 %v2474_v36, %v2475_v37  ;;  %v2482_v55 = vrot.slane %v2481_v6, 1  ;;  %v2542_v56 = vmax.f32 %v2540_v14, %v2541_v12  ;;  %v3795_v29 = vld [vmem:[#allocation2 + $0x81] sm:$0xff] }
 0x1b9   : > { %v2548_v31 = vrot.slane %v2547_v7, 4  ;;  %v2555_v61 = vrot.slane %v2554_v13, 4  ;;  %v2561_v58 = vsel %vm1951_vm2, %v1316_v46, -inf  ;;  %v1297_v24 = vrot.slane %v1283_v20, %v7664_v57  ;;  %7019 = vmatprep.mubr.msk.f32.mxu1 %vm3736_vm10, %v3795_v29 }
 0x1ba   : > { %v2483_v26 = vmax.f32 %v2481_v6, %v2482_v55  ;;  %v3607_v28 = vsel %vm3537_vm3, %v2469_v30, %v2462_v2  ;;  %v2543_v49 = vrot.slane %v2542_v56, 2  ;;  %v2562_v4 = vrot.slane %v2561_v58, 4  ;;  %v8140_v55 = vpop.f32.mrb[36].mxu0 }
 0x1bb   : > { %v3608_v9 = vsel %vm3539_vm4, %v2476_v45, %v3607_v28  ;;  %v2549_v41 = vmax.f32 %v2547_v7, %v2548_v31  ;;  %v2556_v48 = vmax.f32 %v2554_v13, %v2555_v61  ;;  %v1298_v27 = vcombine.high %v1290_v39, %v1290_v39 }
 0x1bc   : > { %v3609_v8 = vsel %vm3541_vm5, %v2483_v26, %v3608_v9  ;;  %v2544_v18 = vmax.f32 %v2542_v56, %v2543_v49  ;;  %v2563_v50 = vmax.f32 %v2561_v58, %v2562_v4  ;;  %v1299_v21 = vcombine.high %v1297_v24, %v1297_v24 }
 0x1bd   : > { %v3610_v5 = vsel %vm3543_vm6, %v8077_v54, %v3609_v8  ;;  %v2550_v60 = vrot.slane %v2549_v41, 2  ;;  %v2557_v51 = vrot.slane %v2556_v48, 2  ;;  %v2512_v63 = vsel %vm1951_vm2, %v1290_v39, -inf }
 0x1be   : > { %v3611_v0 = vsel %vm3545_vm7, %v8091_v1, %v3610_v5  ;;  %v2545_v35 = vrot.slane %v2544_v18, 1  ;;  %v2564_v20 = vrot.slane %v2563_v50, 2  ;;  %v2513_v47 = vrot.slane %v2512_v63, 4 }
 0x1bf   : > { %v3612_v36 = vsel %vm3547_vm8, %v8082_v16, %v3611_v0  ;;  %v2551_v38 = vmax.f32 %v2549_v41, %v2550_v60  ;;  %v2558_v19 = vmax.f32 %v2556_v48, %v2557_v51  ;;  %v2519_v25 = vsel %vm1951_vm2, %v1298_v27, -inf }
 0x1c0   : > { %v3613_v54 = vsel %vm3549_vm9, %v8093_v62, %v3612_v36  ;;  %v8134_v43 = vmax.f32 %v2544_v18, %v2545_v35  ;;  %v2565_v14 = vmax.f32 %v2563_v50, %v2564_v20  ;;  %v2514_v39 = vmax.f32 %v2512_v63, %v2513_v47  ;;  %v8157_v36 = vpop.f32.mrb[37].mxu0 }
 0x1c1   : > { %3746 = vst.msk [vmem:[#allocation2 + $0x91] sm:$0xff] %vm3736_vm10, %v3613_v54  ;;  %v2552_v1 = vrot.slane %v2551_v38, 1  ;;  %v2559_v37 = vrot.slane %v2558_v19, 1  ;;  %v2520_v6 = vrot.slane %v2519_v25, 4  ;;  %v2526_v12 = vsel %vm1951_vm2, %v1297_v24, -inf }
 0x1c2   : > { %v2566_v16 = vrot.slane %v2565_v14, 1  ;;  %v2515_v2 = vrot.slane %v2514_v39, 2  ;;  %v2527_v46 = vrot.slane %v2526_v12, 4  ;;  %v2533_v7 = vsel %vm1951_vm2, %v1299_v21, -inf }
 0x1c3   : > { %v2553_v62 = vmax.f32 %v2551_v38, %v2552_v1  ;;  %v2560_v13 = vmax.f32 %v2558_v19, %v2559_v37  ;;  %v2521_v30 = vmax.f32 %v2519_v25, %v2520_v6  ;;  %v2534_v45 = vrot.slane %v2533_v7, 4 }
 0x1c4   : > { %v8142_v56 = vmax.f32 %v2565_v14, %v2566_v16  ;;  %v2516_v31 = vmax.f32 %v2514_v39, %v2515_v2  ;;  %v2528_v61 = vmax.f32 %v2526_v12, %v2527_v46  ;;  %v1334_v58 = vcombine.high %v8109_v15, %v8109_v15 }
 0x1c5   : > { %v2522_v24 = vrot.slane %v2521_v30, 2  ;;  %v2535_v26 = vmax.f32 %v2533_v7, %v2534_v45  ;;  %v1341_v28 = vrot.slane %v8109_v15, %v7664_v57  ;;  %v869_v49 = vmax.f32 %v8107_v23, 0.0 }
 0x1c6   : > { %v2517_v4 = vrot.slane %v2516_v31, 1  ;;  %v2529_v9 = vrot.slane %v2528_v61, 2  ;;  %v1348_v41 = vrot.slane %v1334_v58, %v7664_v57  ;;  %v8152_v48 = vadd.f32 %v7960_v17, %v7872_v33 }
 0x1c7   : > { %v2523_v27 = vmax.f32 %v2521_v30, %v2522_v24  ;;  %v2536_v8 = vrot.slane %v2535_v26, 2  ;;  %v1349_v18 = vcombine.high %v1341_v28, %v1341_v28  ;;  %v2596_v50 = vsel %vm1951_vm2, %v1341_v28, -inf }
 0x1c8   : > { %v2518_v21 = vmax.f32 %v2516_v31, %v2517_v4  ;;  %v2530_v5 = vmax.f32 %v2528_v61, %v2529_v9  ;;  %v1350_v60 = vcombine.high %v1348_v41, %v1348_v41  ;;  %v2597_v51 = vrot.slane %v2596_v50, 4 }
 0x1c9   : > { %v2524_v15 = vrot.slane %v2523_v27, 1  ;;  %v2537_v63 = vmax.f32 %v2535_v26, %v2536_v8  ;;  %v2603_v23 = vsel %vm1951_vm2, %v1349_v18, -inf  ;;  %v2610_v0 = vsel %vm1951_vm2, %v1348_v41, -inf }
 0x1ca   : > { %v2531_v35 = vrot.slane %v2530_v5, 1  ;;  %v2598_v20 = vmax.f32 %v2596_v50, %v2597_v51  ;;  %v2604_v47 = vrot.slane %v2603_v23, 4  ;;  %v2611_v33 = vrot.slane %v2610_v0, 4 }
 0x1cb   : > { %v2525_v38 = vmax.f32 %v2523_v27, %v2524_v15  ;;  %v2538_v19 = vrot.slane %v2537_v63, 1  ;;  %v2617_v25 = vsel %vm1951_vm2, %v1350_v60, -inf  ;;  %v1317_v54 = vcombine.high %v869_v49, %v869_v49 }
 0x1cc   : > { %v2532_v14 = vmax.f32 %v2530_v5, %v2531_v35  ;;  %v2599_v39 = vrot.slane %v2598_v20, 2  ;;  %v2605_v29 = vmax.f32 %v2603_v23, %v2604_v47  ;;  %v2612_v1 = vmax.f32 %v2610_v0, %v2611_v33  ;;  %v3796_v5 = vld [vmem:[#allocation2 + $0x91] sm:$0xff]  ;;  %v8183_v47 = vpop.f32.mrb[38].mxu0 }
 0x1cd   : > { %v2539_v37 = vmax.f32 %v2537_v63, %v2538_v19  ;;  %v3614_v6 = vsel %vm3537_vm3, %v2525_v38, %v2518_v21  ;;  %v2618_v12 = vrot.slane %v2617_v25, 4  ;;  %v1324_v16 = vrot.slane %v869_v49, %v7664_v57  ;;  %7020 = vmatmul.mubr.msk.f32.gmra.mrb[8].mxu1 %vm3736_vm10, %v3796_v5 }
 0x1ce   : > { %v3615_v2 = vsel %vm3539_vm4, %v2532_v14, %v3614_v6  ;;  %v2600_v46 = vmax.f32 %v2598_v20, %v2599_v39  ;;  %v2606_v7 = vrot.slane %v2605_v29, 2  ;;  %v2613_v30 = vrot.slane %v2612_v1, 2 }
 0x1cf   : > { %v3616_v45 = vsel %vm3541_vm5, %v2539_v37, %v3615_v2  ;;  %v2619_v31 = vmax.f32 %v2617_v25, %v2618_v12  ;;  %v1331_v61 = vrot.slane %v1317_v54, %v7664_v57  ;;  %v1332_v58 = vcombine.high %v1324_v16, %v1324_v16 }
 0x1d0   : > { %v3617_v24 = vsel %vm3543_vm6, %v8134_v43, %v3616_v45  ;;  %v2601_v26 = vrot.slane %v2600_v46, 1  ;;  %v2607_v28 = vmax.f32 %v2605_v29, %v2606_v7  ;;  %v2614_v4 = vmax.f32 %v2612_v1, %v2613_v30 }
 0x1d1   : > { %v3618_v9 = vsel %vm3545_vm7, %v2553_v62, %v3617_v24  ;;  %v2620_v49 = vrot.slane %v2619_v31, 2  ;;  %v1333_v41 = vcombine.high %v1331_v61, %v1331_v61  ;;  %v2568_v27 = vsel %vm1951_vm2, %v1324_v16, -inf }
 0x1d2   : > { %v3619_v8 = vsel %vm3547_vm8, %v2560_v13, %v3618_v9  ;;  %v8170_v18 = vmax.f32 %v2600_v46, %v2601_v26  ;;  %v2608_v50 = vrot.slane %v2607_v28, 1  ;;  %v2615_v21 = vrot.slane %v2614_v4, 1  ;;  %v8197_v9 = vpop.f32.mrb[39].mxu0 }
 0x1d3   : > { %v3620_v60 = vsel %vm3549_vm9, %v8142_v56, %v3619_v8  ;;  %v2621_v43 = vmax.f32 %v2619_v31, %v2620_v49  ;;  %v2569_v51 = vrot.slane %v2568_v27, 4  ;;  %v2575_v15 = vsel %vm1951_vm2, %v1332_v58, -inf }
 0x1d4   : > { %3747 = vst.msk [vmem:[#allocation2 + $0xa1] sm:$0xff] %vm3736_vm10, %v3620_v60  ;;  %v8177_v62 = vmax.f32 %v2607_v28, %v2608_v50  ;;  %v8179_v63 = vmax.f32 %v2614_v4, %v2615_v21  ;;  %v2576_v13 = vrot.slane %v2575_v15, 4  ;;  %v2582_v23 = vsel %vm1951_vm2, %v1331_v61, -inf }
 0x1d5   : > { %v2622_v0 = vrot.slane %v2621_v43, 1  ;;  %v2570_v35 = vmax.f32 %v2568_v27, %v2569_v51  ;;  %v2583_v20 = vrot.slane %v2582_v23, 4  ;;  %v2589_v56 = vsel %vm1951_vm2, %v1333_v41, -inf }
 0x1d6   : > { %v2577_v33 = vmax.f32 %v2575_v15, %v2576_v13  ;;  %v2590_v38 = vrot.slane %v2589_v56, 4  ;;  %v872_v19 = vmax.f32 %v8152_v48, 0.0  ;;  %v729_v25 = vadd.f32 %v7960_v17, %v7886_v3 }
 0x1d7   : > { %v8188_v54 = vmax.f32 %v2621_v43, %v2622_v0  ;;  %v2571_v14 = vrot.slane %v2570_v35, 2  ;;  %v2584_v39 = vmax.f32 %v2582_v23, %v2583_v20  ;;  %v744_v29 = vadd.f32 %v7960_v17, %v7913_v11 }
 0x1d8   : > { %v2578_v1 = vrot.slane %v2577_v33, 2  ;;  %v2591_v37 = vmax.f32 %v2589_v56, %v2590_v38  ;;  %v1368_v6 = vcombine.high %v872_v19, %v872_v19  ;;  %v1375_v12 = vrot.slane %v872_v19, %v7664_v57 }
 0x1d9   : > { %v2572_v16 = vmax.f32 %v2570_v35, %v2571_v14  ;;  %v2585_v2 = vrot.slane %v2584_v39, 2  ;;  %v871_v46 = vmax.f32 %v729_v25, 0.0  ;;  %v8193_v7 = vmax.f32 %v744_v29, 0.0 }
 0x1da   : > { %v2579_v48 = vmax.f32 %v2577_v33, %v2578_v1  ;;  %v2592_v30 = vrot.slane %v2591_v37, 2  ;;  %v1382_v3 = vrot.slane %v1368_v6, %v7664_v57  ;;  %v1383_v45 = vcombine.high %v1375_v12, %v1375_v12 }
 0x1db   : > { %v2573_v31 = vrot.slane %v2572_v16, 1  ;;  %v2586_v61 = vmax.f32 %v2584_v39, %v2585_v2  ;;  %v2652_v58 = vsel %vm1951_vm2, %v1375_v12, -inf  ;;  %v1351_v11 = vcombine.high %v871_v46, %v871_v46 }
 0x1dc   : > { %v2580_v24 = vrot.slane %v2579_v48, 1  ;;  %v2593_v26 = vmax.f32 %v2591_v37, %v2592_v30  ;;  %v1384_v28 = vcombine.high %v1382_v3, %v1382_v3  ;;  %v2653_v4 = vrot.slane %v2652_v58, 4 }
 0x1dd   : > { %v2574_v49 = vmax.f32 %v2572_v16, %v2573_v31  ;;  %v2587_v41 = vrot.slane %v2586_v61, 1  ;;  %v2659_v27 = vsel %vm1951_vm2, %v1383_v45, -inf  ;;  %v2666_v8 = vsel %vm1951_vm2, %v1382_v3, -inf }
 0x1de   : > { %v2581_v50 = vmax.f32 %v2579_v48, %v2580_v24  ;;  %v2594_v21 = vrot.slane %v2593_v26, 1  ;;  %v2654_v5 = vmax.f32 %v2652_v58, %v2653_v4  ;;  %v2660_v60 = vrot.slane %v2659_v27, 4 }
 0x1df   : > { %v2588_v43 = vmax.f32 %v2586_v61, %v2587_v41  ;;  %v2667_v51 = vrot.slane %v2666_v8, 4  ;;  %v2673_v15 = vsel %vm1951_vm2, %v1384_v28, -inf  ;;  %v1358_v13 = vrot.slane %v871_v46, %v7664_v57  ;;  %v3797_v61 = vld [vmem:[#allocation2 + $0xa1] sm:$0xff]  ;;  %v8225_v41 = vpop.f32.mrb[40].mxu0 }
 0x1e0   : > { %v2595_v23 = vmax.f32 %v2593_v26, %v2594_v21  ;;  %v3621_v0 = vsel %vm3537_vm3, %v2581_v50, %v2574_v49  ;;  %v2655_v35 = vrot.slane %v2654_v5, 2  ;;  %v2661_v20 = vmax.f32 %v2659_v27, %v2660_v60  ;;  %7022 = vmatprep.mubr.msk.f32.mxu1 %vm3736_vm10, %v3797_v61 }
 0x1e1   : > { %v3622_v56 = vsel %vm3539_vm4, %v2588_v43, %v3621_v0  ;;  %v2668_v33 = vmax.f32 %v2666_v8, %v2667_v51  ;;  %v2674_v38 = vrot.slane %v2673_v15, 4  ;;  %v1365_v19 = vrot.slane %v1351_v11, %v7664_v57 }
 0x1e2   : > { %v3623_v25 = vsel %vm3541_vm5, %v2595_v23, %v3622_v56  ;;  %v2656_v14 = vmax.f32 %v2654_v5, %v2655_v35  ;;  %v2662_v39 = vrot.slane %v2661_v20, 2  ;;  %v1366_v29 = vcombine.high %v1358_v13, %v1358_v13 }
 0x1e3   : > { %v3624_v1 = vsel %vm3543_vm6, %v8170_v18, %v3623_v25  ;;  %v2669_v37 = vrot.slane %v2668_v33, 2  ;;  %v2675_v6 = vmax.f32 %v2673_v15, %v2674_v38  ;;  %v1367_v12 = vcombine.high %v1365_v19, %v1365_v19 }
 0x1e4   : > { %v3625_v16 = vsel %vm3545_vm7, %v8177_v62, %v3624_v1  ;;  %v2657_v2 = vrot.slane %v2656_v14, 1  ;;  %v2663_v46 = vmax.f32 %v2661_v20, %v2662_v39  ;;  %v2624_v48 = vsel %vm1951_vm2, %v1358_v13, -inf }
 0x1e5   : > { %v3626_v30 = vsel %vm3547_vm8, %v8179_v63, %v3625_v16  ;;  %v2670_v3 = vmax.f32 %v2668_v33, %v2669_v37  ;;  %v2676_v45 = vrot.slane %v2675_v6, 2  ;;  %v2625_v31 = vrot.slane %v2624_v48, 4 }
 0x1e6   : > { %v3627_v18 = vsel %vm3549_vm9, %v8188_v54, %v3626_v30  ;;  %v2664_v58 = vrot.slane %v2663_v46, 1  ;;  %v2631_v11 = vsel %vm1951_vm2, %v1366_v29, -inf  ;;  %v8219_v4 = vmax.f32 %v2656_v14, %v2657_v2 }
 0x1e7   : > { %3748 = vst.msk [vmem:[#allocation2 + $0xb1] sm:$0xff] %vm3736_vm10, %v3627_v18  ;;  %v2671_v62 = vrot.slane %v2670_v3, 1  ;;  %v2677_v24 = vmax.f32 %v2675_v6, %v2676_v45  ;;  %v2626_v26 = vmax.f32 %v2624_v48, %v2625_v31  ;;  %v2632_v28 = vrot.slane %v2631_v11, 4  ;;  %v8240_v48 = vpop.f32.mrb[41].mxu0 }
 0x1e8   : > { %v2638_v63 = vsel %vm1951_vm2, %v1365_v19, -inf  ;;  %v2645_v49 = vsel %vm1951_vm2, %v1367_v12, -inf  ;;  %v1402_v54 = vcombine.high %v8193_v7, %v8193_v7  ;;  %v8227_v27 = vmax.f32 %v2663_v46, %v2664_v58 }
 0x1e9   : > { %v8229_v8 = vmax.f32 %v2670_v3, %v2671_v62  ;;  %v2627_v50 = vrot.slane %v2626_v26, 2  ;;  %v2633_v21 = vmax.f32 %v2631_v11, %v2632_v28  ;;  %v2639_v5 = vrot.slane %v2638_v63, 4 }
 0x1ea   : > { %v2646_v60 = vrot.slane %v2645_v49, 4  ;;  %v1409_v43 = vrot.slane %v8193_v7, %v7664_v57  ;;  %v1416_v51 = vrot.slane %v1402_v54, %v7664_v57  ;;  %v2678_v15 = vrot.slane %v2677_v24, 1 }
 0x1eb   : > { %v2628_v13 = vmax.f32 %v2626_v26, %v2627_v50  ;;  %v2634_v23 = vrot.slane %v2633_v21, 2  ;;  %v739_v0 = vadd.f32 %v7960_v17, %v7922_v42  ;;  %v2640_v35 = vmax.f32 %v2638_v63, %v2639_v5 }
 0x1ec   : > { %v2647_v20 = vmax.f32 %v2645_v49, %v2646_v60  ;;  %v1417_v56 = vcombine.high %v1409_v43, %v1409_v43  ;;  %v1418_v33 = vcombine.high %v1416_v51, %v1416_v51  ;;  %v2708_v25 = vsel %vm1951_vm2, %v1409_v43, -inf }
 0x1ed   : > { %v2629_v38 = vrot.slane %v2628_v13, 1  ;;  %v2635_v19 = vmax.f32 %v2633_v21, %v2634_v23  ;;  %v2722_v14 = vsel %vm1951_vm2, %v1416_v51, -inf  ;;  %v2641_v39 = vrot.slane %v2640_v35, 2 }
 0x1ee   : > { %v2648_v7 = vrot.slane %v2647_v20, 2  ;;  %v2709_v29 = vrot.slane %v2708_v25, 4  ;;  %v2715_v1 = vsel %vm1951_vm2, %v1417_v56, -inf  ;;  %v2723_v16 = vrot.slane %v2722_v14, 4 }
 0x1ef   : > { %v2630_v37 = vmax.f32 %v2628_v13, %v2629_v38  ;;  %v2636_v6 = vrot.slane %v2635_v19, 1  ;;  %v2716_v12 = vrot.slane %v2715_v1, 4  ;;  %v2642_v42 = vmax.f32 %v2640_v35, %v2641_v39  ;;  %v8252_v39 = vld [vmem:[%s9587_s2] ss:$0 sm:$0xff] }
 0x1f0   : > { %v2649_v17 = vmax.f32 %v2647_v20, %v2648_v7  ;;  %v2710_v2 = vmax.f32 %v2708_v25, %v2709_v29  ;;  %v2729_v46 = vsel %vm1951_vm2, %v1418_v33, -inf  ;;  %v2724_v45 = vmax.f32 %v2722_v14, %v2723_v16  ;;  %v3798_v16 = vld [vmem:[#allocation2 + $0xb1] sm:$0xff] }
 0x1f1   : > { %v2637_v30 = vmax.f32 %v2635_v19, %v2636_v6  ;;  %v2717_v3 = vmax.f32 %v2715_v1, %v2716_v12  ;;  %v2730_v31 = vrot.slane %v2729_v46, 4  ;;  %v2643_v61 = vrot.slane %v2642_v42, 1  ;;  %7023 = vmatmul.mubr.msk.f32.gmra.mrb[10].mxu1 %vm3736_vm10, %v3798_v16 }
 0x1f2   : > { %v2650_v18 = vrot.slane %v2649_v17, 1  ;;  %v2711_v58 = vrot.slane %v2710_v2, 2  ;;  %v873_v11 = vmax.f32 %v739_v0, 0.0  ;;  %v2725_v28 = vrot.slane %v2724_v45, 2 }
 0x1f3   : > { %v3628_v62 = vsel %vm3537_vm3, %v2637_v30, %v2630_v37  ;;  %v2718_v26 = vrot.slane %v2717_v3, 2  ;;  %v2731_v63 = vmax.f32 %v2729_v46, %v2730_v31  ;;  %v2644_v49 = vmax.f32 %v2642_v42, %v2643_v61 }
 0x1f4   : > { %v2651_v54 = vmax.f32 %v2649_v17, %v2650_v18  ;;  %v2712_v50 = vmax.f32 %v2710_v2, %v2711_v58  ;;  %v1385_v21 = vcombine.high %v873_v11, %v873_v11  ;;  %v2726_v60 = vmax.f32 %v2724_v45, %v2725_v28  ;;  %v8277_v18 = vpop.f32.mrb[42].mxu0 }
 0x1f5   : > { %v2719_v5 = vmax.f32 %v2717_v3, %v2718_v26  ;;  %v2732_v43 = vrot.slane %v2731_v63, 2  ;;  %v1392_v51 = vrot.slane %v873_v11, %v7664_v57  ;;  %v2679_v13 = vmax.f32 %v2677_v24, %v2678_v15 }
 0x1f6   : > { %v3629_v23 = vsel %vm3539_vm4, %v2644_v49, %v3628_v62  ;;  %v2713_v35 = vrot.slane %v2712_v50, 1  ;;  %v1399_v0 = vrot.slane %v1385_v21, %v7664_v57  ;;  %v2727_v33 = vrot.slane %v2726_v60, 1 }
 0x1f7   : > { %v3630_v20 = vsel %vm3541_vm5, %v2651_v54, %v3629_v23  ;;  %v2720_v56 = vrot.slane %v2719_v5, 1  ;;  %v2733_v38 = vmax.f32 %v2731_v63, %v2732_v43  ;;  %v1400_v25 = vcombine.high %v1392_v51, %v1392_v51  ;;  %v8284_v23 = vpop.f32.mrb[43].mxu0 }
 0x1f8   : > { %v3631_v19 = vsel %vm3543_vm6, %v8219_v4, %v3630_v20  ;;  %v1401_v14 = vcombine.high %v1399_v0, %v1399_v0  ;;  %v754_v24 = vadd.f32 %v8252_v39, %v7954_v59  ;;  %v8258_v7 = vmax.f32 %v2712_v50, %v2713_v35 }
 0x1f9   : > { %v3632_v15 = vsel %vm3545_vm7, %v8227_v27, %v3631_v19  ;;  %v8260_v29 = vmax.f32 %v2719_v5, %v2720_v56  ;;  %v2734_v1 = vrot.slane %v2733_v38, 1  ;;  %v2680_v37 = vsel %vm1951_vm2, %v1392_v51, -inf }
 0x1fa   : > { %v3633_v4 = vsel %vm3547_vm8, %v8229_v8, %v3632_v15  ;;  %v2687_v6 = vsel %vm1951_vm2, %v1400_v25, -inf  ;;  %v2694_v12 = vsel %vm1951_vm2, %v1399_v0, -inf  ;;  %v8268_v42 = vmax.f32 %v2726_v60, %v2727_v33 }
 0x1fb   : > { %v3634_v59 = vsel %vm3549_vm9, %v2679_v13, %v3633_v4  ;;  %v2681_v27 = vrot.slane %v2680_v37, 4  ;;  %v2688_v17 = vrot.slane %v2687_v6, 4  ;;  %v2695_v2 = vrot.slane %v2694_v12, 4 }
 0x1fc   : > { %3749 = vst.msk [vmem:[#allocation2 + $0xc1] sm:$0xff] %vm3736_vm10, %v3634_v59  ;;  %v2701_v8 = vsel %vm1951_vm2, %v1401_v14, -inf  ;;  %v876_v46 = vmax.f32 %v754_v24, 0.0  ;;  %v749_v30 = vadd.f32 %v8252_v39, %v7967_v52  ;;  %v8275_v3 = vmax.f32 %v2733_v38, %v2734_v1 }
 0x1fd   : > { %v2682_v45 = vmax.f32 %v2680_v37, %v2681_v27  ;;  %v2689_v31 = vmax.f32 %v2687_v6, %v2688_v17  ;;  %v2702_v61 = vrot.slane %v2701_v8, 4  ;;  %v2696_v58 = vmax.f32 %v2694_v12, %v2695_v2 }
 0x1fe   : > { %v1436_v11 = vcombine.high %v876_v46, %v876_v46  ;;  %v1443_v62 = vrot.slane %v876_v46, %v7664_v57  ;;  %v764_v26 = vadd.f32 %v8252_v39, %v8002_v44  ;;  %v875_v54 = vmax.f32 %v749_v30, 0.0 }
 0x1ff   : > { %v2683_v28 = vrot.slane %v2682_v45, 2  ;;  %v2690_v63 = vrot.slane %v2689_v31, 2  ;;  %v2703_v49 = vmax.f32 %v2701_v8, %v2702_v61  ;;  %v2697_v50 = vrot.slane %v2696_v58, 2 }
 0x200   : > { %v1450_v52 = vrot.slane %v1436_v11, %v7664_v57  ;;  %v1451_v21 = vcombine.high %v1443_v62, %v1443_v62  ;;  %v2764_v5 = vsel %vm1951_vm2, %v1443_v62, -inf  ;;  %v1419_v46 = vcombine.high %v875_v54, %v875_v54 }
 0x201   : > { %v2684_v60 = vmax.f32 %v2682_v45, %v2683_v28  ;;  %v2691_v43 = vmax.f32 %v2689_v31, %v2690_v63  ;;  %v2704_v51 = vrot.slane %v2703_v49, 2  ;;  %v2765_v13 = vrot.slane %v2764_v5, 4 }
 0x202   : > { %v2698_v35 = vmax.f32 %v2696_v58, %v2697_v50  ;;  %v1452_v0 = vcombine.high %v1450_v52, %v1450_v52  ;;  %v2771_v44 = vsel %vm1951_vm2, %v1451_v21, -inf  ;;  %v2778_v20 = vsel %vm1951_vm2, %v1450_v52, -inf }
 0x203   : > { %v2685_v56 = vrot.slane %v2684_v60, 1  ;;  %v2692_v33 = vrot.slane %v2691_v43, 1  ;;  %v2705_v38 = vmax.f32 %v2703_v49, %v2704_v51  ;;  %v2766_v19 = vmax.f32 %v2764_v5, %v2765_v13 }
 0x204   : > { %v2699_v25 = vrot.slane %v2698_v35, 1  ;;  %v2772_v14 = vrot.slane %v2771_v44, 4  ;;  %v2779_v24 = vrot.slane %v2778_v20, 4  ;;  %v2785_v15 = vsel %vm1951_vm2, %v1452_v0, -inf }
 0x205   : > { %v2686_v1 = vmax.f32 %v2684_v60, %v2685_v56  ;;  %v2693_v4 = vmax.f32 %v2691_v43, %v2692_v33  ;;  %v2706_v37 = vrot.slane %v2705_v38, 1  ;;  %v2767_v6 = vrot.slane %v2766_v19, 2 }
 0x206   : > { %v2700_v12 = vmax.f32 %v2698_v35, %v2699_v25  ;;  %v2773_v16 = vmax.f32 %v2771_v44, %v2772_v14  ;;  %v2780_v59 = vmax.f32 %v2778_v20, %v2779_v24  ;;  %v2786_v27 = vrot.slane %v2785_v15, 4  ;;  %v3799_v20 = vld [vmem:[#allocation2 + $0xc1] sm:$0xff] }
 0x207   : > { %v2707_v17 = vmax.f32 %v2705_v38, %v2706_v37  ;;  %v3635_v2 = vsel %vm3537_vm3, %v2693_v4, %v2686_v1  ;;  %v2768_v8 = vmax.f32 %v2766_v19, %v2767_v6  ;;  %v1426_v62 = vrot.slane %v875_v54, %v7664_v57  ;;  %7025 = vmatprep.mubr.msk.f32.mxu1 %vm3736_vm10, %v3799_v20  ;;  %v8319_v1 = vpop.f32.mrb[44].mxu0 }
 0x208   : > { %v3636_v30 = vsel %vm3539_vm4, %v2700_v12, %v3635_v2  ;;  %v2774_v45 = vrot.slane %v2773_v16, 2  ;;  %v2781_v31 = vrot.slane %v2780_v59, 2  ;;  %v2787_v61 = vmax.f32 %v2785_v15, %v2786_v27 }
 0x209   : > { %v3637_v58 = vsel %vm3541_vm5, %v2707_v17, %v3636_v30  ;;  %v2769_v11 = vrot.slane %v2768_v8, 1  ;;  %v1433_v28 = vrot.slane %v1419_v46, %v7664_v57  ;;  %v1434_v5 = vcombine.high %v1426_v62, %v1426_v62 }
 0x20a   : > { %v3638_v63 = vsel %vm3543_vm6, %v8258_v7, %v3637_v58  ;;  %v2775_v49 = vmax.f32 %v2773_v16, %v2774_v45  ;;  %v8296_v50 = vmax.f32 %v2780_v59, %v2781_v31  ;;  %v2788_v52 = vrot.slane %v2787_v61, 2 }
 0x20b   : > { %v3639_v21 = vsel %vm3545_vm7, %v8260_v29, %v3638_v63  ;;  %v1435_v60 = vcombine.high %v1433_v28, %v1433_v28  ;;  %v878_v43 = vmax.f32 %v764_v26, 0.0  ;;  %v2736_v7 = vsel %vm1951_vm2, %v1426_v62, -inf }
 0x20c   : > { %v3640_v51 = vsel %vm3547_vm8, %v8268_v42, %v3639_v21  ;;  %v2776_v13 = vrot.slane %v2775_v49, 1  ;;  %v8302_v54 = vmax.f32 %v2787_v61, %v2788_v52  ;;  %v2743_v0 = vsel %vm1951_vm2, %v1434_v5, -inf }
 0x20d   : > { %v3641_v35 = vsel %vm3549_vm9, %v8275_v3, %v3640_v51  ;;  %v2750_v44 = vsel %vm1951_vm2, %v1433_v28, -inf  ;;  %v8310_v29 = vmax.f32 %v2768_v8, %v2769_v11  ;;  %v2783_v42 = vrot.slane %v8296_v50, 1 }
 0x20e   : > { %3750 = vst.msk [vmem:[#allocation2 + $0xd1] sm:$0xff] %vm3736_vm10, %v3641_v35  ;;  %v8312_v26 = vmax.f32 %v2775_v49, %v2776_v13  ;;  %v2737_v56 = vrot.slane %v2736_v7, 4  ;;  %v2744_v33 = vrot.slane %v2743_v0, 4  ;;  %v2751_v3 = vrot.slane %v2750_v44, 4  ;;  %v8328_v13 = vpop.f32.mrb[45].mxu0 }
 0x20f   : > { %v2757_v38 = vsel %vm1951_vm2, %v1435_v60, -inf  ;;  %v1470_v19 = vcombine.high %v878_v43, %v878_v43  ;;  %v2790_v25 = vrot.slane %v8302_v54, 1  ;;  %v1477_v15 = vrot.slane %v878_v43, %v7664_v57 }
 0x210   : > { %v2738_v14 = vmax.f32 %v2736_v7, %v2737_v56  ;;  %v2758_v24 = vrot.slane %v2757_v38, 4  ;;  %v2745_v4 = vmax.f32 %v2743_v0, %v2744_v33  ;;  %v2752_v37 = vmax.f32 %v2750_v44, %v2751_v3 }
 0x211   : > { %v1484_v6 = vrot.slane %v1470_v19, %v7664_v57  ;;  %v759_v12 = vadd.f32 %v8252_v39, %v8013_v22  ;;  %v1485_v27 = vcombine.high %v1477_v15, %v1477_v15  ;;  %v2820_v17 = vsel %vm1951_vm2, %v1477_v15, -inf }
 0x212   : > { %v2739_v16 = vrot.slane %v2738_v14, 2  ;;  %v2759_v59 = vmax.f32 %v2757_v38, %v2758_v24  ;;  %v2746_v2 = vrot.slane %v2745_v4, 2  ;;  %v2753_v8 = vrot.slane %v2752_v37, 2 }
 0x213   : > { %v1486_v46 = vcombine.high %v1484_v6, %v1484_v6  ;;  %v2821_v30 = vrot.slane %v2820_v17, 4  ;;  %v2827_v61 = vsel %vm1951_vm2, %v1485_v27, -inf  ;;  %v2834_v58 = vsel %vm1951_vm2, %v1484_v6, -inf }
 0x214   : > { %v2740_v45 = vmax.f32 %v2738_v14, %v2739_v16  ;;  %v2760_v31 = vrot.slane %v2759_v59, 2  ;;  %v2747_v11 = vmax.f32 %v2745_v4, %v2746_v2  ;;  %v2754_v62 = vmax.f32 %v2752_v37, %v2753_v8 }
 0x215   : > { %v2822_v28 = vmax.f32 %v2820_v17, %v2821_v30  ;;  %v2828_v63 = vrot.slane %v2827_v61, 4  ;;  %v2835_v52 = vrot.slane %v2834_v58, 4  ;;  %v2841_v21 = vsel %vm1951_vm2, %v1486_v46, -inf }
 0x216   : > { %v2741_v22 = vrot.slane %v2740_v45, 1  ;;  %v2761_v49 = vmax.f32 %v2759_v59, %v2760_v31  ;;  %v2748_v5 = vrot.slane %v2747_v11, 1  ;;  %v2755_v60 = vrot.slane %v2754_v62, 1 }
 0x217   : > { %v2823_v43 = vrot.slane %v2822_v28, 2  ;;  %v2829_v51 = vmax.f32 %v2827_v61, %v2828_v63  ;;  %v2836_v0 = vmax.f32 %v2834_v58, %v2835_v52  ;;  %v2842_v44 = vrot.slane %v2841_v21, 4 }
 0x218   : > { %v2742_v35 = vmax.f32 %v2740_v45, %v2741_v22  ;;  %v2762_v7 = vrot.slane %v2761_v49, 1  ;;  %v2749_v20 = vmax.f32 %v2747_v11, %v2748_v5  ;;  %v2756_v56 = vmax.f32 %v2754_v62, %v2755_v60 }
 0x219   : > { %v2824_v33 = vmax.f32 %v2822_v28, %v2823_v43  ;;  %v2830_v3 = vrot.slane %v2829_v51, 2  ;;  %v2837_v19 = vrot.slane %v2836_v0, 2  ;;  %v2843_v14 = vmax.f32 %v2841_v21, %v2842_v44 }
 0x21a   : > { %v2763_v38 = vmax.f32 %v2761_v49, %v2762_v7  ;;  %v877_v24 = vmax.f32 %v759_v12, 0.0  ;;  %v2784_v15 = vmax.f32 %v8296_v50, %v2783_v42  ;;  %v3642_v4 = vsel %vm3537_vm3, %v2749_v20, %v2742_v35  ;;  %v3800_v49 = vld [vmem:[#allocation2 + $0xd1] sm:$0xff] }
 0x21b   : > { %v2825_v37 = vrot.slane %v2824_v33, 1  ;;  %v2831_v6 = vmax.f32 %v2829_v51, %v2830_v3  ;;  %v3643_v16 = vsel %vm3539_vm4, %v2756_v56, %v3642_v4  ;;  %v2838_v59 = vmax.f32 %v2836_v0, %v2837_v19  ;;  %7026 = vmatmul.mubr.msk.f32.gmra.mrb[12].mxu1 %vm3736_vm10, %v3800_v49  ;;  %v8361_v56 = vpop.f32.mrb[46].mxu0 }
 0x21c   : > { %v2844_v27 = vrot.slane %v2843_v14, 2  ;;  %v1453_v17 = vcombine.high %v877_v24, %v877_v24  ;;  %v2791_v2 = vmax.f32 %v8302_v54, %v2790_v25  ;;  %v3644_v8 = vsel %vm3541_vm5, %v2763_v38, %v3643_v16 }
 0x21d   : > { %v1460_v46 = vrot.slane %v877_v24, %v7664_v57  ;;  %v774_v12 = vadd.f32 %v8252_v39, %v8052_v34  ;;  %v3645_v50 = vsel %vm3543_vm6, %v8310_v29, %v3644_v8  ;;  %v2832_v42 = vrot.slane %v2831_v6, 1  ;;  %v8368_v8 = vpop.f32.mrb[47].mxu0 }
 0x21e   : > { %v2845_v30 = vmax.f32 %v2843_v14, %v2844_v27  ;;  %v1467_v45 = vrot.slane %v1453_v17, %v7664_v57  ;;  %v3646_v31 = vsel %vm3545_vm7, %v8312_v26, %v3645_v50  ;;  %v8343_v61 = vmax.f32 %v2824_v33, %v2825_v37 }
 0x21f   : > { %v1468_v54 = vcombine.high %v1460_v46, %v1460_v46  ;;  %v2792_v25 = vsel %vm1951_vm2, %v1460_v46, -inf  ;;  %v3647_v58 = vsel %vm3547_vm8, %v2784_v15, %v3646_v31  ;;  %v2839_v11 = vrot.slane %v2838_v59, 1 }
 0x220   : > { %v2846_v62 = vrot.slane %v2845_v30, 1  ;;  %v1469_v34 = vcombine.high %v1467_v45, %v1467_v45  ;;  %v3648_v28 = vsel %vm3549_vm9, %v2791_v2, %v3647_v58  ;;  %v2793_v29 = vrot.slane %v2792_v25, 4 }
 0x221   : > { %v2799_v63 = vsel %vm1951_vm2, %v1468_v54, -inf  ;;  %v2806_v22 = vsel %vm1951_vm2, %v1467_v45, -inf  ;;  %3751 = vst.msk [vmem:[#allocation2 + $0xe1] sm:$0xff] %vm3736_vm10, %v3648_v28  ;;  %v8351_v26 = vmax.f32 %v2831_v6, %v2832_v42  ;;  %v880_v51 = vmax.f32 %v774_v12, 0.0 }
 0x222   : > { %v2800_v52 = vrot.slane %v2799_v63, 4  ;;  %v2807_v21 = vrot.slane %v2806_v22, 4  ;;  %v2813_v5 = vsel %vm1951_vm2, %v1469_v34, -inf  ;;  %v2794_v60 = vmax.f32 %v2792_v25, %v2793_v29 }
 0x223   : > { %v2814_v43 = vrot.slane %v2813_v5, 4  ;;  %v769_v35 = vadd.f32 %v8252_v39, %v8062_v32  ;;  %v8357_v7 = vmax.f32 %v2838_v59, %v2839_v11  ;;  %v8359_v0 = vmax.f32 %v2845_v30, %v2846_v62 }
 0x224   : > { %v2801_v44 = vmax.f32 %v2799_v63, %v2800_v52  ;;  %v2808_v20 = vmax.f32 %v2806_v22, %v2807_v21  ;;  %v2795_v33 = vrot.slane %v2794_v60, 2  ;;  %v1504_v38 = vcombine.high %v880_v51, %v880_v51 }
 0x225   : > { %v2815_v3 = vmax.f32 %v2813_v5, %v2814_v43  ;;  %v1511_v19 = vrot.slane %v880_v51, %v7664_v57  ;;  %v879_v15 = vmax.f32 %v769_v35, 0.0  ;;  %v784_v4 = vadd.f32 %v8252_v39, %v8100_v10 }
 0x226   : > { %v2802_v14 = vrot.slane %v2801_v44, 2  ;;  %v2809_v24 = vrot.slane %v2808_v20, 2  ;;  %v2796_v32 = vmax.f32 %v2794_v60, %v2795_v33  ;;  %v1518_v6 = vrot.slane %v1504_v38, %v7664_v57 }
 0x227   : > { %v2816_v37 = vrot.slane %v2815_v3, 2  ;;  %v1519_v16 = vcombine.high %v1511_v19, %v1511_v19  ;;  %v2876_v17 = vsel %vm1951_vm2, %v1511_v19, -inf  ;;  %v1487_v2 = vcombine.high %v879_v15, %v879_v15 }
 0x228   : > { %v2803_v59 = vmax.f32 %v2801_v44, %v2802_v14  ;;  %v2810_v27 = vmax.f32 %v2808_v20, %v2809_v24  ;;  %v2797_v46 = vrot.slane %v2796_v32, 1  ;;  %v1520_v50 = vcombine.high %v1518_v6, %v1518_v6 }
 0x229   : > { %v2817_v12 = vmax.f32 %v2815_v3, %v2816_v37  ;;  %v2877_v42 = vrot.slane %v2876_v17, 4  ;;  %v2883_v10 = vsel %vm1951_vm2, %v1519_v16, -inf  ;;  %v2890_v31 = vsel %vm1951_vm2, %v1518_v6, -inf }
 0x22a   : > { %v2804_v30 = vrot.slane %v2803_v59, 1  ;;  %v2811_v45 = vrot.slane %v2810_v27, 1  ;;  %v2798_v54 = vmax.f32 %v2796_v32, %v2797_v46  ;;  %v2884_v11 = vrot.slane %v2883_v10, 4 }
 0x22b   : > { %v2818_v25 = vrot.slane %v2817_v12, 1  ;;  %v2878_v58 = vmax.f32 %v2876_v17, %v2877_v42  ;;  %v2891_v28 = vrot.slane %v2890_v31, 4  ;;  %v2897_v29 = vsel %vm1951_vm2, %v1520_v50, -inf }
 0x22c   : > { %v2805_v62 = vmax.f32 %v2803_v59, %v2804_v30  ;;  %v2812_v34 = vmax.f32 %v2810_v27, %v2811_v45  ;;  %v2885_v49 = vmax.f32 %v2883_v10, %v2884_v11  ;;  %v2898_v52 = vrot.slane %v2897_v29, 4 }
 0x22d   : > { %v2819_v63 = vmax.f32 %v2817_v12, %v2818_v25  ;;  %v2879_v22 = vrot.slane %v2878_v58, 2  ;;  %v2892_v5 = vmax.f32 %v2890_v31, %v2891_v28  ;;  %v1494_v60 = vrot.slane %v879_v15, %v7664_v57 }
 0x22e   : > { %v3649_v21 = vsel %vm3537_vm3, %v2805_v62, %v2798_v54  ;;  %v1501_v43 = vrot.slane %v1487_v2, %v7664_v57  ;;  %v2886_v44 = vrot.slane %v2885_v49, 2  ;;  %v2899_v20 = vmax.f32 %v2897_v29, %v2898_v52 }
 0x22f   : > { %v3650_v51 = vsel %vm3539_vm4, %v2812_v34, %v3649_v21  ;;  %v2880_v35 = vmax.f32 %v2878_v58, %v2879_v22  ;;  %v2893_v3 = vrot.slane %v2892_v5, 2  ;;  %v1502_v38 = vcombine.high %v1494_v60, %v1494_v60 }
 0x230   : > { %v3651_v33 = vsel %vm3541_vm5, %v2819_v63, %v3650_v51  ;;  %v1503_v19 = vcombine.high %v1501_v43, %v1501_v43  ;;  %v8380_v32 = vmax.f32 %v2885_v49, %v2886_v44  ;;  %v2900_v37 = vrot.slane %v2899_v20, 2 }
 0x231   : > { %v3652_v14 = vsel %vm3543_vm6, %v8343_v61, %v3651_v33  ;;  %v2881_v24 = vrot.slane %v2880_v35, 1  ;;  %v8384_v6 = vmax.f32 %v2892_v5, %v2893_v3  ;;  %v2848_v16 = vsel %vm1951_vm2, %v1494_v60, -inf  ;;  %v3801_v61 = vld [vmem:[#allocation2 + $0xe1] sm:$0xff] }
 0x232   : > { %v3653_v15 = vsel %vm3545_vm7, %v8351_v26, %v3652_v14  ;;  %v2855_v59 = vsel %vm1951_vm2, %v1502_v38, -inf  ;;  %v8390_v17 = vmax.f32 %v2899_v20, %v2900_v37  ;;  %v882_v2 = vmax.f32 %v784_v4, 0.0  ;;  %7028 = vmatprep.mubr.msk.f32.mxu1 %vm3736_vm10, %v3801_v61 }
 0x233   : > { %v3654_v27 = vsel %vm3547_vm8, %v8357_v7, %v3653_v15  ;;  %v2849_v12 = vrot.slane %v2848_v16, 4  ;;  %v2856_v50 = vrot.slane %v2855_v59, 4  ;;  %v779_v26 = vadd.f32 %v8252_v39, %v8113_v40 }
 0x234   : > { %v3655_v46 = vsel %vm3549_vm9, %v8359_v0, %v3654_v27  ;;  %v8398_v42 = vmax.f32 %v2880_v35, %v2881_v24  ;;  %v2888_v7 = vrot.slane %v8380_v32, 1  ;;  %v2862_v30 = vsel %vm1951_vm2, %v1501_v43, -inf }
 0x235   : > { %3752 = vst.msk [vmem:[#allocation2 + $0xf1] sm:$0xff] %vm3736_vm10, %v3655_v46  ;;  %v2869_v4 = vsel %vm1951_vm2, %v1503_v19, -inf  ;;  %v2895_v45 = vrot.slane %v8384_v6, 1  ;;  %v2850_v0 = vmax.f32 %v2848_v16, %v2849_v12  ;;  %v2857_v10 = vmax.f32 %v2855_v59, %v2856_v50 }
 0x236   : > { %v2863_v31 = vrot.slane %v2862_v30, 4  ;;  %v2902_v54 = vrot.slane %v8390_v17, 1  ;;  %v2870_v40 = vrot.slane %v2869_v4, 4  ;;  %v1538_v25 = vcombine.high %v882_v2, %v882_v2 }
 0x237   : > { %v1545_v58 = vrot.slane %v882_v2, %v7664_v57  ;;  %v2851_v11 = vrot.slane %v2850_v0, 2  ;;  %v2858_v62 = vrot.slane %v2857_v10, 2  ;;  %v881_v28 = vmax.f32 %v779_v26, 0.0 }
 0x238   : > { %v2864_v34 = vmax.f32 %v2862_v30, %v2863_v31  ;;  %v2871_v29 = vmax.f32 %v2869_v4, %v2870_v40  ;;  %v1552_v63 = vrot.slane %v1538_v25, %v7664_v57 }
 0x239   : > { %v1553_v22 = vcombine.high %v1545_v58, %v1545_v58  ;;  %v2932_v49 = vsel %vm1951_vm2, %v1545_v58, -inf  ;;  %v2852_v52 = vmax.f32 %v2850_v0, %v2851_v11  ;;  %v2859_v21 = vmax.f32 %v2857_v10, %v2858_v62 }
 0x23a   : > { %v2865_v5 = vrot.slane %v2864_v34, 2  ;;  %v2933_v60 = vrot.slane %v2932_v49, 4  ;;  %v2872_v43 = vrot.slane %v2871_v29, 2  ;;  %v1554_v51 = vcombine.high %v1552_v63, %v1552_v63 }
 0x23b   : > { %v2939_v35 = vsel %vm1951_vm2, %v1553_v22, -inf  ;;  %v2946_v44 = vsel %vm1951_vm2, %v1552_v63, -inf  ;;  %v2853_v20 = vrot.slane %v2852_v52, 1  ;;  %v2860_v33 = vrot.slane %v2859_v21, 1 }
 0x23c   : > { %v2866_v3 = vmax.f32 %v2864_v34, %v2865_v5  ;;  %v2934_v38 = vmax.f32 %v2932_v49, %v2933_v60  ;;  %v3802_v19 = vld [vmem:[#allocation2 + $0xf1] sm:$0xff]  ;;  %v2873_v14 = vmax.f32 %v2871_v29, %v2872_v43  ;;  %v2940_v24 = vrot.slane %v2939_v35, 4 }
 0x23d   : > { %v2947_v37 = vrot.slane %v2946_v44, 4  ;;  %v2953_v15 = vsel %vm1951_vm2, %v1554_v51, -inf  ;;  %7029 = vmatmul.mubr.msk.f32.gmra.mrb[14].mxu1 %vm3736_vm10, %v3802_v19  ;;  %v2854_v16 = vmax.f32 %v2852_v52, %v2853_v20  ;;  %v2861_v59 = vmax.f32 %v2859_v21, %v2860_v33 }
 0x23e   : > { %v2867_v27 = vrot.slane %v2866_v3, 1  ;;  %v2935_v2 = vrot.slane %v2934_v38, 2  ;;  %v2874_v61 = vrot.slane %v2873_v14, 1  ;;  %v2941_v46 = vmax.f32 %v2939_v35, %v2940_v24 }
 0x23f   : > { %v2948_v12 = vmax.f32 %v2946_v44, %v2947_v37  ;;  %v2954_v50 = vrot.slane %v2953_v15, 4  ;;  %v3656_v30 = vsel %vm3537_vm3, %v2861_v59, %v2854_v16  ;;  %v1521_v0 = vcombine.high %v881_v28, %v881_v28 }
 0x240   : > { %v2868_v26 = vmax.f32 %v2866_v3, %v2867_v27  ;;  %v2936_v4 = vmax.f32 %v2934_v38, %v2935_v2  ;;  %v2875_v10 = vmax.f32 %v2873_v14, %v2874_v61  ;;  %v2942_v31 = vrot.slane %v2941_v46, 2 }
 0x241   : > { %v2949_v40 = vrot.slane %v2948_v12, 2  ;;  %v2955_v25 = vmax.f32 %v2953_v15, %v2954_v50  ;;  %v2889_v58 = vmax.f32 %v8380_v32, %v2888_v7  ;;  %v1528_v62 = vrot.slane %v881_v28, %v7664_v57 }
 0x242   : > { %v3657_v11 = vsel %vm3539_vm4, %v2868_v26, %v3656_v30  ;;  %v1535_v34 = vrot.slane %v1521_v0, %v7664_v57  ;;  %v2943_v63 = vmax.f32 %v2941_v46, %v2942_v31  ;;  %v2896_v52 = vmax.f32 %v8384_v6, %v2895_v45 }
 0x243   : > { %v3658_v29 = vsel %vm3541_vm5, %v2875_v10, %v3657_v11  ;;  %v2950_v22 = vmax.f32 %v2948_v12, %v2949_v40  ;;  %v2956_v49 = vrot.slane %v2955_v25, 2  ;;  %v1536_v5 = vcombine.high %v1528_v62, %v1528_v62 }
 0x244   : > { %v3659_v21 = vsel %vm3543_vm6, %v8398_v42, %v3658_v29  ;;  %v1537_v60 = vcombine.high %v1535_v34, %v1535_v34  ;;  %v2903_v32 = vmax.f32 %v8390_v17, %v2902_v54  ;;  %v2937_v43 = vrot.slane %v2936_v4, 1 }
 0x245   : > { %v3660_v7 = vsel %vm3545_vm7, %v2889_v58, %v3659_v21  ;;  %v2944_v28 = vrot.slane %v2943_v63, 1  ;;  %v2904_v35 = vsel %vm1951_vm2, %v1528_v62, -inf  ;;  %v2911_v44 = vsel %vm1951_vm2, %v1536_v5, -inf }
 0x246   : > { %v3661_v51 = vsel %vm3547_vm8, %v2896_v52, %v3660_v7  ;;  %v2918_v20 = vsel %vm1951_vm2, %v1535_v34, -inf  ;;  %v2951_v45 = vrot.slane %v2950_v22, 1  ;;  %v2957_v42 = vmax.f32 %v2955_v25, %v2956_v49 }
 0x247   : > { %v3662_v6 = vsel %vm3549_vm9, %v2903_v32, %v3661_v51  ;;  %v2905_v33 = vrot.slane %v2904_v35, 4  ;;  %v2912_v17 = vrot.slane %v2911_v44, 4  ;;  %v2919_v54 = vrot.slane %v2918_v20, 4 }
 0x248   : > { %3753 = vst.msk [vmem:[#allocation2 + $0x101] sm:$0xff] %vm3736_vm10, %v3662_v6  ;;  %v2925_v3 = vsel %vm1951_vm2, %v1537_v60, -inf  ;;  %v2938_v38 = vmax.f32 %v2936_v4, %v2937_v43  ;;  %v794_v14 = vadd.f32 %v8252_v39, %v8140_v55  ;;  %v789_v24 = vadd.f32 %v8252_v39, %v8157_v36 }
 0x249   : > { %v2926_v19 = vrot.slane %v2925_v3, 4  ;;  %v2945_v37 = vmax.f32 %v2943_v63, %v2944_v28  ;;  %v2906_v15 = vmax.f32 %v2904_v35, %v2905_v33  ;;  %v2913_v16 = vmax.f32 %v2911_v44, %v2912_v17 }
 0x24a   : > { %v2920_v59 = vmax.f32 %v2918_v20, %v2919_v54  ;;  %v2952_v27 = vmax.f32 %v2950_v22, %v2951_v45  ;;  %v884_v61 = vmax.f32 %v794_v14, 0.0  ;;  %v883_v46 = vmax.f32 %v789_v24, 0.0 }
 0x24b   : > { %v2927_v2 = vmax.f32 %v2925_v3, %v2926_v19  ;;  %v2958_v12 = vrot.slane %v2957_v42, 1  ;;  %v2907_v50 = vrot.slane %v2906_v15, 2  ;;  %v2914_v26 = vrot.slane %v2913_v16, 2 }
 0x24c   : > { %v2921_v30 = vrot.slane %v2920_v59, 2  ;;  %v1572_v0 = vcombine.high %v884_v61, %v884_v61  ;;  %v1579_v10 = vrot.slane %v884_v61, %v7664_v57  ;;  %v1555_v55 = vcombine.high %v883_v46, %v883_v46 }
 0x24d   : > { %v2928_v4 = vrot.slane %v2927_v2, 2  ;;  %v2908_v31 = vmax.f32 %v2906_v15, %v2907_v50  ;;  %v2915_v40 = vmax.f32 %v2913_v16, %v2914_v26  ;;  %v1562_v25 = vrot.slane %v883_v46, %v7664_v57 }
 0x24e   : > { %v2922_v36 = vmax.f32 %v2920_v59, %v2921_v30  ;;  %v1586_v11 = vrot.slane %v1572_v0, %v7664_v57  ;;  %v1587_v62 = vcombine.high %v1579_v10, %v1579_v10  ;;  %v2988_v34 = vsel %vm1951_vm2, %v1579_v10, -inf }
 0x24f   : > { %v2929_v58 = vmax.f32 %v2927_v2, %v2928_v4  ;;  %v3803_v29 = vld [vmem:[#allocation2 + $0x101] sm:$0xff]  ;;  %v2909_v63 = vrot.slane %v2908_v31, 1  ;;  %v2916_v22 = vrot.slane %v2915_v40, 1  ;;  %v2989_v52 = vrot.slane %v2988_v34, 4 }
 0x250   : > { %v2923_v49 = vrot.slane %v2922_v36, 1  ;;  %7031 = vmatprep.mubr.msk.f32.mxu1 %vm3736_vm10, %v3803_v29  ;;  %v1588_v5 = vcombine.high %v1586_v11, %v1586_v11  ;;  %v2995_v60 = vsel %vm1951_vm2, %v1587_v62, -inf  ;;  %v3002_v32 = vsel %vm1951_vm2, %v1586_v11, -inf }
 0x251   : > { %v2930_v21 = vrot.slane %v2929_v58, 1  ;;  %v2910_v7 = vmax.f32 %v2908_v31, %v2909_v63  ;;  %v2917_v43 = vmax.f32 %v2915_v40, %v2916_v22  ;;  %v2990_v51 = vmax.f32 %v2988_v34, %v2989_v52 }
 0x252   : > { %v2924_v28 = vmax.f32 %v2922_v36, %v2923_v49  ;;  %v2996_v44 = vrot.slane %v2995_v60, 4  ;;  %v3003_v20 = vrot.slane %v3002_v32, 4  ;;  %v3009_v6 = vsel %vm1951_vm2, %v1588_v5, -inf }
 0x253   : > { %v2931_v35 = vmax.f32 %v2929_v58, %v2930_v21  ;;  %v3663_v45 = vsel %vm3537_vm3, %v2917_v43, %v2910_v7  ;;  %v2991_v33 = vrot.slane %v2990_v51, 2  ;;  %v3010_v17 = vrot.slane %v3009_v6, 4 }
 0x254   : > { %v1569_v54 = vrot.slane %v1555_v55, %v7664_v57  ;;  %v3664_v3 = vsel %vm3539_vm4, %v2924_v28, %v3663_v45  ;;  %v2997_v19 = vmax.f32 %v2995_v60, %v2996_v44  ;;  %v3004_v14 = vmax.f32 %v3002_v32, %v3003_v20 }
 0x255   : > { %v1570_v24 = vcombine.high %v1562_v25, %v1562_v25  ;;  %v2959_v15 = vmax.f32 %v2957_v42, %v2958_v12  ;;  %v3665_v16 = vsel %vm3541_vm5, %v2931_v35, %v3664_v3  ;;  %v3011_v59 = vmax.f32 %v3009_v6, %v3010_v17 }
 0x256   : > { %v804_v2 = vadd.f32 %v8252_v39, %v8183_v47  ;;  %v3666_v61 = vsel %vm3543_vm6, %v2938_v38, %v3665_v16  ;;  %v2998_v46 = vrot.slane %v2997_v19, 2  ;;  %v3005_v50 = vrot.slane %v3004_v14, 2 }
 0x257   : > { %v2960_v26 = vsel %vm1951_vm2, %v1562_v25, -inf  ;;  %v3667_v30 = vsel %vm3545_vm7, %v2945_v37, %v3666_v61  ;;  %v3012_v4 = vrot.slane %v3011_v59, 2  ;;  %v1571_v0 = vcombine.high %v1569_v54, %v1569_v54 }
 0x258   : > { %v2961_v10 = vrot.slane %v2960_v26, 4  ;;  %v3668_v55 = vsel %vm3547_vm8, %v2952_v27, %v3667_v30  ;;  %v2992_v42 = vmax.f32 %v2990_v51, %v2991_v33  ;;  %v2999_v12 = vmax.f32 %v2997_v19, %v2998_v46 }
 0x259   : > { %v2967_v31 = vsel %vm1951_vm2, %v1570_v24, -inf  ;;  %v3669_v40 = vsel %vm3549_vm9, %v2959_v15, %v3668_v55  ;;  %v8454_v47 = vmax.f32 %v3004_v14, %v3005_v50  ;;  %v886_v36 = vmax.f32 %v804_v2, 0.0 }
 0x25a   : > { %v2962_v38 = vmax.f32 %v2960_v26, %v2961_v10  ;;  %3754 = vst.msk [vmem:[#allocation2 + $0x111] sm:$0xff] %vm3736_vm10, %v3669_v40  ;;  %v3013_v25 = vmax.f32 %v3011_v59, %v3012_v4  ;;  %v2968_v58 = vrot.slane %v2967_v31, 4  ;;  %v2974_v37 = vsel %vm1951_vm2, %v1569_v54, -inf }
 0x25b   : > { %v2975_v62 = vrot.slane %v2974_v37, 4  ;;  %v2981_v27 = vsel %vm1951_vm2, %v1571_v0, -inf  ;;  %v799_v34 = vadd.f32 %v8252_v39, %v8197_v9  ;;  %v2993_v29 = vrot.slane %v2992_v42, 1 }
 0x25c   : > { %v2963_v11 = vrot.slane %v2962_v38, 2  ;;  %v3000_v63 = vrot.slane %v2999_v12, 1  ;;  %v2969_v22 = vmax.f32 %v2967_v31, %v2968_v58  ;;  %v2982_v49 = vrot.slane %v2981_v27, 4 }
 0x25d   : > { %v3007_v52 = vrot.slane %v8454_v47, 1  ;;  %v2976_v5 = vmax.f32 %v2974_v37, %v2975_v62  ;;  %v1606_v60 = vcombine.high %v886_v36, %v886_v36  ;;  %v3014_v32 = vrot.slane %v3013_v25, 1 }
 0x25e   : > { %v2964_v21 = vmax.f32 %v2962_v38, %v2963_v11  ;;  %v2970_v7 = vrot.slane %v2969_v22, 2  ;;  %v2983_v43 = vmax.f32 %v2981_v27, %v2982_v49  ;;  %v1613_v28 = vrot.slane %v886_v36, %v7664_v57 }
 0x25f   : > { %v2977_v35 = vrot.slane %v2976_v5, 2  ;;  %v1620_v44 = vrot.slane %v1606_v60, %v7664_v57  ;;  %v885_v20 = vmax.f32 %v799_v34, 0.0  ;;  %v2994_v11 = vmax.f32 %v2992_v42, %v2993_v29 }
 0x260   : > { %v2965_v51 = vrot.slane %v2964_v21, 1  ;;  %v2971_v9 = vmax.f32 %v2969_v22, %v2970_v7  ;;  %v2984_v6 = vrot.slane %v2983_v43, 2  ;;  %v1621_v45 = vcombine.high %v1613_v28, %v1613_v28 }
 0x261   : > { %v3044_v33 = vsel %vm1951_vm2, %v1613_v28, -inf  ;;  %v2978_v54 = vmax.f32 %v2976_v5, %v2977_v35  ;;  %v1622_v3 = vcombine.high %v1620_v44, %v1620_v44  ;;  %v3804_v14 = vld [vmem:[#allocation2 + $0x111] sm:$0xff]  ;;  %v3058_v59 = vsel %vm1951_vm2, %v1620_v44, -inf }
 0x262   : > { %v2966_v17 = vmax.f32 %v2964_v21, %v2965_v51  ;;  %v3045_v19 = vrot.slane %v3044_v33, 4  ;;  %v2972_v24 = vrot.slane %v2971_v9, 1  ;;  %v2985_v15 = vmax.f32 %v2983_v43, %v2984_v6  ;;  %7032 = vmatmul.mubr.msk.f32.gmra.mrb[16].mxu1 %vm3736_vm10, %v3804_v14 }
 0x263   : > { %v3051_v16 = vsel %vm1951_vm2, %v1621_v45, -inf  ;;  %v2979_v2 = vrot.slane %v2978_v54, 1  ;;  %v3059_v50 = vrot.slane %v3058_v59, 4  ;;  %v3065_v4 = vsel %vm1951_vm2, %v1622_v3, -inf }
 0x264   : > { %v3046_v61 = vmax.f32 %v3044_v33, %v3045_v19  ;;  %v3052_v46 = vrot.slane %v3051_v16, 4  ;;  %v2973_v26 = vmax.f32 %v2971_v9, %v2972_v24  ;;  %v2986_v30 = vrot.slane %v2985_v15, 1 }
 0x265   : > { %v1589_v0 = vcombine.high %v885_v20, %v885_v20  ;;  %v2980_v10 = vmax.f32 %v2978_v54, %v2979_v2  ;;  %v3060_v40 = vmax.f32 %v3058_v59, %v3059_v50  ;;  %v3066_v58 = vrot.slane %v3065_v4, 4 }
 0x266   : > { %v3047_v55 = vrot.slane %v3046_v61, 2  ;;  %v3053_v31 = vmax.f32 %v3051_v16, %v3052_v46  ;;  %v2987_v38 = vmax.f32 %v2985_v15, %v2986_v30  ;;  %v3670_v36 = vsel %vm3537_vm3, %v2973_v26, %v2966_v17 }
 0x267   : > { %v1596_v37 = vrot.slane %v885_v20, %v7664_v57  ;;  %v3001_v62 = vmax.f32 %v2999_v12, %v3000_v63  ;;  %v3671_v27 = vsel %vm3539_vm4, %v2980_v10, %v3670_v36  ;;  %v1603_v21 = vrot.slane %v1589_v0, %v7664_v57 }
 0x268   : > { %v3048_v34 = vmax.f32 %v3046_v61, %v3047_v55  ;;  %v3672_v22 = vsel %vm3541_vm5, %v2987_v38, %v3671_v27  ;;  %v3054_v49 = vrot.slane %v3053_v31, 2  ;;  %v3008_v60 = vmax.f32 %v8454_v47, %v3007_v52 }
 0x269   : > { %v1604_v5 = vcombine.high %v1596_v37, %v1596_v37  ;;  %v3015_v7 = vmax.f32 %v3013_v25, %v3014_v32  ;;  %v3673_v43 = vsel %vm3543_vm6, %v2994_v11, %v3672_v22  ;;  %v3061_v28 = vrot.slane %v3060_v40, 2 }
 0x26a   : > { %v3674_v51 = vsel %vm3545_vm7, %v3001_v62, %v3673_v43  ;;  %v3067_v35 = vmax.f32 %v3065_v4, %v3066_v58  ;;  %v1605_v42 = vcombine.high %v1603_v21, %v1603_v21  ;;  %v3016_v12 = vsel %vm1951_vm2, %v1596_v37, -inf }
 0x26b   : > { %v3675_v29 = vsel %vm3547_vm8, %v3008_v60, %v3674_v51  ;;  %v3049_v63 = vrot.slane %v3048_v34, 1  ;;  %v814_v44 = vadd.f32 %v8252_v39, %v8225_v41  ;;  %v3055_v9 = vmax.f32 %v3053_v31, %v3054_v49 }
 0x26c   : > { %v3676_v20 = vsel %vm3549_vm9, %v3015_v7, %v3675_v29  ;;  %v3017_v47 = vrot.slane %v3016_v12, 4  ;;  %v3023_v25 = vsel %vm1951_vm2, %v1604_v5, -inf  ;;  %v3062_v52 = vmax.f32 %v3060_v40, %v3061_v28 }
 0x26d   : > { %3755 = vst.msk [vmem:[#allocation2 + $0x121] sm:$0xff] %vm3736_vm10, %v3676_v20  ;;  %v3024_v32 = vrot.slane %v3023_v25, 4  ;;  %v3030_v6 = vsel %vm1951_vm2, %v1603_v21, -inf  ;;  %v3068_v45 = vrot.slane %v3067_v35, 2  ;;  %v3037_v54 = vsel %vm1951_vm2, %v1605_v42, -inf }
 0x26e   : > { %v3018_v33 = vmax.f32 %v3016_v12, %v3017_v47  ;;  %v3031_v17 = vrot.slane %v3030_v6, 4  ;;  %v3038_v19 = vrot.slane %v3037_v54, 4  ;;  %v888_v41 = vmax.f32 %v814_v44, 0.0  ;;  %v8498_v42 = vld [vmem:[%s9587_s2] ss:$0 sm:$0xff] }
 0x26f   : > { %v3025_v3 = vmax.f32 %v3023_v25, %v3024_v32  ;;  %v809_v14 = vadd.f32 %v8252_v39, %v8240_v48  ;;  %v3050_v24 = vmax.f32 %v3048_v34, %v3049_v63  ;;  %v3056_v15 = vrot.slane %v3055_v9, 1 }
 0x270   : > { %v3019_v16 = vrot.slane %v3018_v33, 2  ;;  %v3032_v59 = vmax.f32 %v3030_v6, %v3031_v17  ;;  %v3039_v61 = vmax.f32 %v3037_v54, %v3038_v19  ;;  %v1640_v46 = vcombine.high %v888_v41, %v888_v41 }
 0x271   : > { %v3026_v2 = vrot.slane %v3025_v3, 2  ;;  %v1647_v50 = vrot.slane %v888_v41, %v7664_v57  ;;  %v3063_v26 = vrot.slane %v3062_v52, 1  ;;  %v887_v0 = vmax.f32 %v809_v14, 0.0 }
 0x272   : > { %v3020_v30 = vmax.f32 %v3018_v33, %v3019_v16  ;;  %v3033_v4 = vrot.slane %v3032_v59, 2  ;;  %v3040_v55 = vrot.slane %v3039_v61, 2  ;;  %v1654_v31 = vrot.slane %v1640_v46, %v7664_v57 }
 0x273   : > { %v3027_v10 = vmax.f32 %v3025_v3, %v3026_v2  ;;  %v1655_v40 = vcombine.high %v1647_v50, %v1647_v50  ;;  %v3069_v38 = vmax.f32 %v3067_v35, %v3068_v45  ;;  %v3100_v36 = vsel %vm1951_vm2, %v1647_v50, -inf }
 0x274   : > { %v3021_v48 = vrot.slane %v3020_v30, 1  ;;  %v3034_v39 = vmax.f32 %v3032_v59, %v3033_v4  ;;  %v3805_v58 = vld [vmem:[#allocation2 + $0x121] sm:$0xff]  ;;  %v3041_v11 = vmax.f32 %v3039_v61, %v3040_v55  ;;  %v1656_v62 = vcombine.high %v1654_v31, %v1654_v31 }
 0x275   : > { %v3028_v37 = vrot.slane %v3027_v10, 1  ;;  %v3101_v27 = vrot.slane %v3100_v36, 4  ;;  %7034 = vmatprep.mubr.msk.f32.mxu1 %vm3736_vm10, %v3805_v58  ;;  %v3107_v49 = vsel %vm1951_vm2, %v1655_v40, -inf  ;;  %v1623_v21 = vcombine.high %v887_v0, %v887_v0 }
 0x276   : > { %v3022_v34 = vmax.f32 %v3020_v30, %v3021_v48  ;;  %v3035_v22 = vrot.slane %v3034_v39, 1  ;;  %v3042_v60 = vrot.slane %v3041_v11, 1  ;;  %v3108_v7 = vrot.slane %v3107_v49, 4 }
 0x277   : > { %v3029_v5 = vmax.f32 %v3027_v10, %v3028_v37  ;;  %v3114_v43 = vsel %vm1951_vm2, %v1654_v31, -inf  ;;  %v3070_v28 = vrot.slane %v3069_v38, 1  ;;  %v1630_v35 = vrot.slane %v887_v0, %v7664_v57 }
 0x278   : > { %v3036_v51 = vmax.f32 %v3034_v39, %v3035_v22  ;;  %v824_v12 = vadd.f32 %v8498_v42, %v8277_v18  ;;  %v3043_v29 = vmax.f32 %v3041_v11, %v3042_v60  ;;  %v3102_v44 = vmax.f32 %v3100_v36, %v3101_v27 }
 0x279   : > { %v3677_v63 = vsel %vm3537_vm3, %v3029_v5, %v3022_v34  ;;  %v3121_v20 = vsel %vm1951_vm2, %v1656_v62, -inf  ;;  %v3109_v25 = vmax.f32 %v3107_v49, %v3108_v7  ;;  %v3115_v32 = vrot.slane %v3114_v43, 4 }
 0x27a   : > { %v3678_v47 = vsel %vm3539_vm4, %v3036_v51, %v3677_v63  ;;  %v1637_v6 = vrot.slane %v1623_v21, %v7664_v57  ;;  %v3057_v45 = vmax.f32 %v3055_v9, %v3056_v15  ;;  %v3064_v33 = vmax.f32 %v3062_v52, %v3063_v26 }
 0x27b   : > { %v3679_v17 = vsel %vm3541_vm5, %v3043_v29, %v3678_v47  ;;  %v1638_v54 = vcombine.high %v1630_v35, %v1630_v35  ;;  %v3071_v3 = vmax.f32 %v3069_v38, %v3070_v28  ;;  %v3122_v19 = vrot.slane %v3121_v20, 4 }
 0x27c   : > { %v3680_v18 = vsel %vm3543_vm6, %v3050_v24, %v3679_v17  ;;  %v890_v41 = vmax.f32 %v824_v12, 0.0  ;;  %v3103_v16 = vrot.slane %v3102_v44, 2  ;;  %v1639_v59 = vcombine.high %v1637_v6, %v1637_v6 }
 0x27d   : > { %v3681_v14 = vsel %vm3545_vm7, %v3057_v45, %v3680_v18  ;;  %v3072_v2 = vsel %vm1951_vm2, %v1630_v35, -inf  ;;  %v3110_v46 = vrot.slane %v3109_v25, 2  ;;  %v3116_v50 = vmax.f32 %v3114_v43, %v3115_v32 }
 0x27e   : > { %v3682_v61 = vsel %vm3547_vm8, %v3064_v33, %v3681_v14  ;;  %v3073_v9 = vrot.slane %v3072_v2, 4  ;;  %v3079_v15 = vsel %vm1951_vm2, %v1638_v54, -inf  ;;  %v3123_v24 = vmax.f32 %v3121_v20, %v3122_v19 }
 0x27f   : > { %v3683_v52 = vsel %vm3549_vm9, %v3071_v3, %v3682_v61  ;;  %v3080_v30 = vrot.slane %v3079_v15, 4  ;;  %v3104_v4 = vmax.f32 %v3102_v44, %v3103_v16  ;;  %v3086_v0 = vsel %vm1951_vm2, %v1637_v6, -inf }
 0x280   : > { %3756 = vst.msk [vmem:[#allocation2 + $0x131] sm:$0xff] %vm3736_vm10, %v3683_v52  ;;  %v3074_v26 = vmax.f32 %v3072_v2, %v3073_v9  ;;  %v3093_v10 = vsel %vm1951_vm2, %v1639_v59, -inf  ;;  %v1674_v55 = vcombine.high %v890_v41, %v890_v41  ;;  %v3111_v31 = vmax.f32 %v3109_v25, %v3110_v46  ;;  %v3785_v46 = vld [vmem:[%s9588_s3] sm:$0xff] }
 0x281   : > { %v3117_v40 = vrot.slane %v3116_v50, 2  ;;  %v3081_v48 = vmax.f32 %v3079_v15, %v3080_v30  ;;  %v3087_v39 = vrot.slane %v3086_v0, 4  ;;  %v3094_v36 = vrot.slane %v3093_v10, 4 }
 0x282   : > { %v3075_v38 = vrot.slane %v3074_v26, 2  ;;  %v1681_v58 = vrot.slane %v890_v41, %v7664_v57  ;;  %v1688_v37 = vrot.slane %v1674_v55, %v7664_v57  ;;  %v3124_v11 = vrot.slane %v3123_v24, 2 }
 0x283   : > { %v3082_v27 = vrot.slane %v3081_v48, 2  ;;  %v819_v34 = vadd.f32 %v8498_v42, %v8284_v23  ;;  %v3088_v22 = vmax.f32 %v3086_v0, %v3087_v39  ;;  %v3095_v49 = vmax.f32 %v3093_v10, %v3094_v36 }
 0x284   : > { %v3076_v62 = vmax.f32 %v3074_v26, %v3075_v38  ;;  %v1689_v21 = vcombine.high %v1681_v58, %v1681_v58  ;;  %v1690_v5 = vcombine.high %v1688_v37, %v1688_v37  ;;  %v3156_v43 = vsel %vm1951_vm2, %v1681_v58, -inf }
 0x285   : > { %v3083_v7 = vmax.f32 %v3081_v48, %v3082_v27  ;;  %v3170_v28 = vsel %vm1951_vm2, %v1688_v37, -inf  ;;  %v3089_v51 = vrot.slane %v3088_v22, 2  ;;  %v3096_v35 = vrot.slane %v3095_v49, 2 }
 0x286   : > { %v3077_v60 = vrot.slane %v3076_v62, 1  ;;  %v3157_v12 = vrot.slane %v3156_v43, 4  ;;  %v3163_v29 = vsel %vm1951_vm2, %v1689_v21, -inf  ;;  %v3118_v44 = vmax.f32 %v3116_v50, %v3117_v40  ;;  %v3786_v50 = vld [vmem:[%s9588_s3 + $0x8] sm:$0xff] }
 0x287   : > { %v3806_v63 = vld [vmem:[#allocation2 + $0x131] sm:$0xff]  ;;  %v3084_v20 = vrot.slane %v3083_v7, 1  ;;  %v3164_v47 = vrot.slane %v3163_v29, 4  ;;  %v3171_v23 = vrot.slane %v3170_v28, 4  ;;  %v3105_v25 = vrot.slane %v3104_v4, 1 }
 0x288   : > { %7035 = vmatmul.mubr.msk.f32.gmra.mrb[18].mxu1 %vm3736_vm10, %v3806_v63  ;;  %v3125_v32 = vmax.f32 %v3123_v24, %v3124_v11  ;;  %v3090_v6 = vmax.f32 %v3088_v22, %v3089_v51  ;;  %v3097_v45 = vmax.f32 %v3095_v49, %v3096_v35  ;;  %v3078_v33 = vmax.f32 %v3076_v62, %v3077_v60 }
 0x289   : > { %v3085_v17 = vmax.f32 %v3083_v7, %v3084_v20  ;;  %v3158_v54 = vmax.f32 %v3156_v43, %v3157_v12  ;;  %v3165_v3 = vmax.f32 %v3163_v29, %v3164_v47  ;;  %v3177_v41 = vsel %vm1951_vm2, %v1690_v5, -inf }
 0x28a   : > { %v3091_v18 = vrot.slane %v3090_v6, 1  ;;  %v3098_v19 = vrot.slane %v3097_v45, 1  ;;  %v889_v14 = vmax.f32 %v819_v34, 0.0  ;;  %v3112_v16 = vrot.slane %v3111_v31, 1 }
 0x28b   : > { %v3119_v59 = vrot.slane %v3118_v44, 1  ;;  %v3684_v2 = vsel %vm3537_vm3, %v3085_v17, %v3078_v33  ;;  %v3172_v61 = vmax.f32 %v3170_v28, %v3171_v23  ;;  %v3126_v9 = vrot.slane %v3125_v32, 1 }
 0x28c   : > { %v3092_v52 = vmax.f32 %v3090_v6, %v3091_v18  ;;  %v3099_v15 = vmax.f32 %v3097_v45, %v3098_v19  ;;  %v1657_v24 = vcombine.high %v889_v14, %v889_v14  ;;  %v3159_v26 = vrot.slane %v3158_v54, 2 }
 0x28d   : > { %v3166_v30 = vrot.slane %v3165_v3, 2  ;;  %v3178_v0 = vrot.slane %v3177_v41, 4  ;;  %v1664_v10 = vrot.slane %v889_v14, %v7664_v57  ;;  %v3106_v55 = vmax.f32 %v3104_v4, %v3105_v25 }
 0x28e   : > { %v3685_v40 = vsel %vm3539_vm4, %v3092_v52, %v3684_v2  ;;  %v1671_v38 = vrot.slane %v1657_v24, %v7664_v57  ;;  %v7209_v48 = vpack.c.bf16 %v3786_v50, %v3785_v46  ;;  %v3113_v39 = vmax.f32 %v3111_v31, %v3112_v16 }
 0x28f   : > { %v3120_v36 = vmax.f32 %v3118_v44, %v3119_v59  ;;  %v3686_v58 = vsel %vm3541_vm5, %v3099_v15, %v3685_v40  ;;  %v3173_v37 = vrot.slane %v3172_v61, 2  ;;  %v3127_v11 = vmax.f32 %v3125_v32, %v3126_v9 }
 0x290   : > { %v3687_v62 = vsel %vm3543_vm6, %v3106_v55, %v3686_v58  ;;  %v1672_v27 = vcombine.high %v1664_v10, %v1664_v10  ;;  %v1673_v34 = vcombine.high %v1671_v38, %v1671_v38  ;;  %7210 = vmatprep.subr.bf16.mxu1 %v7209_v48  ;;  %v3160_v49 = vmax.f32 %v3158_v54, %v3159_v26 }
 0x291   : > { %v3688_v22 = vsel %vm3545_vm7, %v3113_v39, %v3687_v62  ;;  %v3167_v4 = vmax.f32 %v3165_v3, %v3166_v30  ;;  %v3179_v21 = vmax.f32 %v3177_v41, %v3178_v0  ;;  %7212 = vmatpush3.bf16.msra.mxu1 %v7209_v48  ;;  %v3128_v31 = vsel %vm1951_vm2, %v1664_v10, -inf }
 0x292   : > { %v3689_v5 = vsel %vm3547_vm8, %v3120_v36, %v3688_v22  ;;  %v3135_v60 = vsel %vm1951_vm2, %v1672_v27, -inf  ;;  %v3142_v7 = vsel %vm1951_vm2, %v1671_v38, -inf  ;;  %v3174_v28 = vmax.f32 %v3172_v61, %v3173_v37 }
 0x293   : > { %v3690_v43 = vsel %vm3549_vm9, %v3127_v11, %v3689_v5  ;;  %v3129_v51 = vrot.slane %v3128_v31, 4  ;;  %v3136_v35 = vrot.slane %v3135_v60, 4  ;;  %v3143_v12 = vrot.slane %v3142_v7, 4 }
 0x294   : > { %3757 = vst.msk [vmem:[#allocation2 + $0x141] sm:$0xff] %vm3736_vm10, %v3690_v43  ;;  %v3149_v29 = vsel %vm1951_vm2, %v1673_v34, -inf  ;;  %v834_v63 = vadd.f32 %v8498_v42, %v8319_v1  ;;  %v829_v44 = vadd.f32 %v8498_v42, %v8328_v13  ;;  %v3180_v20 = vrot.slane %v3179_v21, 2 }
 0x295   : > { %v3130_v47 = vmax.f32 %v3128_v31, %v3129_v51  ;;  %v3137_v23 = vmax.f32 %v3135_v60, %v3136_v35  ;;  %v3150_v25 = vrot.slane %v3149_v29, 4  ;;  %v3161_v32 = vrot.slane %v3160_v49, 1 }
 0x296   : > { %v3168_v6 = vrot.slane %v3167_v4, 1  ;;  %v3144_v45 = vmax.f32 %v3142_v7, %v3143_v12  ;;  %v892_v33 = vmax.f32 %v834_v63, 0.0  ;;  %v891_v18 = vmax.f32 %v829_v44, 0.0 }
 0x297   : > { %v3131_v17 = vrot.slane %v3130_v47, 2  ;;  %v3138_v54 = vrot.slane %v3137_v23, 2  ;;  %v3151_v3 = vmax.f32 %v3149_v29, %v3150_v25  ;;  %v3175_v19 = vrot.slane %v3174_v28, 1 }
 0x298   : > { %v3145_v41 = vrot.slane %v3144_v45, 2  ;;  %v1708_v14 = vcombine.high %v892_v33, %v892_v33  ;;  %v1715_v1 = vrot.slane %v892_v33, %v7664_v57  ;;  %v3181_v16 = vmax.f32 %v3179_v21, %v3180_v20 }
 0x299   : > { %v3132_v59 = vmax.f32 %v3130_v47, %v3131_v17  ;;  %v3139_v13 = vmax.f32 %v3137_v23, %v3138_v54  ;;  %v3152_v2 = vrot.slane %v3151_v3, 2  ;;  %v1691_v26 = vcombine.high %v891_v18, %v891_v18 }
 0x29a   : > { %v3146_v61 = vmax.f32 %v3144_v45, %v3145_v41  ;;  %v1722_v46 = vrot.slane %v1708_v14, %v7664_v57  ;;  %v1723_v50 = vcombine.high %v1715_v1, %v1715_v1  ;;  %v3212_v9 = vsel %vm1951_vm2, %v1715_v1, -inf }
 0x29b   : > { %v3133_v52 = vrot.slane %v3132_v59, 1  ;;  %v3140_v15 = vrot.slane %v3139_v13, 1  ;;  %v3153_v24 = vmax.f32 %v3151_v3, %v3152_v2  ;;  %v3807_v30 = vld [vmem:[#allocation2 + $0x141] sm:$0xff]  ;;  %v3213_v55 = vrot.slane %v3212_v9, 4 }
 0x29c   : > { %v3147_v0 = vrot.slane %v3146_v61, 1  ;;  %v1724_v10 = vcombine.high %v1722_v46, %v1722_v46  ;;  %v1698_v40 = vrot.slane %v891_v18, %v7664_v57  ;;  %7037 = vmatprep.mubr.msk.f32.mxu1 %vm3736_vm10, %v3807_v30  ;;  %v3219_v36 = vsel %vm1951_vm2, %v1723_v50, -inf }
 0x29d   : > { %v3134_v38 = vmax.f32 %v3132_v59, %v3133_v52  ;;  %v3141_v48 = vmax.f32 %v3139_v13, %v3140_v15  ;;  %v3154_v39 = vrot.slane %v3153_v24, 1  ;;  %v3162_v58 = vmax.f32 %v3160_v49, %v3161_v32 }
 0x29e   : > { %v3182_v37 = vrot.slane %v3181_v16, 1  ;;  %v3148_v11 = vmax.f32 %v3146_v61, %v3147_v0  ;;  %v844_v62 = vadd.f32 %v8498_v42, %v8361_v56  ;;  %v3226_v22 = vsel %vm1951_vm2, %v1722_v46, -inf }
 0x29f   : > { %v3155_v27 = vmax.f32 %v3153_v24, %v3154_v39  ;;  %v3691_v34 = vsel %vm3537_vm3, %v3141_v48, %v3134_v38  ;;  %v3233_v21 = vsel %vm1951_vm2, %v1724_v10, -inf  ;;  %v3169_v5 = vmax.f32 %v3167_v4, %v3168_v6 }
 0x2a0   : > { %v3692_v31 = vsel %vm3539_vm4, %v3148_v11, %v3691_v34  ;;  %v3220_v60 = vrot.slane %v3219_v36, 4  ;;  %v1705_v7 = vrot.slane %v1691_v26, %v7664_v57  ;;  %v3176_v43 = vmax.f32 %v3174_v28, %v3175_v19 }
 0x2a1   : > { %v3693_v49 = vsel %vm3541_vm5, %v3155_v27, %v3692_v31  ;;  %v3214_v51 = vmax.f32 %v3212_v9, %v3213_v55  ;;  %v1706_v35 = vcombine.high %v1698_v40, %v1698_v40  ;;  %v3183_v12 = vmax.f32 %v3181_v16, %v3182_v37 }
 0x2a2   : > { %v3694_v56 = vsel %vm3543_vm6, %v3162_v58, %v3693_v49  ;;  %v3227_v29 = vrot.slane %v3226_v22, 4  ;;  %v3234_v63 = vrot.slane %v3233_v21, 4  ;;  %v1707_v20 = vcombine.high %v1705_v7, %v1705_v7 }
 0x2a3   : > { %v3695_v44 = vsel %vm3545_vm7, %v3169_v5, %v3694_v56  ;;  %v3184_v4 = vsel %vm1951_vm2, %v1698_v40, -inf  ;;  %v894_v47 = vmax.f32 %v844_v62, 0.0  ;;  %v3221_v25 = vmax.f32 %v3219_v36, %v3220_v60 }
 0x2a4   : > { %v3696_v23 = vsel %vm3547_vm8, %v3176_v43, %v3695_v44  ;;  %v3185_v32 = vrot.slane %v3184_v4, 4  ;;  %v3215_v6 = vrot.slane %v3214_v51, 2  ;;  %v3191_v45 = vsel %vm1951_vm2, %v1706_v35, -inf }
 0x2a5   : > { %v3697_v28 = vsel %vm3549_vm9, %v3183_v12, %v3696_v23  ;;  %v3228_v33 = vmax.f32 %v3226_v22, %v3227_v29  ;;  %v3235_v17 = vmax.f32 %v3233_v21, %v3234_v63  ;;  %v3192_v3 = vrot.slane %v3191_v45, 4 }
 0x2a6   : > { %3758 = vst.msk [vmem:[#allocation2 + $0x151] sm:$0xff] %vm3736_vm10, %v3697_v28  ;;  %v3186_v54 = vmax.f32 %v3184_v4, %v3185_v32  ;;  %v3198_v18 = vsel %vm1951_vm2, %v1705_v7, -inf  ;;  %v3205_v19 = vsel %vm1951_vm2, %v1707_v20, -inf  ;;  %v1742_v41 = vcombine.high %v894_v47, %v894_v47 }
 0x2a7   : > { %v3222_v14 = vrot.slane %v3221_v25, 2  ;;  %v3193_v16 = vmax.f32 %v3191_v45, %v3192_v3  ;;  %v839_v59 = vadd.f32 %v8498_v42, %v8368_v8  ;;  %v3216_v13 = vmax.f32 %v3214_v51, %v3215_v6 }
 0x2a8   : > { %v3187_v1 = vrot.slane %v3186_v54, 2  ;;  %v3199_v2 = vrot.slane %v3198_v18, 4  ;;  %v3206_v61 = vrot.slane %v3205_v19, 4  ;;  %v1749_v46 = vrot.slane %v894_v47, %v7664_v57 }
 0x2a9   : > { %v3229_v50 = vrot.slane %v3228_v33, 2  ;;  %v3236_v9 = vrot.slane %v3235_v17, 2  ;;  %v3194_v15 = vrot.slane %v3193_v16, 2  ;;  %v1756_v30 = vrot.slane %v1742_v41, %v7664_v57 }
 0x2aa   : > { %v3188_v52 = vmax.f32 %v3186_v54, %v3187_v1  ;;  %v3200_v24 = vmax.f32 %v3198_v18, %v3199_v2  ;;  %v3207_v26 = vmax.f32 %v3205_v19, %v3206_v61  ;;  %v1757_v0 = vcombine.high %v1749_v46, %v1749_v46 }
 0x2ab   : > { %v3223_v10 = vmax.f32 %v3221_v25, %v3222_v14  ;;  %v3195_v40 = vmax.f32 %v3193_v16, %v3194_v15  ;;  %v3268_v8 = vsel %vm1951_vm2, %v1749_v46, -inf  ;;  %v893_v42 = vmax.f32 %v839_v59, 0.0  ;;  %v6731_v15 = vld [vmem:[%s9588_s3 + $0x28] sm:$0xff] }
 0x2ac   : > { %v3189_v55 = vrot.slane %v3188_v52, 1  ;;  %v3201_v38 = vrot.slane %v3200_v24, 2  ;;  %v3208_v48 = vrot.slane %v3207_v26, 2  ;;  %v3230_v36 = vmax.f32 %v3228_v33, %v3229_v50 }
 0x2ad   : > { %v3808_v39 = vld [vmem:[#allocation2 + $0x151] sm:$0xff]  ;;  %v3237_v58 = vmax.f32 %v3235_v17, %v3236_v9  ;;  %v3196_v37 = vrot.slane %v3195_v40, 1  ;;  %v3275_v11 = vsel %vm1951_vm2, %v1757_v0, -inf  ;;  %v3217_v62 = vrot.slane %v3216_v13, 1 }
 0x2ae   : > { %7038 = vmatmul.mubr.msk.f32.gmra.mrb[20].mxu1 %vm3736_vm10, %v3808_v39  ;;  %v3202_v27 = vmax.f32 %v3200_v24, %v3201_v38  ;;  %v3209_v34 = vmax.f32 %v3207_v26, %v3208_v48  ;;  %v1758_v22 = vcombine.high %v1756_v30, %v1756_v30  ;;  %v3190_v21 = vmax.f32 %v3188_v52, %v3189_v55  ;;  %v6730_v52 = vld [vmem:[%s9588_s3 + $0x20] sm:$0xff] }
 0x2af   : > { %v3197_v5 = vmax.f32 %v3195_v40, %v3196_v37  ;;  %v3269_v31 = vrot.slane %v3268_v8, 4  ;;  %v3282_v60 = vsel %vm1951_vm2, %v1756_v30, -inf  ;;  %v3276_v49 = vrot.slane %v3275_v11, 4 }
 0x2b0   : > { %v3203_v7 = vrot.slane %v3202_v27, 1  ;;  %v3210_v43 = vrot.slane %v3209_v34, 1  ;;  %v1725_v51 = vcombine.high %v893_v42, %v893_v42  ;;  %v3224_v35 = vrot.slane %v3223_v10, 1 }
 0x2b1   : > { %v3231_v12 = vrot.slane %v3230_v36, 1  ;;  %v3238_v56 = vrot.slane %v3237_v58, 1  ;;  %v3698_v29 = vsel %vm3537_vm3, %v3197_v5, %v3190_v21  ;;  %v3289_v20 = vsel %vm1951_vm2, %v1758_v22, -inf }
 0x2b2   : > { %v3204_v63 = vmax.f32 %v3202_v27, %v3203_v7  ;;  %v3211_v44 = vmax.f32 %v3209_v34, %v3210_v43  ;;  %v1732_v4 = vrot.slane %v893_v42, %v7664_v57  ;;  %v3218_v47 = vmax.f32 %v3216_v13, %v3217_v62 }
 0x2b3   : > { %v8583_v23 = vmax.f32 %v3268_v8, %v3269_v31  ;;  %v3283_v25 = vrot.slane %v3282_v60, 4  ;;  %v1739_v32 = vrot.slane %v1725_v51, %v7664_v57  ;;  %v8587_v6 = vmax.f32 %v3275_v11, %v3276_v49 }
 0x2b4   : > { %v3699_v28 = vsel %vm3539_vm4, %v3204_v63, %v3698_v29  ;;  %v1740_v45 = vcombine.high %v1732_v4, %v1732_v4  ;;  %v3240_v33 = vsel %vm1951_vm2, %v1732_v4, -inf  ;;  %v3225_v17 = vmax.f32 %v3223_v10, %v3224_v35 }
 0x2b5   : > { %v3232_v54 = vmax.f32 %v3230_v36, %v3231_v12  ;;  %v3700_v3 = vsel %vm3541_vm5, %v3211_v44, %v3699_v28  ;;  %v3290_v18 = vrot.slane %v3289_v20, 4  ;;  %v3239_v19 = vmax.f32 %v3237_v58, %v3238_v56 }
 0x2b6   : > { %v3701_v41 = vsel %vm3543_vm6, %v3218_v47, %v3700_v3  ;;  %v1741_v14 = vcombine.high %v1739_v32, %v1739_v32  ;;  %v3241_v1 = vrot.slane %v3240_v33, 4  ;;  %v3271_v59 = vrot.slane %v8583_v23, 2 }
 0x2b7   : > { %v3702_v16 = vsel %vm3545_vm7, %v3225_v17, %v3701_v41  ;;  %v8594_v13 = vmax.f32 %v3282_v60, %v3283_v25  ;;  %v3247_v2 = vsel %vm1951_vm2, %v1740_v45, -inf  ;;  %v3278_v46 = vrot.slane %v8587_v6, 2 }
 0x2b8   : > { %v3703_v61 = vsel %vm3547_vm8, %v3232_v54, %v3702_v16  ;;  %v3242_v50 = vmax.f32 %v3240_v33, %v3241_v1  ;;  %v3248_v9 = vrot.slane %v3247_v2, 4  ;;  %v8606_v26 = vmax.f32 %v3289_v20, %v3290_v18 }
 0x2b9   : > { %v3704_v24 = vsel %vm3549_vm9, %v3239_v19, %v3703_v61  ;;  %v3254_v30 = vsel %vm1951_vm2, %v1739_v32, -inf  ;;  %v3261_v0 = vsel %vm1951_vm2, %v1741_v14, -inf  ;;  %v3285_v48 = vrot.slane %v8594_v13, 2 }
 0x2ba   : > { %3759 = vst.msk [vmem:[#allocation2 + $0x161] sm:$0xff] %vm3736_vm10, %v3704_v24  ;;  %v3243_v10 = vrot.slane %v3242_v50, 2  ;;  %v8611_v55 = vmax.f32 %v3247_v2, %v3248_v9  ;;  %v3255_v40 = vrot.slane %v3254_v30, 4  ;;  %v3262_v38 = vrot.slane %v3261_v0, 4 }
 0x2bb   : > { %v8614_v8 = vpack.c.bf16 %v6731_v15, %v6730_v52  ;;  %v9595_v37 = vmov 0.0   ;;  %v3272_v11 = vmax.f32 %v8583_v23, %v3271_v59  ;;  %v3292_v62 = vrot.slane %v8606_v26, 2 }
 0x2bc   : > { %v8616_v42 = vmax.f32 %v3242_v50, %v3243_v10  ;;  %v3250_v39 = vrot.slane %v8611_v55, 2  ;;  %v3256_v36 = vmax.f32 %v3254_v30, %v3255_v40  ;;  %v3263_v58 = vmax.f32 %v3261_v0, %v3262_v38  ;;  %3297 = vst.msk [vmem:[#allocation2] sm:$0x1] %vm3296_vm11, %v9595_v37  ;;  %3298 = vst.msk [vmem:[#allocation2 + $0x10] sm:$0x1] %vm3296_vm11, %v9595_v37 }
 0x2bd   : > { %3299 = vst.msk [vmem:[#allocation2 + $0x20] sm:$0x1] %vm3296_vm11, %v9595_v37  ;;  %3300 = vst.msk [vmem:[#allocation2 + $0x30] sm:$0x1] %vm3296_vm11, %v9595_v37  ;;  %7214 = vmatprep.subr.bf16.mxu1 %v8614_v8  ;;  %v3279_v5 = vmax.f32 %v8587_v6, %v3278_v46  ;;  %v3286_v31 = vmax.f32 %v8594_v13, %v3285_v48  ;;  %v3273_v49 = vrot.slane %v3272_v11, 1 }
 0x2be   : > { %3301 = vst.msk [vmem:[#allocation2 + $0x40] sm:$0x1] %vm3296_vm11, %v9595_v37  ;;  %3302 = vst.msk [vmem:[#allocation2 + $0x50] sm:$0x1] %vm3296_vm11, %v9595_v37  ;;  %v3245_v27 = vrot.slane %v8616_v42, 1  ;;  %v3251_v34 = vmax.f32 %v8611_v55, %v3250_v39  ;;  %v3257_v22 = vrot.slane %v3256_v36, 2  ;;  %v3293_v51 = vmax.f32 %v8606_v26, %v3292_v62 }
 0x2bf   : > { %3303 = vst.msk [vmem:[#allocation2 + $0x60] sm:$0x1] %vm3296_vm11, %v9595_v37  ;;  %3304 = vst.msk [vmem:[#allocation2 + $0x70] sm:$0x1] %vm3296_vm11, %v9595_v37  ;;  %v3264_v21 = vrot.slane %v3263_v58, 2  ;;  %v3280_v44 = vrot.slane %v3279_v5, 1  ;;  %v3274_v32 = vmax.f32 %v3272_v11, %v3273_v49 }
 0x2c0   : > { %3305 = vst.msk [vmem:[#allocation2 + $0x80] sm:$0x1] %vm3296_vm11, %v9595_v37  ;;  %3306 = vst.msk [vmem:[#allocation2 + $0x90] sm:$0x1] %vm3296_vm11, %v9595_v37  ;;  %v3252_v60 = vrot.slane %v3251_v34, 1  ;;  %v3258_v7 = vmax.f32 %v3256_v36, %v3257_v22  ;;  %v3246_v12 = vmax.f32 %v8616_v42, %v3245_v27  ;;  %v3287_v20 = vrot.slane %v3286_v31, 1 }
 0x2c1   : > { %3307 = vst.msk [vmem:[#allocation2 + $0xa0] sm:$0x1] %vm3296_vm11, %v9595_v37  ;;  %3308 = vst.msk [vmem:[#allocation2 + $0xb0] sm:$0x1] %vm3296_vm11, %v9595_v37  ;;  %v3265_v43 = vmax.f32 %v3263_v58, %v3264_v21  ;;  %v3809_v35 = vld [vmem:[#allocation2 + $0x161] sm:$0xff]  ;;  %v3294_v25 = vrot.slane %v3293_v51, 1  ;;  %v3281_v6 = vmax.f32 %v3279_v5, %v3280_v44 }
 0x2c2   : > { %3309 = vst.msk [vmem:[#allocation2 + $0xc0] sm:$0x1] %vm3296_vm11, %v9595_v37  ;;  %3310 = vst.msk [vmem:[#allocation2 + $0xd0] sm:$0x1] %vm3296_vm11, %v9595_v37  ;;  %v3253_v56 = vmax.f32 %v3251_v34, %v3252_v60  ;;  %v3259_v29 = vrot.slane %v3258_v7, 1  ;;  %7040 = vmatprep.mubr.msk.f32.mxu1 %vm3736_vm10, %v3809_v35  ;;  %v3288_v33 = vmax.f32 %v3286_v31, %v3287_v20 }
 0x2c3   : > { %3311 = vst.msk [vmem:[#allocation2 + $0xe0] sm:$0x1] %vm3296_vm11, %v9595_v37  ;;  %3312 = vst.msk [vmem:[#allocation2 + $0xf0] sm:$0x1] %vm3296_vm11, %v9595_v37  ;;  %v3266_v63 = vrot.slane %v3265_v43, 1  ;;  %v3295_v54 = vmax.f32 %v3293_v51, %v3294_v25  ;;  %v3761_v14 = vld [vmem:[#allocation2] sm:$0xff] }
 0x2c4   : > { %3313 = vst.msk [vmem:[#allocation2 + $0x100] sm:$0x1] %vm3296_vm11, %v9595_v37  ;;  %3314 = vst.msk [vmem:[#allocation2 + $0x110] sm:$0x1] %vm3296_vm11, %v9595_v37  ;;  %v3260_v4 = vmax.f32 %v3258_v7, %v3259_v29  ;;  %v3705_v23 = vsel %vm3537_vm3, %v3253_v56, %v3246_v12  ;;  %v3762_v1 = vld [vmem:[#allocation2 + $0x10] sm:$0xff]  ;;  %v3763_v16 = vld [vmem:[#allocation2 + $0x20] sm:$0xff] }
 0x2c5   : > { %3315 = vst.msk [vmem:[#allocation2 + $0x120] sm:$0x1] %vm3296_vm11, %v9595_v37  ;;  %3316 = vst.msk [vmem:[#allocation2 + $0x130] sm:$0x1] %vm3296_vm11, %v9595_v37  ;;  %v3267_v47 = vmax.f32 %v3265_v43, %v3266_v63  ;;  %v3764_v59 = vld [vmem:[#allocation2 + $0x30] sm:$0xff]  ;;  %v3765_v13 = vld [vmem:[#allocation2 + $0x40] sm:$0xff] }
 0x2c6   : > { %3317 = vst.msk [vmem:[#allocation2 + $0x140] sm:$0x1] %vm3296_vm11, %v9595_v37  ;;  %3318 = vst.msk [vmem:[#allocation2 + $0x150] sm:$0x1] %vm3296_vm11, %v9595_v37  ;;  %v3706_v28 = vsel %vm3539_vm4, %v3260_v4, %v3705_v23  ;;  %v3766_v2 = vld [vmem:[#allocation2 + $0x50] sm:$0xff]  ;;  %v3767_v61 = vld [vmem:[#allocation2 + $0x60] sm:$0xff] }
 0x2c7   : > { %3319 = vst.msk [vmem:[#allocation2 + $0x160] sm:$0x1] %vm3296_vm11, %v9595_v37  ;;  %3320 = vst.msk [vmem:[#allocation2 + $0x170] sm:$0x1] %vm3296_vm11, %v9595_v37  ;;  %v3707_v45 = vsel %vm3541_vm5, %v3267_v47, %v3706_v28  ;;  %v3768_v46 = vld [vmem:[#allocation2 + $0x70] sm:$0xff]  ;;  %v3769_v50 = vld [vmem:[#allocation2 + $0x80] sm:$0xff] }
 0x2c8   : > { %3321 = vst.msk [vmem:[#allocation2 + $0x9] sm:$0x1] %vm3296_vm11, %v9595_v37  ;;  %3322 = vst.msk [vmem:[#allocation2 + $0x19] sm:$0x1] %vm3296_vm11, %v9595_v37  ;;  %v3708_v17 = vsel %vm3543_vm6, %v3274_v32, %v3707_v45  ;;  %v3770_v9 = vld [vmem:[#allocation2 + $0x90] sm:$0xff]  ;;  %v3771_v52 = vld [vmem:[#allocation2 + $0xa0] sm:$0xff] }
 0x2c9   : > { %3323 = vst.msk [vmem:[#allocation2 + $0x29] sm:$0x1] %vm3296_vm11, %v9595_v37  ;;  %3324 = vst.msk [vmem:[#allocation2 + $0x39] sm:$0x1] %vm3296_vm11, %v9595_v37  ;;  %v3709_v3 = vsel %vm3545_vm7, %v3281_v6, %v3708_v17  ;;  %v3772_v15 = vld [vmem:[#allocation2 + $0xb0] sm:$0xff]  ;;  %v3773_v24 = vld [vmem:[#allocation2 + $0xc0] sm:$0xff] }
 0x2ca   : > { %3325 = vst.msk [vmem:[#allocation2 + $0x49] sm:$0x1] %vm3296_vm11, %v9595_v37  ;;  %3326 = vst.msk [vmem:[#allocation2 + $0x59] sm:$0x1] %vm3296_vm11, %v9595_v37  ;;  %v3710_v18 = vsel %vm3547_vm8, %v3288_v33, %v3709_v3  ;;  %v3774_v26 = vld [vmem:[#allocation2 + $0xd0] sm:$0xff]  ;;  %v3775_v30 = vld [vmem:[#allocation2 + $0xe0] sm:$0xff] }
 0x2cb   : > { %3327 = vst.msk [vmem:[#allocation2 + $0x69] sm:$0x1] %vm3296_vm11, %v9595_v37  ;;  %3328 = vst.msk [vmem:[#allocation2 + $0x79] sm:$0x1] %vm3296_vm11, %v9595_v37  ;;  %v3711_v19 = vsel %vm3549_vm9, %v3295_v54, %v3710_v18  ;;  %v3776_v0 = vld [vmem:[#allocation2 + $0xf0] sm:$0xff]  ;;  %v3777_v10 = vld [vmem:[#allocation2 + $0x100] sm:$0xff] }
 0x2cc   : > { %3329 = vst.msk [vmem:[#allocation2 + $0x89] sm:$0x1] %vm3296_vm11, %v9595_v37  ;;  %3330 = vst.msk [vmem:[#allocation2 + $0x99] sm:$0x1] %vm3296_vm11, %v9595_v37  ;;  %v3778_v55 = vld [vmem:[#allocation2 + $0x110] sm:$0xff]  ;;  %v3779_v40 = vld [vmem:[#allocation2 + $0x120] sm:$0xff] }
 0x2cd   : > { %3331 = vst.msk [vmem:[#allocation2 + $0xa9] sm:$0x1] %vm3296_vm11, %v9595_v37  ;;  %3332 = vst.msk [vmem:[#allocation2 + $0xb9] sm:$0x1] %vm3296_vm11, %v9595_v37  ;;  %v3780_v38 = vld [vmem:[#allocation2 + $0x130] sm:$0xff]  ;;  %v3781_v48 = vld [vmem:[#allocation2 + $0x140] sm:$0xff] }
 0x2ce   : > { %3333 = vst.msk [vmem:[#allocation2 + $0xc9] sm:$0x1] %vm3296_vm11, %v9595_v37  ;;  %3334 = vst.msk [vmem:[#allocation2 + $0xd9] sm:$0x1] %vm3296_vm11, %v9595_v37  ;;  %v3783_v42 = vld [vmem:[#allocation2 + $0x160] sm:$0xff] }
 0x2cf   : > { %3335 = vst.msk [vmem:[#allocation2 + $0xe9] sm:$0x1] %vm3296_vm11, %v9595_v37  ;;  %3336 = vst.msk [vmem:[#allocation2 + $0xf9] sm:$0x1] %vm3296_vm11, %v9595_v37  ;;  %v4328_v36 = vld [vmem:[#allocation2 + $0x2] sm:$0xff]  ;;  %v4329_v58 = vld [vmem:[#allocation2 + $0x12] sm:$0xff] }
 0x2d0   : > { %3337 = vst.msk [vmem:[#allocation2 + $0x109] sm:$0x1] %vm3296_vm11, %v9595_v37  ;;  %3338 = vst.msk [vmem:[#allocation2 + $0x119] sm:$0x1] %vm3296_vm11, %v9595_v37  ;;  %v4330_v11 = vld [vmem:[#allocation2 + $0x22] sm:$0xff]  ;;  %v4331_v62 = vld [vmem:[#allocation2 + $0x32] sm:$0xff] }
 0x2d1   : > { %3339 = vst.msk [vmem:[#allocation2 + $0x129] sm:$0x1] %vm3296_vm11, %v9595_v37  ;;  %3340 = vst.msk [vmem:[#allocation2 + $0x139] sm:$0x1] %vm3296_vm11, %v9595_v37  ;;  %v4332_v27 = vld [vmem:[#allocation2 + $0x42] sm:$0xff]  ;;  %v4333_v34 = vld [vmem:[#allocation2 + $0x52] sm:$0xff] }
 0x2d2   : > { %3341 = vst.msk [vmem:[#allocation2 + $0x149] sm:$0x1] %vm3296_vm11, %v9595_v37  ;;  %3342 = vst.msk [vmem:[#allocation2 + $0x159] sm:$0x1] %vm3296_vm11, %v9595_v37  ;;  %v4334_v22 = vld [vmem:[#allocation2 + $0x62] sm:$0xff]  ;;  %v4335_v21 = vld [vmem:[#allocation2 + $0x72] sm:$0xff] }
 0x2d3   : > { %3343 = vst.msk [vmem:[#allocation2 + $0x169] sm:$0x1] %vm3296_vm11, %v9595_v37  ;;  %3344 = vst.msk [vmem:[#allocation2 + $0x179] sm:$0x1] %vm3296_vm11, %v9595_v37  ;;  %v4336_v5 = vld [vmem:[#allocation2 + $0x82] sm:$0xff]  ;;  %v4337_v31 = vld [vmem:[#allocation2 + $0x92] sm:$0xff] }
 0x2d4   : > { %3760 = vst.msk [vmem:[#allocation2 + $0x171] sm:$0xff] %vm3736_vm10, %v3711_v19  ;;  %v4338_v60 = vld [vmem:[#allocation2 + $0xa2] sm:$0xff]  ;;  %v4339_v7 = vld [vmem:[#allocation2 + $0xb2] sm:$0xff]  ;;  %v8792_v23 = vld [vmem:[%s9589_s4] ss:$0 sm:$0xff] }
 0x2d5   : > { %v4340_v43 = vld [vmem:[#allocation2 + $0xc2] sm:$0xff]  ;;  %v4341_v49 = vld [vmem:[#allocation2 + $0xd2] sm:$0xff] }
 0x2d6   : > { %v4342_v51 = vld [vmem:[#allocation2 + $0xe2] sm:$0xff]  ;;  %v4343_v35 = vld [vmem:[#allocation2 + $0xf2] sm:$0xff] }
 0x2d7   : > { %v4344_v12 = vld [vmem:[#allocation2 + $0x102] sm:$0xff]  ;;  %v4345_v56 = vld [vmem:[#allocation2 + $0x112] sm:$0xff] }
 0x2d8   : > { %v4346_v29 = vld [vmem:[#allocation2 + $0x122] sm:$0xff]  ;;  %v4347_v63 = vld [vmem:[#allocation2 + $0x132] sm:$0xff] }
 0x2d9   : > { %v4348_v44 = vld [vmem:[#allocation2 + $0x142] sm:$0xff]  ;;  %v4349_v20 = vld [vmem:[#allocation2 + $0x152] sm:$0xff] }
 0x2da   : > { %v4350_v4 = vld [vmem:[#allocation2 + $0x162] sm:$0xff] }
 0x2db   : > { %v3810_v41 = vld [vmem:[#allocation2 + $0x171] sm:$0xff] }
 0x2dc   : > { %7041 = vmatmul.mubr.msk.f32.gmra.mrb[22].mxu1 %vm3736_vm10, %v3810_v41  ;;  %v3784_v39 = vld [vmem:[#allocation2 + $0x170] sm:$0xff] }
 0x2dd   : > { %7047 = vmatprep.mubr.msk.f32.mxu1 %vm3736_vm10, %v3761_v14  ;;  %v4351_v47 = vld [vmem:[#allocation2 + $0x172] sm:$0xff] }
 0x2e0   : > { %7048 = vmatmul.mubr.msk.f32.vlgmr.msra.gmra.mrb[0].mxu1 %vm3736_vm10, %v3762_v1 }
 0x2e1   : > { %7216 = vmatpush3.bf16.msra.mxu1 %v8614_v8  ;;  %7050 = vmatprep.mubr.msk.f32.mxu1 %vm3736_vm10, %v3763_v16  ;;  %v3782_v8 = vld [vmem:[#allocation2 + $0x150] sm:$0xff] }
 0x2e4   : > { %7051 = vmatmul.mubr.msk.f32.gmra.mrb[2].mxu1 %vm3736_vm10, %v3764_v59 }
 0x2e5   : > { %7053 = vmatprep.mubr.msk.f32.mxu1 %vm3736_vm10, %v3765_v13 }
 0x2e8   : > { %7054 = vmatmul.mubr.msk.f32.gmra.mrb[4].mxu1 %vm3736_vm10, %v3766_v2 }
 0x2e9   : > { %7056 = vmatprep.mubr.msk.f32.mxu1 %vm3736_vm10, %v3767_v61 }
 0x2ec   : > { %7057 = vmatmul.mubr.msk.f32.gmra.mrb[6].mxu1 %vm3736_vm10, %v3768_v46 }
 0x2ed   : > { %7059 = vmatprep.mubr.msk.f32.mxu1 %vm3736_vm10, %v3769_v50 }
 0x2f0   : > { %7060 = vmatmul.mubr.msk.f32.gmra.mrb[8].mxu1 %vm3736_vm10, %v3770_v9 }
 0x2f1   : > { %7062 = vmatprep.mubr.msk.f32.mxu1 %vm3736_vm10, %v3771_v52 }
 0x2f4   : > { %7063 = vmatmul.mubr.msk.f32.gmra.mrb[10].mxu1 %vm3736_vm10, %v3772_v15 }
 0x2f5   : > { %7065 = vmatprep.mubr.msk.f32.mxu1 %vm3736_vm10, %v3773_v24 }
 0x2f8   : > { %7066 = vmatmul.mubr.msk.f32.gmra.mrb[12].mxu1 %vm3736_vm10, %v3774_v26 }
 0x2f9   : > { %7068 = vmatprep.mubr.msk.f32.mxu1 %vm3736_vm10, %v3775_v30 }
 0x2fc   : > { %7069 = vmatmul.mubr.msk.f32.gmra.mrb[14].mxu1 %vm3736_vm10, %v3776_v0 }
 0x2fd   : > { %7071 = vmatprep.mubr.msk.f32.mxu1 %vm3736_vm10, %v3777_v10 }
 0x300   : > { %7072 = vmatmul.mubr.msk.f32.gmra.mrb[16].mxu1 %vm3736_vm10, %v3778_v55 }
 0x301   : > { %7074 = vmatprep.mubr.msk.f32.mxu1 %vm3736_vm10, %v3779_v40 }
 0x304   : > { %7075 = vmatmul.mubr.msk.f32.gmra.mrb[18].mxu1 %vm3736_vm10, %v3780_v38 }
 0x305   : > { %7077 = vmatprep.mubr.msk.f32.mxu1 %vm3736_vm10, %v3781_v48 }
 0x308   : > { %7078 = vmatmul.mubr.msk.f32.gmra.mrb[20].mxu1 %vm3736_vm10, %v3782_v8 }
 0x309   : > { %7080 = vmatprep.mubr.msk.f32.mxu1 %vm3736_vm10, %v3783_v42 }
 0x30c   : > { %7081 = vmatmul.mubr.msk.f32.gmra.mrb[22].mxu1 %vm3736_vm10, %v3784_v39 }
 0x30d   : > { %7087 = vmatprep.mubr.msk.f32.mxu1 %vm3736_vm10, %v4328_v36 }
 0x310   : > { %7088 = vmatmul.mubr.msk.f32.vlgmr.msra.gmra.mrb[0].mxu1 %vm3736_vm10, %v4329_v58 }
 0x311   : > { %7090 = vmatprep.mubr.msk.f32.mxu1 %vm3736_vm10, %v4330_v11 }
 0x314   : > { %7091 = vmatmul.mubr.msk.f32.gmra.mrb[2].mxu1 %vm3736_vm10, %v4331_v62 }
 0x315   : > { %7093 = vmatprep.mubr.msk.f32.mxu1 %vm3736_vm10, %v4332_v27 }
 0x318   : > { %7094 = vmatmul.mubr.msk.f32.gmra.mrb[4].mxu1 %vm3736_vm10, %v4333_v34 }
 0x319   : > { %7096 = vmatprep.mubr.msk.f32.mxu1 %vm3736_vm10, %v4334_v22 }
 0x31c   : > { %7097 = vmatmul.mubr.msk.f32.gmra.mrb[6].mxu1 %vm3736_vm10, %v4335_v21 }
 0x31d   : > { %7099 = vmatprep.mubr.msk.f32.mxu1 %vm3736_vm10, %v4336_v5 }
 0x320   : > { %7100 = vmatmul.mubr.msk.f32.gmra.mrb[8].mxu1 %vm3736_vm10, %v4337_v31 }
 0x321   : > { %7102 = vmatprep.mubr.msk.f32.mxu1 %vm3736_vm10, %v4338_v60 }
 0x324   : > { %7103 = vmatmul.mubr.msk.f32.gmra.mrb[10].mxu1 %vm3736_vm10, %v4339_v7 }
 0x325   : > { %7105 = vmatprep.mubr.msk.f32.mxu1 %vm3736_vm10, %v4340_v43 }
 0x328   : > { %7106 = vmatmul.mubr.msk.f32.gmra.mrb[12].mxu1 %vm3736_vm10, %v4341_v49 }
 0x329   : > { %7108 = vmatprep.mubr.msk.f32.mxu1 %vm3736_vm10, %v4342_v51 }
 0x32c   : > { %7109 = vmatmul.mubr.msk.f32.gmra.mrb[14].mxu1 %vm3736_vm10, %v4343_v35 }
 0x32d   : > { %7111 = vmatprep.mubr.msk.f32.mxu1 %vm3736_vm10, %v4344_v12 }
 0x330   : > { %7112 = vmatmul.mubr.msk.f32.gmra.mrb[16].mxu1 %vm3736_vm10, %v4345_v56 }
 0x331   : > { %7114 = vmatprep.mubr.msk.f32.mxu1 %vm3736_vm10, %v4346_v29 }
 0x334   : > { %7115 = vmatmul.mubr.msk.f32.gmra.mrb[18].mxu1 %vm3736_vm10, %v4347_v63 }
 0x335   : > { %7117 = vmatprep.mubr.msk.f32.mxu1 %vm3736_vm10, %v4348_v44 }
 0x338   : > { %7118 = vmatmul.mubr.msk.f32.gmra.mrb[20].mxu1 %vm3736_vm10, %v4349_v20 }
 0x339   : > { %7120 = vmatprep.mubr.msk.f32.mxu1 %vm3736_vm10, %v4350_v4 }
 0x33c   : > { %7121 = vmatmul.mubr.msk.f32.gmra.mrb[22].mxu1 %vm3736_vm10, %v4351_v47 }
 0x3e3   : > { %v7089_v25 = vpop.f32.mrb[0].mxu1 }
 0x3e4   : > { %v4644_v32 = vadd.f32 %v7089_v25, %v8792_v23  ;;  %v4493_v28 = vpop.f32.mrb[1].mxu1 }
 0x3e5   : > { %v4643_v6 = vadd.f32 %v8792_v23, %v4493_v28 }
 0x3e6   : > { %v4668_v45 = vmax.f32 %v4644_v32, 0.0 }
 0x3e7   : > { %v4667_v33 = vmax.f32 %v4643_v6, 0.0  ;;  %v7092_v17 = vpop.f32.mrb[2].mxu1 }
 0x3e8   : > { %v4732_v54 = vcombine.high %v4668_v45, %v4668_v45  ;;  %v4739_v3 = vrot.slane %v4668_v45, %v7664_v57  ;;  %v4646_v18 = vadd.f32 %v7092_v17, %v8792_v23  ;;  %v4503_v19 = vpop.f32.mrb[3].mxu1 }
 0x3e9   : > { %v4715_v41 = vcombine.high %v4667_v33, %v4667_v33  ;;  %v4722_v14 = vrot.slane %v4667_v33, %v7664_v57  ;;  %v8800_v1 = vadd.f32 %v8792_v23, %v4503_v19 }
 0x3ea   : > { %v4746_v16 = vrot.slane %v4732_v54, %v7664_v57  ;;  %v4747_v59 = vcombine.high %v4739_v3, %v4739_v3  ;;  %v5248_v13 = vsel %vm5219_vm12, %v4739_v3, -inf  ;;  %v8804_v2 = vmax.f32 %v4646_v18, 0.0 }
 0x3eb   : > { %v5249_v61 = vrot.slane %v5248_v13, 4  ;;  %v4729_v46 = vrot.slane %v4715_v41, %v7664_v57  ;;  %v4730_v50 = vcombine.high %v4722_v14, %v4722_v14  ;;  %v5220_v9 = vsel %vm5219_vm12, %v4722_v14, -inf  ;;  %v8808_v52 = vpop.f32.mrb[4].mxu1 }
 0x3ec   : > { %v4748_v15 = vcombine.high %v4746_v16, %v4746_v16  ;;  %v5255_v24 = vsel %vm5219_vm12, %v4747_v59, -inf  ;;  %v5262_v26 = vsel %vm5219_vm12, %v4746_v16, -inf  ;;  %v5221_v30 = vrot.slane %v5220_v9, 4  ;;  %v8812_v0 = vpop.f32.mrb[5].mxu1 }
 0x3ed   : > { %v5250_v10 = vmax.f32 %v5248_v13, %v5249_v61  ;;  %v5256_v55 = vrot.slane %v5255_v24, 4  ;;  %v5263_v40 = vrot.slane %v5262_v26, 4  ;;  %v4731_v38 = vcombine.high %v4729_v46, %v4729_v46 }
 0x3ee   : > { %v5269_v48 = vsel %vm5219_vm12, %v4748_v15, -inf  ;;  %v5222_v8 = vmax.f32 %v5220_v9, %v5221_v30  ;;  %v5227_v42 = vsel %vm5219_vm12, %v4730_v50, -inf  ;;  %v5234_v39 = vsel %vm5219_vm12, %v4729_v46, -inf }
 0x3ef   : > { %v5251_v36 = vrot.slane %v5250_v10, 2  ;;  %v5257_v58 = vmax.f32 %v5255_v24, %v5256_v55  ;;  %v5264_v11 = vmax.f32 %v5262_v26, %v5263_v40  ;;  %v5270_v62 = vrot.slane %v5269_v48, 4  ;;  %v8817_v27 = vpop.f32.mrb[6].mxu1 }
 0x3f0   : > { %v5223_v34 = vrot.slane %v5222_v8, 2  ;;  %v5228_v22 = vrot.slane %v5227_v42, 4  ;;  %v5235_v21 = vrot.slane %v5234_v39, 4  ;;  %v5241_v5 = vsel %vm5219_vm12, %v4731_v38, -inf  ;;  %v8820_v31 = vpop.f32.mrb[7].mxu1 }
 0x3f1   : > { %v5252_v60 = vmax.f32 %v5250_v10, %v5251_v36  ;;  %v5258_v7 = vrot.slane %v5257_v58, 2  ;;  %v5265_v43 = vrot.slane %v5264_v11, 2  ;;  %v5271_v49 = vmax.f32 %v5269_v48, %v5270_v62 }
 0x3f2   : > { %v5224_v51 = vmax.f32 %v5222_v8, %v5223_v34  ;;  %v5229_v35 = vmax.f32 %v5227_v42, %v5228_v22  ;;  %v5236_v12 = vmax.f32 %v5234_v39, %v5235_v21  ;;  %v5242_v56 = vrot.slane %v5241_v5, 4 }
 0x3f3   : > { %v5253_v29 = vrot.slane %v5252_v60, 1  ;;  %v5259_v63 = vmax.f32 %v5257_v58, %v5258_v7  ;;  %v5266_v44 = vmax.f32 %v5264_v11, %v5265_v43  ;;  %v5272_v20 = vrot.slane %v5271_v49, 2  ;;  %v8822_v4 = vpop.f32.mrb[8].mxu1 }
 0x3f4   : > { %v5225_v47 = vrot.slane %v5224_v51, 1  ;;  %v5230_v25 = vrot.slane %v5229_v35, 2  ;;  %v5237_v32 = vrot.slane %v5236_v12, 2  ;;  %v5243_v28 = vmax.f32 %v5241_v5, %v5242_v56  ;;  %v8824_v6 = vpop.f32.mrb[9].mxu1 }
 0x3f5   : > { %v5254_v45 = vmax.f32 %v5252_v60, %v5253_v29  ;;  %v5260_v33 = vrot.slane %v5259_v63, 1  ;;  %v5267_v17 = vrot.slane %v5266_v44, 1  ;;  %v5273_v54 = vmax.f32 %v5271_v49, %v5272_v20 }
 0x3f6   : > { %v5226_v3 = vmax.f32 %v5224_v51, %v5225_v47  ;;  %v5231_v18 = vmax.f32 %v5229_v35, %v5230_v25  ;;  %v5238_v19 = vmax.f32 %v5236_v12, %v5237_v32  ;;  %v5244_v41 = vrot.slane %v5243_v28, 2 }
 0x3f7   : > { %v5261_v14 = vmax.f32 %v5259_v63, %v5260_v33  ;;  %v8826_v16 = vmax.f32 %v5266_v44, %v5267_v17  ;;  %v5274_v59 = vrot.slane %v5273_v54, 1  ;;  %v4766_v13 = vcombine.high %v8804_v2, %v8804_v2  ;;  %v8830_v61 = vpop.f32.mrb[10].mxu1 }
 0x3f8   : > { %v5232_v46 = vrot.slane %v5231_v18, 1  ;;  %v5239_v50 = vrot.slane %v5238_v19, 1  ;;  %v5245_v9 = vmax.f32 %v5243_v28, %v5244_v41  ;;  %v4773_v15 = vrot.slane %v8804_v2, %v7664_v57  ;;  %v8834_v24 = vpop.f32.mrb[11].mxu1 }
 0x3f9   : > { %v8836_v26 = vmax.f32 %v5273_v54, %v5274_v59  ;;  %v8839_v30 = vsel %vm3537_vm3, %v5261_v14, %v5254_v45  ;;  %v4780_v10 = vrot.slane %v4766_v13, %v7664_v57  ;;  %v4669_v55 = vmax.f32 %v8800_v1, 0.0 }
 0x3fa   : > { %v5233_v40 = vmax.f32 %v5231_v18, %v5232_v46  ;;  %v8843_v38 = vmax.f32 %v5238_v19, %v5239_v50  ;;  %v5246_v48 = vrot.slane %v5245_v9, 1  ;;  %v4781_v8 = vcombine.high %v4773_v15, %v4773_v15 }
 0x3fb   : > { %v4782_v42 = vcombine.high %v4780_v10, %v4780_v10  ;;  %v5304_v39 = vsel %vm5219_vm12, %v4773_v15, -inf  ;;  %v5318_v2 = vsel %vm5219_vm12, %v4780_v10, -inf  ;;  %v4749_v36 = vcombine.high %v4669_v55, %v4669_v55  ;;  %v8847_v58 = vpop.f32.mrb[12].mxu1 }
 0x3fc   : > { %v8849_v11 = vmax.f32 %v5245_v9, %v5246_v48  ;;  %v8852_v62 = vsel %vm3537_vm3, %v5233_v40, %v5226_v3  ;;  %v5305_v34 = vrot.slane %v5304_v39, 4  ;;  %v5311_v1 = vsel %vm5219_vm12, %v4781_v8, -inf  ;;  %v8855_v22 = vpop.f32.mrb[13].mxu1 }
 0x3fd   : > { %v5312_v21 = vrot.slane %v5311_v1, 4  ;;  %v5319_v5 = vrot.slane %v5318_v2, 4  ;;  %v5325_v60 = vsel %vm5219_vm12, %v4782_v42, -inf  ;;  %v4756_v7 = vrot.slane %v4669_v55, %v7664_v57 }
 0x3fe   : > { %v5306_v43 = vmax.f32 %v5304_v39, %v5305_v34  ;;  %v5326_v49 = vrot.slane %v5325_v60, 4  ;;  %v4763_v51 = vrot.slane %v4749_v36, %v7664_v57  ;;  %v4648_v35 = vadd.f32 %v8808_v52, %v8792_v23 }
 0x3ff   : > { %v5313_v12 = vmax.f32 %v5311_v1, %v5312_v21  ;;  %v5320_v56 = vmax.f32 %v5318_v2, %v5319_v5  ;;  %v4764_v29 = vcombine.high %v4756_v7, %v4756_v7  ;;  %v5276_v63 = vsel %vm5219_vm12, %v4756_v7, -inf  ;;  %v8863_v44 = vpop.f32.mrb[14].mxu1 }
 0x400   : > { %v5307_v20 = vrot.slane %v5306_v43, 2  ;;  %v5327_v47 = vmax.f32 %v5325_v60, %v5326_v49  ;;  %v4765_v25 = vcombine.high %v4763_v51, %v4763_v51  ;;  %v5277_v32 = vrot.slane %v5276_v63, 4  ;;  %v8865_v28 = vpop.f32.mrb[15].mxu1 }
 0x401   : > { %v5314_v45 = vrot.slane %v5313_v12, 2  ;;  %v5321_v33 = vrot.slane %v5320_v56, 2  ;;  %v5283_v17 = vsel %vm5219_vm12, %v4764_v29, -inf  ;;  %v5290_v54 = vsel %vm5219_vm12, %v4763_v51, -inf }
 0x402   : > { %v5308_v52 = vmax.f32 %v5306_v43, %v5307_v20  ;;  %v5328_v3 = vrot.slane %v5327_v47, 2  ;;  %v5278_v18 = vmax.f32 %v5276_v63, %v5277_v32  ;;  %v5284_v19 = vrot.slane %v5283_v17, 4 }
 0x403   : > { %v5315_v41 = vmax.f32 %v5313_v12, %v5314_v45  ;;  %v5322_v14 = vmax.f32 %v5320_v56, %v5321_v33  ;;  %v5291_v59 = vrot.slane %v5290_v54, 4  ;;  %v5297_v13 = vsel %vm5219_vm12, %v4765_v25, -inf  ;;  %v8870_v46 = vpop.f32.mrb[16].mxu1 }
 0x404   : > { %v5309_v50 = vrot.slane %v5308_v52, 1  ;;  %v5329_v9 = vmax.f32 %v5327_v47, %v5328_v3  ;;  %v5279_v15 = vrot.slane %v5278_v18, 2  ;;  %v5285_v10 = vmax.f32 %v5283_v17, %v5284_v19  ;;  %v8872_v55 = vpop.f32.mrb[17].mxu1 }
 0x405   : > { %v5316_v40 = vrot.slane %v5315_v41, 1  ;;  %v5323_v48 = vrot.slane %v5322_v14, 1  ;;  %v5292_v8 = vmax.f32 %v5290_v54, %v5291_v59  ;;  %v5298_v42 = vrot.slane %v5297_v13, 4 }
 0x406   : > { %v5310_v39 = vmax.f32 %v5308_v52, %v5309_v50  ;;  %v5330_v2 = vrot.slane %v5329_v9, 1  ;;  %v5280_v36 = vmax.f32 %v5278_v18, %v5279_v15  ;;  %v5286_v34 = vrot.slane %v5285_v10, 2 }
 0x407   : > { %v5317_v1 = vmax.f32 %v5315_v41, %v5316_v40  ;;  %v8874_v21 = vmax.f32 %v5322_v14, %v5323_v48  ;;  %v5293_v5 = vrot.slane %v5292_v8, 2  ;;  %v5299_v60 = vmax.f32 %v5297_v13, %v5298_v42  ;;  %v8876_v7 = vpop.f32.mrb[18].mxu1 }
 0x408   : > { %v8878_v43 = vmax.f32 %v5329_v9, %v5330_v2  ;;  %v5281_v49 = vrot.slane %v5280_v36, 1  ;;  %v5287_v51 = vmax.f32 %v5285_v10, %v5286_v34  ;;  %v4672_v12 = vmax.f32 %v4648_v35, 0.0  ;;  %v8880_v56 = vpop.f32.mrb[19].mxu1 }
 0x409   : > { %v8883_v29 = vsel %vm3537_vm3, %v5317_v1, %v5310_v39  ;;  %v5294_v63 = vmax.f32 %v5292_v8, %v5293_v5  ;;  %v5300_v20 = vrot.slane %v5299_v60, 2  ;;  %v4647_v47 = vadd.f32 %v8792_v23, %v8812_v0 }
 0x40a   : > { %v5282_v25 = vmax.f32 %v5280_v36, %v5281_v49  ;;  %v5288_v32 = vrot.slane %v5287_v51, 1  ;;  %v4800_v45 = vcombine.high %v4672_v12, %v4672_v12  ;;  %v4807_v33 = vrot.slane %v4672_v12, %v7664_v57 }
 0x40b   : > { %v5295_v17 = vrot.slane %v5294_v63, 1  ;;  %v5301_v54 = vmax.f32 %v5299_v60, %v5300_v20  ;;  %v4671_v52 = vmax.f32 %v4647_v47, 0.0  ;;  %v4650_v35 = vadd.f32 %v8817_v27, %v8792_v23  ;;  %v8894_v50 = vpop.f32.mrb[20].mxu1 }
 0x40c   : > { %v5289_v3 = vmax.f32 %v5287_v51, %v5288_v32  ;;  %v4814_v18 = vrot.slane %v4800_v45, %v7664_v57  ;;  %v4815_v19 = vcombine.high %v4807_v33, %v4807_v33  ;;  %v5360_v41 = vsel %vm5219_vm12, %v4807_v33, -inf }
 0x40d   : > { %v8892_v14 = vmax.f32 %v5294_v63, %v5295_v17  ;;  %v5302_v0 = vrot.slane %v5301_v54, 1  ;;  %v5361_v59 = vrot.slane %v5360_v41, 4  ;;  %v4783_v13 = vcombine.high %v4671_v52, %v4671_v52 }
 0x40e   : > { %v8897_v9 = vsel %vm3537_vm3, %v5289_v3, %v5282_v25  ;;  %v4816_v15 = vcombine.high %v4814_v18, %v4814_v18  ;;  %v5367_v10 = vsel %vm5219_vm12, %v4815_v19, -inf  ;;  %v5374_v27 = vsel %vm5219_vm12, %v4814_v18, -inf }
 0x40f   : > { %v8901_v40 = vmax.f32 %v5301_v54, %v5302_v0  ;;  %v5362_v48 = vmax.f32 %v5360_v41, %v5361_v59  ;;  %v5368_v8 = vrot.slane %v5367_v10, 4  ;;  %v5375_v42 = vrot.slane %v5374_v27, 4 }
 0x410   : > { %v5381_v39 = vsel %vm5219_vm12, %v4816_v15, -inf  ;;  %v4790_v2 = vrot.slane %v4671_v52, %v7664_v57  ;;  %v4797_v36 = vrot.slane %v4783_v13, %v7664_v57  ;;  %v4674_v34 = vmax.f32 %v4650_v35, 0.0  ;;  %v8910_v15 = vpop.f32.mrb[21].mxu1 }
 0x411   : > { %v5363_v1 = vrot.slane %v5362_v48, 2  ;;  %v5369_v5 = vmax.f32 %v5367_v10, %v5368_v8  ;;  %v5376_v60 = vmax.f32 %v5374_v27, %v5375_v42  ;;  %v5382_v49 = vrot.slane %v5381_v39, 4 }
 0x412   : > { %v4798_v51 = vcombine.high %v4790_v2, %v4790_v2  ;;  %v4799_v12 = vcombine.high %v4797_v36, %v4797_v36  ;;  %v5332_v63 = vsel %vm5219_vm12, %v4790_v2, -inf  ;;  %v5346_v20 = vsel %vm5219_vm12, %v4797_v36, -inf }
 0x413   : > { %v5364_v47 = vmax.f32 %v5362_v48, %v5363_v1  ;;  %v5370_v25 = vrot.slane %v5369_v5, 2  ;;  %v5377_v32 = vrot.slane %v5376_v60, 2  ;;  %v5383_v45 = vmax.f32 %v5381_v39, %v5382_v49 }
 0x414   : > { %v5333_v33 = vrot.slane %v5332_v63, 4  ;;  %v5339_v17 = vsel %vm5219_vm12, %v4798_v51, -inf  ;;  %v5347_v54 = vrot.slane %v5346_v20, 4  ;;  %v5353_v52 = vsel %vm5219_vm12, %v4799_v12, -inf }
 0x415   : > { %v5365_v35 = vrot.slane %v5364_v47, 1  ;;  %v5371_v3 = vmax.f32 %v5369_v5, %v5370_v25  ;;  %v5378_v18 = vmax.f32 %v5376_v60, %v5377_v32  ;;  %v5384_v19 = vrot.slane %v5383_v45, 2 }
 0x416   : > { %v5334_v41 = vmax.f32 %v5332_v63, %v5333_v33  ;;  %v5340_v0 = vrot.slane %v5339_v17, 4  ;;  %v5348_v59 = vmax.f32 %v5346_v20, %v5347_v54  ;;  %v5354_v13 = vrot.slane %v5353_v52, 4 }
 0x417   : > { %v5366_v10 = vmax.f32 %v5364_v47, %v5365_v35  ;;  %v5372_v27 = vrot.slane %v5371_v3, 1  ;;  %v5379_v48 = vrot.slane %v5378_v18, 1  ;;  %v5385_v8 = vmax.f32 %v5383_v45, %v5384_v19 }
 0x418   : > { %v5335_v42 = vrot.slane %v5334_v41, 2  ;;  %v5341_v39 = vmax.f32 %v5339_v17, %v5340_v0  ;;  %v5349_v2 = vrot.slane %v5348_v59, 2  ;;  %v5355_v36 = vmax.f32 %v5353_v52, %v5354_v13 }
 0x419   : > { %v5373_v1 = vmax.f32 %v5371_v3, %v5372_v27  ;;  %v8912_v49 = vmax.f32 %v5378_v18, %v5379_v48  ;;  %v5386_v5 = vrot.slane %v5385_v8, 1  ;;  %v4834_v60 = vcombine.high %v4674_v34, %v4674_v34 }
 0x41a   : > { %v5336_v51 = vmax.f32 %v5334_v41, %v5335_v42  ;;  %v5342_v12 = vrot.slane %v5341_v39, 2  ;;  %v5350_v63 = vmax.f32 %v5348_v59, %v5349_v2  ;;  %v5356_v20 = vrot.slane %v5355_v36, 2 }
 0x41b   : > { %9601 = vst [vmem:[#allocation7_spill] sm:$0xff] %v8912_v49  ;;  %v8914_v25 = vmax.f32 %v5385_v8, %v5386_v5  ;;  %v8917_v47 = vsel %vm3537_vm3, %v5373_v1, %v5366_v10  ;;  %v4841_v32 = vrot.slane %v4674_v34, %v7664_v57  ;;  %v4848_v45 = vrot.slane %v4834_v60, %v7664_v57  ;;  %v8927_v8 = vpop.f32.mrb[22].mxu1 }
 0x41c   : > { %v5337_v33 = vrot.slane %v5336_v51, 1  ;;  %v5343_v17 = vmax.f32 %v5341_v39, %v5342_v12  ;;  %v5351_v54 = vrot.slane %v5350_v63, 1  ;;  %v5357_v52 = vmax.f32 %v5355_v36, %v5356_v20 }
 0x41d   : > { %9602 = vst [vmem:[#allocation8_spill] sm:$0xff] %v8914_v25  ;;  %v4849_v35 = vcombine.high %v4841_v32, %v4841_v32  ;;  %v4850_v3 = vcombine.high %v4848_v45, %v4848_v45  ;;  %v5416_v18 = vsel %vm5219_vm12, %v4841_v32, -inf  ;;  %v5430_v19 = vsel %vm5219_vm12, %v4848_v45, -inf }
 0x41e   : > { %v5338_v41 = vmax.f32 %v5336_v51, %v5337_v33  ;;  %v5344_v0 = vrot.slane %v5343_v17, 1  ;;  %v8923_v59 = vmax.f32 %v5350_v63, %v5351_v54  ;;  %v5358_v13 = vrot.slane %v5357_v52, 1 }
 0x41f   : > { %v5417_v10 = vrot.slane %v5416_v18, 4  ;;  %v5423_v34 = vsel %vm5219_vm12, %v4849_v35, -inf  ;;  %v5431_v27 = vrot.slane %v5430_v19, 4  ;;  %v5437_v48 = vsel %vm5219_vm12, %v4850_v3, -inf }
 0x420   : > { %v5345_v42 = vmax.f32 %v5343_v17, %v5344_v0  ;;  %v8929_v39 = vmax.f32 %v5357_v52, %v5358_v13  ;;  %v5424_v2 = vrot.slane %v5423_v34, 4  ;;  %v5438_v36 = vrot.slane %v5437_v48, 4 }
 0x421   : > { %v5418_v1 = vmax.f32 %v5416_v18, %v5417_v10  ;;  %v5432_v5 = vmax.f32 %v5430_v19, %v5431_v27  ;;  %v4649_v60 = vadd.f32 %v8792_v23, %v8820_v31  ;;  %v4652_v51 = vadd.f32 %v8822_v4, %v8792_v23 }
 0x422   : > { %9603 = vst [vmem:[#allocation9_spill] sm:$0xff] %v8929_v39  ;;  %v8936_v12 = vsel %vm3537_vm3, %v5345_v42, %v5338_v41  ;;  %v5425_v63 = vmax.f32 %v5423_v34, %v5424_v2  ;;  %v5439_v20 = vmax.f32 %v5437_v48, %v5438_v36  ;;  %v4651_v32 = vadd.f32 %v8792_v23, %v8824_v6  ;;  %v8949_v2 = vpop.f32.mrb[23].mxu1 }
 0x423   : > { %v5419_v45 = vrot.slane %v5418_v1, 2  ;;  %v5433_v33 = vrot.slane %v5432_v5, 2  ;;  %v4673_v17 = vmax.f32 %v4649_v60, 0.0  ;;  %v4676_v54 = vmax.f32 %v4652_v51, 0.0 }
 0x424   : > { %v5426_v52 = vrot.slane %v5425_v63, 2  ;;  %v5440_v35 = vrot.slane %v5439_v20, 2  ;;  %v8940_v3 = vmax.f32 %v4651_v32, 0.0  ;;  %v8944_v31 = vadd.f32 %v8830_v61, %v8792_v23 }
 0x425   : > { %v5420_v4 = vmax.f32 %v5418_v1, %v5419_v45  ;;  %v5434_v18 = vmax.f32 %v5432_v5, %v5433_v33  ;;  %v4817_v19 = vcombine.high %v4673_v17, %v4673_v17  ;;  %v4824_v41 = vrot.slane %v4673_v17, %v7664_v57 }
 0x426   : > { %v5427_v0 = vmax.f32 %v5425_v63, %v5426_v52  ;;  %v5441_v13 = vmax.f32 %v5439_v20, %v5440_v35  ;;  %v4868_v6 = vcombine.high %v4676_v54, %v4676_v54  ;;  %v4875_v10 = vrot.slane %v4676_v54, %v7664_v57 }
 0x427   : > { %v5421_v34 = vrot.slane %v5420_v4, 1  ;;  %v5435_v27 = vrot.slane %v5434_v18, 1  ;;  %v4831_v48 = vrot.slane %v4817_v19, %v7664_v57  ;;  %v4832_v42 = vcombine.high %v4824_v41, %v4824_v41 }
 0x428   : > { %v5428_v36 = vrot.slane %v5427_v0, 1  ;;  %v5442_v61 = vrot.slane %v5441_v13, 1  ;;  %v5388_v1 = vsel %vm5219_vm12, %v4824_v41, -inf  ;;  %v4882_v5 = vrot.slane %v4868_v6, %v7664_v57 }
 0x429   : > { %v5422_v60 = vmax.f32 %v5420_v4, %v5421_v34  ;;  %v8953_v51 = vmax.f32 %v5434_v18, %v5435_v27  ;;  %v4833_v63 = vcombine.high %v4831_v48, %v4831_v48  ;;  %v5389_v20 = vrot.slane %v5388_v1, 4 }
 0x42a   : > { %v5429_v32 = vmax.f32 %v5427_v0, %v5428_v36  ;;  %v8955_v45 = vmax.f32 %v5441_v13, %v5442_v61  ;;  %v5395_v33 = vsel %vm5219_vm12, %v4832_v42, -inf  ;;  %v5402_v17 = vsel %vm5219_vm12, %v4831_v48, -inf }
 0x42b   : > { %9604 = vst [vmem:[#allocation10_spill] sm:$0xff] %v8953_v51  ;;  %v5390_v54 = vmax.f32 %v5388_v1, %v5389_v20  ;;  %v5396_v52 = vrot.slane %v5395_v33, 4  ;;  %v5403_v35 = vrot.slane %v5402_v17, 4  ;;  %v5409_v19 = vsel %vm5219_vm12, %v4833_v63, -inf }
 0x42c   : > { %9605 = vst [vmem:[#allocation11_spill] sm:$0xff] %v8955_v45  ;;  %v8961_v41 = vsel %vm3537_vm3, %v5429_v32, %v5422_v60  ;;  %v5410_v4 = vrot.slane %v5409_v19, 4  ;;  %v4883_v18 = vcombine.high %v4875_v10, %v4875_v10  ;;  %v4884_v6 = vcombine.high %v4882_v5, %v4882_v5 }
 0x42d   : > { %9606 = vst [vmem:[#allocation12_spill] sm:$0xff] %v8961_v41  ;;  %v5391_v34 = vrot.slane %v5390_v54, 2  ;;  %v5397_v27 = vmax.f32 %v5395_v33, %v5396_v52  ;;  %v5404_v0 = vmax.f32 %v5402_v17, %v5403_v35  ;;  %v5472_v13 = vsel %vm5219_vm12, %v4875_v10, -inf }
 0x42e   : > { %v5411_v36 = vmax.f32 %v5409_v19, %v5410_v4  ;;  %v5473_v42 = vrot.slane %v5472_v13, 4  ;;  %v5479_v48 = vsel %vm5219_vm12, %v4883_v18, -inf  ;;  %v5486_v61 = vsel %vm5219_vm12, %v4882_v5, -inf }
 0x42f   : > { %v5392_v1 = vmax.f32 %v5390_v54, %v5391_v34  ;;  %v5398_v20 = vrot.slane %v5397_v27, 2  ;;  %v5405_v63 = vrot.slane %v5404_v0, 2  ;;  %v5480_v37 = vrot.slane %v5479_v48, 4 }
 0x430   : > { %v5412_v60 = vrot.slane %v5411_v36, 2  ;;  %v5474_v32 = vmax.f32 %v5472_v13, %v5473_v42  ;;  %v5487_v53 = vrot.slane %v5486_v61, 4  ;;  %v5493_v45 = vsel %vm5219_vm12, %v4884_v6, -inf }
 0x431   : > { %v5393_v51 = vrot.slane %v5392_v1, 1  ;;  %v5399_v33 = vmax.f32 %v5397_v27, %v5398_v20  ;;  %v5406_v17 = vmax.f32 %v5404_v0, %v5405_v63  ;;  %v5481_v52 = vmax.f32 %v5479_v48, %v5480_v37 }
 0x432   : > { %v5413_v10 = vmax.f32 %v5411_v36, %v5412_v60  ;;  %v5475_v35 = vrot.slane %v5474_v32, 2  ;;  %v5488_v19 = vmax.f32 %v5486_v61, %v5487_v53  ;;  %v5494_v4 = vrot.slane %v5493_v45, 4 }
 0x433   : > { %v5394_v18 = vmax.f32 %v5392_v1, %v5393_v51  ;;  %v5400_v41 = vrot.slane %v5399_v33, 1  ;;  %v5407_v5 = vrot.slane %v5406_v17, 1  ;;  %v5482_v54 = vrot.slane %v5481_v52, 2 }
 0x434   : > { %v5414_v34 = vrot.slane %v5413_v10, 1  ;;  %v5476_v25 = vmax.f32 %v5474_v32, %v5475_v35  ;;  %v5489_v39 = vrot.slane %v5488_v19, 2  ;;  %v5495_v49 = vmax.f32 %v5493_v45, %v5494_v4 }
 0x435   : > { %v5401_v13 = vmax.f32 %v5399_v33, %v5400_v41  ;;  %v8967_v42 = vmax.f32 %v5406_v17, %v5407_v5  ;;  %v5483_v6 = vmax.f32 %v5481_v52, %v5482_v54  ;;  %v4851_v27 = vcombine.high %v8940_v3, %v8940_v3 }
 0x436   : > { %v8971_v37 = vmax.f32 %v5413_v10, %v5414_v34  ;;  %v5477_v0 = vrot.slane %v5476_v25, 1  ;;  %v5490_v53 = vmax.f32 %v5488_v19, %v5489_v39  ;;  %v5496_v36 = vrot.slane %v5495_v49, 2 }
 0x437   : > { %v8974_v51 = vsel %vm3537_vm3, %v5401_v13, %v5394_v18  ;;  %v5484_v48 = vrot.slane %v5483_v6, 1  ;;  %v4858_v61 = vrot.slane %v8940_v3, %v7664_v57  ;;  %v4865_v45 = vrot.slane %v4851_v27, %v7664_v57 }
 0x438   : > { %v5478_v41 = vmax.f32 %v5476_v25, %v5477_v0  ;;  %v5491_v1 = vrot.slane %v5490_v53, 1  ;;  %v5497_v20 = vmax.f32 %v5495_v49, %v5496_v36  ;;  %v4678_v63 = vmax.f32 %v8944_v31, 0.0 }
 0x439   : > { %v5485_v60 = vmax.f32 %v5483_v6, %v5484_v48  ;;  %v4866_v32 = vcombine.high %v4858_v61, %v4858_v61  ;;  %v4867_v33 = vcombine.high %v4865_v45, %v4865_v45  ;;  %v5444_v39 = vsel %vm5219_vm12, %v4858_v61, -inf }
 0x43a   : > { %v8981_v17 = vmax.f32 %v5490_v53, %v5491_v1  ;;  %v5498_v52 = vrot.slane %v5497_v20, 1  ;;  %v5445_v10 = vrot.slane %v5444_v39, 4  ;;  %v5458_v35 = vsel %vm5219_vm12, %v4865_v45, -inf }
 0x43b   : > { %v8985_v3 = vsel %vm3537_vm3, %v5485_v60, %v5478_v41  ;;  %v5451_v25 = vsel %vm5219_vm12, %v4866_v32, -inf  ;;  %v5459_v19 = vrot.slane %v5458_v35, 4  ;;  %v5465_v49 = vsel %vm5219_vm12, %v4867_v33, -inf }
 0x43c   : > { %9607 = vst [vmem:[#allocation13_spill] sm:$0xff] %v8981_v17  ;;  %9608 = vst [vmem:[#allocation14_spill] sm:$0xff] %v8985_v3  ;;  %v8989_v31 = vmax.f32 %v5497_v20, %v5498_v52  ;;  %v5446_v4 = vmax.f32 %v5444_v39, %v5445_v10  ;;  %v5452_v18 = vrot.slane %v5451_v25, 4  ;;  %v5466_v5 = vrot.slane %v5465_v49, 4 }
 0x43d   : > { %v5460_v54 = vmax.f32 %v5458_v35, %v5459_v19  ;;  %v4902_v34 = vcombine.high %v4678_v63, %v4678_v63  ;;  %v4909_v13 = vrot.slane %v4678_v63, %v7664_v57  ;;  %v4653_v6 = vadd.f32 %v8792_v23, %v8834_v24 }
 0x43e   : > { %9609 = vst [vmem:[#allocation15_spill] sm:$0xff] %v8989_v31  ;;  %v5447_v27 = vrot.slane %v5446_v4, 2  ;;  %v5453_v0 = vmax.f32 %v5451_v25, %v5452_v18  ;;  %v5467_v53 = vmax.f32 %v5465_v49, %v5466_v5  ;;  %v4656_v36 = vadd.f32 %v8847_v58, %v8792_v23 }
 0x43f   : > { %v5461_v48 = vrot.slane %v5460_v54, 2  ;;  %v4916_v61 = vrot.slane %v4902_v34, %v7664_v57  ;;  %v4917_v45 = vcombine.high %v4909_v13, %v4909_v13  ;;  %v5528_v41 = vsel %vm5219_vm12, %v4909_v13, -inf }
 0x440   : > { %v5448_v1 = vmax.f32 %v5446_v4, %v5447_v27  ;;  %v5454_v20 = vrot.slane %v5453_v0, 2  ;;  %v5468_v60 = vrot.slane %v5467_v53, 2  ;;  %v5529_v32 = vrot.slane %v5528_v41, 4 }
 0x441   : > { %v5462_v63 = vmax.f32 %v5460_v54, %v5461_v48  ;;  %v4918_v33 = vcombine.high %v4916_v61, %v4916_v61  ;;  %v5535_v24 = vsel %vm5219_vm12, %v4917_v45, -inf  ;;  %v5542_v39 = vsel %vm5219_vm12, %v4916_v61, -inf }
 0x442   : > { %v5449_v52 = vrot.slane %v5448_v1, 1  ;;  %v5455_v10 = vmax.f32 %v5453_v0, %v5454_v20  ;;  %v5469_v35 = vmax.f32 %v5467_v53, %v5468_v60  ;;  %v5530_v58 = vmax.f32 %v5528_v41, %v5529_v32 }
 0x443   : > { %v5463_v25 = vrot.slane %v5462_v63, 1  ;;  %v5536_v19 = vrot.slane %v5535_v24, 4  ;;  %v5543_v49 = vrot.slane %v5542_v39, 4  ;;  %v5549_v18 = vsel %vm5219_vm12, %v4918_v33, -inf }
 0x444   : > { %v5450_v5 = vmax.f32 %v5448_v1, %v5449_v52  ;;  %v5456_v4 = vrot.slane %v5455_v10, 1  ;;  %v5470_v34 = vrot.slane %v5469_v35, 1  ;;  %v5531_v13 = vrot.slane %v5530_v58, 2 }
 0x445   : > { %v9001_v27 = vmax.f32 %v5462_v63, %v5463_v25  ;;  %v5537_v54 = vmax.f32 %v5535_v24, %v5536_v19  ;;  %v5544_v48 = vmax.f32 %v5542_v39, %v5543_v49  ;;  %v5550_v45 = vrot.slane %v5549_v18, 4 }
 0x446   : > { %v5457_v31 = vmax.f32 %v5455_v10, %v5456_v4  ;;  %v9003_v61 = vmax.f32 %v5469_v35, %v5470_v34  ;;  %v5532_v0 = vmax.f32 %v5530_v58, %v5531_v13  ;;  %v4677_v53 = vmax.f32 %v4653_v6, 0.0 }
 0x447   : > { %9610 = vst [vmem:[#allocation16_spill] sm:$0xff] %v9001_v27  ;;  %v5538_v41 = vrot.slane %v5537_v54, 2  ;;  %v5545_v20 = vrot.slane %v5544_v48, 2  ;;  %v5551_v60 = vmax.f32 %v5549_v18, %v5550_v45  ;;  %v4680_v32 = vmax.f32 %v4656_v36, 0.0 }
 0x448   : > { %9611 = vst [vmem:[#allocation17_spill] sm:$0xff] %v9003_v61  ;;  %v9006_v33 = vsel %vm3537_vm3, %v5457_v31, %v5450_v5  ;;  %v5533_v1 = vrot.slane %v5532_v0, 1  ;;  %v4885_v52 = vcombine.high %v4677_v53, %v4677_v53  ;;  %v4892_v63 = vrot.slane %v4677_v53, %v7664_v57 }
 0x449   : > { %v5539_v25 = vmax.f32 %v5537_v54, %v5538_v41  ;;  %v5546_v24 = vmax.f32 %v5544_v48, %v5545_v20  ;;  %v5552_v39 = vrot.slane %v5551_v60, 2  ;;  %v4936_v19 = vcombine.high %v4680_v32, %v4680_v32 }
 0x44a   : > { %v5534_v10 = vmax.f32 %v5532_v0, %v5533_v1  ;;  %v4899_v35 = vrot.slane %v4885_v52, %v7664_v57  ;;  %v4900_v58 = vcombine.high %v4892_v63, %v4892_v63  ;;  %v5500_v6 = vsel %vm5219_vm12, %v4892_v63, -inf }
 0x44b   : > { %v5540_v49 = vrot.slane %v5539_v25, 1  ;;  %v5547_v18 = vrot.slane %v5546_v24, 1  ;;  %v5553_v36 = vmax.f32 %v5551_v60, %v5552_v39  ;;  %v5501_v4 = vrot.slane %v5500_v6, 4 }
 0x44c   : > { %v4901_v31 = vcombine.high %v4899_v35, %v4899_v35  ;;  %v5507_v5 = vsel %vm5219_vm12, %v4900_v58, -inf  ;;  %v5514_v34 = vsel %vm5219_vm12, %v4899_v35, -inf  ;;  %v4943_v13 = vrot.slane %v4680_v32, %v7664_v57 }
 0x44d   : > { %v5541_v54 = vmax.f32 %v5539_v25, %v5540_v49  ;;  %v9014_v48 = vmax.f32 %v5546_v24, %v5547_v18  ;;  %v5554_v45 = vrot.slane %v5553_v36, 1  ;;  %v5502_v0 = vmax.f32 %v5500_v6, %v5501_v4 }
 0x44e   : > { %v5508_v53 = vrot.slane %v5507_v5, 4  ;;  %v5515_v41 = vrot.slane %v5514_v34, 4  ;;  %v5521_v20 = vsel %vm5219_vm12, %v4901_v31, -inf  ;;  %v4950_v1 = vrot.slane %v4936_v19, %v7664_v57 }
 0x44f   : > { %9612 = vst [vmem:[#allocation18_spill] sm:$0xff] %v9014_v48  ;;  %v9018_v60 = vmax.f32 %v5553_v36, %v5554_v45  ;;  %v9021_v52 = vsel %vm3537_vm3, %v5541_v54, %v5534_v10  ;;  %v5503_v63 = vrot.slane %v5502_v0, 2  ;;  %v5522_v39 = vrot.slane %v5521_v20, 4 }
 0x450   : > { %9614 = vst [vmem:[#allocation20_spill] sm:$0xff] %v9021_v52  ;;  %v5509_v35 = vmax.f32 %v5507_v5, %v5508_v53  ;;  %v5516_v32 = vmax.f32 %v5514_v34, %v5515_v41  ;;  %v4951_v25 = vcombine.high %v4943_v13, %v4943_v13  ;;  %v4952_v24 = vcombine.high %v4950_v1, %v4950_v1 }
 0x451   : > { %9613 = vst [vmem:[#allocation19_spill] sm:$0xff] %v9018_v60  ;;  %v5504_v58 = vmax.f32 %v5502_v0, %v5503_v63  ;;  %v5523_v49 = vmax.f32 %v5521_v20, %v5522_v39  ;;  %v5584_v6 = vsel %vm5219_vm12, %v4943_v13, -inf  ;;  %v5598_v18 = vsel %vm5219_vm12, %v4950_v1, -inf }
 0x452   : > { %v5510_v4 = vrot.slane %v5509_v35, 2  ;;  %v5517_v31 = vrot.slane %v5516_v32, 2  ;;  %v5585_v19 = vrot.slane %v5584_v6, 4  ;;  %v5591_v36 = vsel %vm5219_vm12, %v4951_v25, -inf }
 0x453   : > { %v5505_v45 = vrot.slane %v5504_v58, 1  ;;  %v5524_v10 = vrot.slane %v5523_v49, 2  ;;  %v5592_v54 = vrot.slane %v5591_v36, 4  ;;  %v5599_v60 = vrot.slane %v5598_v18, 4 }
 0x454   : > { %v5511_v48 = vmax.f32 %v5509_v35, %v5510_v4  ;;  %v5518_v5 = vmax.f32 %v5516_v32, %v5517_v31  ;;  %v5586_v34 = vmax.f32 %v5584_v6, %v5585_v19  ;;  %v5605_v53 = vsel %vm5219_vm12, %v4952_v24, -inf }
 0x455   : > { %v5506_v0 = vmax.f32 %v5504_v58, %v5505_v45  ;;  %v5525_v41 = vmax.f32 %v5523_v49, %v5524_v10  ;;  %v5593_v20 = vmax.f32 %v5591_v36, %v5592_v54  ;;  %v5600_v13 = vmax.f32 %v5598_v18, %v5599_v60 }
 0x456   : > { %v5512_v63 = vrot.slane %v5511_v48, 1  ;;  %v5519_v1 = vrot.slane %v5518_v5, 1  ;;  %v5587_v39 = vrot.slane %v5586_v34, 2  ;;  %v5606_v52 = vrot.slane %v5605_v53, 4 }
 0x457   : > { %v5526_v61 = vrot.slane %v5525_v41, 1  ;;  %v5594_v17 = vrot.slane %v5593_v20, 2  ;;  %v5601_v25 = vrot.slane %v5600_v13, 2  ;;  %v4655_v3 = vadd.f32 %v8792_v23, %v8855_v22 }
 0x458   : > { %v5513_v27 = vmax.f32 %v5511_v48, %v5512_v63  ;;  %v9029_v35 = vmax.f32 %v5518_v5, %v5519_v1  ;;  %v5588_v32 = vmax.f32 %v5586_v34, %v5587_v39  ;;  %v5607_v6 = vmax.f32 %v5605_v53, %v5606_v52 }
 0x459   : > { %v9031_v24 = vmax.f32 %v5525_v41, %v5526_v61  ;;  %v5595_v58 = vmax.f32 %v5593_v20, %v5594_v17  ;;  %v5602_v49 = vmax.f32 %v5600_v13, %v5601_v25  ;;  %v4679_v60 = vmax.f32 %v4655_v3, 0.0 }
 0x45a   : > { %v9034_v18 = vsel %vm3537_vm3, %v5513_v27, %v5506_v0  ;;  %v5589_v4 = vrot.slane %v5588_v32, 1  ;;  %v5608_v31 = vrot.slane %v5607_v6, 2  ;;  %v4658_v19 = vadd.f32 %v8863_v44, %v8792_v23 }
 0x45b   : > { %v5596_v36 = vrot.slane %v5595_v58, 1  ;;  %v5603_v22 = vrot.slane %v5602_v49, 1  ;;  %v4919_v48 = vcombine.high %v4679_v60, %v4679_v60  ;;  %v4926_v45 = vrot.slane %v4679_v60, %v7664_v57 }
 0x45c   : > { %v5590_v10 = vmax.f32 %v5588_v32, %v5589_v4  ;;  %v5609_v52 = vmax.f32 %v5607_v6, %v5608_v31  ;;  %v4682_v61 = vmax.f32 %v4658_v19, 0.0  ;;  %v4657_v17 = vadd.f32 %v8792_v23, %v8865_v28 }
 0x45d   : > { %v5597_v3 = vmax.f32 %v5595_v58, %v5596_v36  ;;  %v9041_v54 = vmax.f32 %v5602_v49, %v5603_v22  ;;  %v4933_v27 = vrot.slane %v4919_v48, %v7664_v57  ;;  %v4934_v5 = vcombine.high %v4926_v45, %v4926_v45 }
 0x45e   : > { %v5610_v34 = vrot.slane %v5609_v52, 1  ;;  %v5556_v44 = vsel %vm5219_vm12, %v4926_v45, -inf  ;;  %v4970_v53 = vcombine.high %v4682_v61, %v4682_v61  ;;  %v4977_v0 = vrot.slane %v4682_v61, %v7664_v57 }
 0x45f   : > { %9615 = vst [vmem:[#allocation21_spill] sm:$0xff] %v9041_v54  ;;  %v9047_v41 = vsel %vm3537_vm3, %v5597_v3, %v5590_v10  ;;  %v4935_v20 = vcombine.high %v4933_v27, %v4933_v27  ;;  %v5557_v13 = vrot.slane %v5556_v44, 4  ;;  %v5563_v63 = vsel %vm5219_vm12, %v4934_v5, -inf }
 0x460   : > { %9616 = vst [vmem:[#allocation22_spill] sm:$0xff] %v9047_v41  ;;  %v9050_v23 = vmax.f32 %v5609_v52, %v5610_v34  ;;  %v5564_v28 = vrot.slane %v5563_v63, 4  ;;  %v5570_v1 = vsel %vm5219_vm12, %v4933_v27, -inf  ;;  %v4984_v39 = vrot.slane %v4970_v53, %v7664_v57 }
 0x461   : > { %v5558_v25 = vmax.f32 %v5556_v44, %v5557_v13  ;;  %v5571_v32 = vrot.slane %v5570_v1, 4  ;;  %v5577_v6 = vsel %vm5219_vm12, %v4935_v20, -inf  ;;  %v4985_v58 = vcombine.high %v4977_v0, %v4977_v0 }
 0x462   : > { %9617 = vst [vmem:[#allocation23_spill] sm:$0xff] %v9050_v23  ;;  %v5565_v49 = vmax.f32 %v5563_v63, %v5564_v28  ;;  %v5578_v60 = vrot.slane %v5577_v6, 4  ;;  %v4986_v4 = vcombine.high %v4984_v39, %v4984_v39  ;;  %v5640_v31 = vsel %vm5219_vm12, %v4977_v0, -inf }
 0x463   : > { %v5559_v19 = vrot.slane %v5558_v25, 2  ;;  %v5572_v36 = vmax.f32 %v5570_v1, %v5571_v32  ;;  %v5641_v22 = vrot.slane %v5640_v31, 4  ;;  %v5647_v48 = vsel %vm5219_vm12, %v4985_v58, -inf }
 0x464   : > { %v5566_v45 = vrot.slane %v5565_v49, 2  ;;  %v5579_v10 = vmax.f32 %v5577_v6, %v5578_v60  ;;  %v5648_v52 = vrot.slane %v5647_v48, 4  ;;  %v5654_v61 = vsel %vm5219_vm12, %v4984_v39, -inf }
 0x465   : > { %v5560_v3 = vmax.f32 %v5558_v25, %v5559_v19  ;;  %v5573_v27 = vrot.slane %v5572_v36, 2  ;;  %v5642_v5 = vmax.f32 %v5640_v31, %v5641_v22  ;;  %v5655_v34 = vrot.slane %v5654_v61, 4 }
 0x466   : > { %v5567_v44 = vmax.f32 %v5565_v49, %v5566_v45  ;;  %v5580_v53 = vrot.slane %v5579_v10, 2  ;;  %v5649_v20 = vmax.f32 %v5647_v48, %v5648_v52  ;;  %v5661_v13 = vsel %vm5219_vm12, %v4986_v4, -inf }
 0x467   : > { %v5561_v0 = vrot.slane %v5560_v3, 1  ;;  %v5574_v63 = vmax.f32 %v5572_v36, %v5573_v27  ;;  %v5643_v28 = vrot.slane %v5642_v5, 2  ;;  %v5656_v1 = vmax.f32 %v5654_v61, %v5655_v34 }
 0x468   : > { %v5568_v32 = vrot.slane %v5567_v44, 1  ;;  %v5581_v58 = vmax.f32 %v5579_v10, %v5580_v53  ;;  %v5650_v23 = vrot.slane %v5649_v20, 2  ;;  %v5662_v6 = vrot.slane %v5661_v13, 4 }
 0x469   : > { %v5562_v60 = vmax.f32 %v5560_v3, %v5561_v0  ;;  %v5575_v54 = vrot.slane %v5574_v63, 1  ;;  %v5644_v39 = vmax.f32 %v5642_v5, %v5643_v28  ;;  %v5657_v25 = vrot.slane %v5656_v1, 2 }
 0x46a   : > { %v5569_v19 = vmax.f32 %v5567_v44, %v5568_v32  ;;  %v5582_v31 = vrot.slane %v5581_v58, 1  ;;  %v5651_v22 = vmax.f32 %v5649_v20, %v5650_v23  ;;  %v5663_v49 = vmax.f32 %v5661_v13, %v5662_v6 }
 0x46b   : > { %v9059_v45 = vmax.f32 %v5574_v63, %v5575_v54  ;;  %v5645_v48 = vrot.slane %v5644_v39, 1  ;;  %v5658_v4 = vmax.f32 %v5656_v1, %v5657_v25  ;;  %v4681_v52 = vmax.f32 %v4657_v17, 0.0  ;;  %v9070_v54 = vld [vmem:[%s9589_s4] ss:$0 sm:$0xff] }
 0x46c   : > { %v9061_v36 = vmax.f32 %v5581_v58, %v5582_v31  ;;  %v9064_v61 = vsel %vm3537_vm3, %v5569_v19, %v5562_v60  ;;  %v5652_v10 = vrot.slane %v5651_v22, 1  ;;  %v5664_v27 = vrot.slane %v5663_v49, 2 }
 0x46d   : > { %v5646_v3 = vmax.f32 %v5644_v39, %v5645_v48  ;;  %v5659_v34 = vrot.slane %v5658_v4, 1  ;;  %v4953_v5 = vcombine.high %v4681_v52, %v4681_v52  ;;  %v4960_v44 = vrot.slane %v4681_v52, %v7664_v57 }
 0x46e   : > { %9618 = vst [vmem:[#allocation24_spill] sm:$0xff] %v9061_v36  ;;  %v5653_v53 = vmax.f32 %v5651_v22, %v5652_v10  ;;  %v5665_v23 = vmax.f32 %v5663_v49, %v5664_v27  ;;  %v4660_v17 = vadd.f32 %v9070_v54, %v8870_v46  ;;  %v4659_v20 = vadd.f32 %v9070_v54, %v8872_v55 }
 0x46f   : > { %v9076_v13 = vmax.f32 %v5658_v4, %v5659_v34  ;;  %v4967_v0 = vrot.slane %v4953_v5, %v7664_v57  ;;  %v4968_v63 = vcombine.high %v4960_v44, %v4960_v44  ;;  %v5612_v28 = vsel %vm5219_vm12, %v4960_v44, -inf }
 0x470   : > { %v5666_v1 = vrot.slane %v5665_v23, 1  ;;  %v9081_v32 = vsel %vm3537_vm3, %v5653_v53, %v5646_v3  ;;  %v5613_v58 = vrot.slane %v5612_v28, 4  ;;  %v4684_v6 = vmax.f32 %v4660_v17, 0.0 }
 0x471   : > { %9619 = vst [vmem:[#allocation25_spill] sm:$0xff] %v9076_v13  ;;  %9620 = vst [vmem:[#allocation26_spill] sm:$0xff] %v9081_v32  ;;  %v4969_v60 = vcombine.high %v4967_v0, %v4967_v0  ;;  %v5619_v39 = vsel %vm5219_vm12, %v4968_v63, -inf  ;;  %v5626_v46 = vsel %vm5219_vm12, %v4967_v0, -inf  ;;  %v4683_v25 = vmax.f32 %v4659_v20, 0.0 }
 0x472   : > { %v9085_v55 = vmax.f32 %v5665_v23, %v5666_v1  ;;  %v5614_v19 = vmax.f32 %v5612_v28, %v5613_v58  ;;  %v5620_v31 = vrot.slane %v5619_v39, 4  ;;  %v5627_v22 = vrot.slane %v5626_v46, 4 }
 0x473   : > { %v5633_v49 = vsel %vm5219_vm12, %v4969_v60, -inf  ;;  %v5004_v48 = vcombine.high %v4684_v6, %v4684_v6  ;;  %v5011_v4 = vrot.slane %v4684_v6, %v7664_v57  ;;  %v4987_v52 = vcombine.high %v4683_v25, %v4683_v25 }
 0x474   : > { %9621 = vst [vmem:[#allocation27_spill] sm:$0xff] %v9085_v55  ;;  %v5615_v10 = vrot.slane %v5614_v19, 2  ;;  %v5621_v27 = vmax.f32 %v5619_v39, %v5620_v31  ;;  %v5628_v3 = vmax.f32 %v5626_v46, %v5627_v22  ;;  %v5634_v34 = vrot.slane %v5633_v49, 4 }
 0x475   : > { %v5018_v5 = vrot.slane %v5004_v48, %v7664_v57  ;;  %v5019_v44 = vcombine.high %v5011_v4, %v5011_v4  ;;  %v5696_v53 = vsel %vm5219_vm12, %v5011_v4, -inf  ;;  %v4994_v23 = vrot.slane %v4683_v25, %v7664_v57 }
 0x476   : > { %v5616_v17 = vmax.f32 %v5614_v19, %v5615_v10  ;;  %v5622_v20 = vrot.slane %v5621_v27, 2  ;;  %v5629_v0 = vrot.slane %v5628_v3, 2  ;;  %v5635_v63 = vmax.f32 %v5633_v49, %v5634_v34 }
 0x477   : > { %v5020_v28 = vcombine.high %v5018_v5, %v5018_v5  ;;  %v5697_v1 = vrot.slane %v5696_v53, 4  ;;  %v5703_v58 = vsel %vm5219_vm12, %v5019_v44, -inf  ;;  %v5710_v6 = vsel %vm5219_vm12, %v5018_v5, -inf }
 0x478   : > { %v5617_v60 = vrot.slane %v5616_v17, 1  ;;  %v5623_v39 = vmax.f32 %v5621_v27, %v5622_v20  ;;  %v5630_v46 = vmax.f32 %v5628_v3, %v5629_v0  ;;  %v5636_v31 = vrot.slane %v5635_v63, 2 }
 0x479   : > { %v5698_v22 = vmax.f32 %v5696_v53, %v5697_v1  ;;  %v5704_v48 = vrot.slane %v5703_v58, 4  ;;  %v5711_v55 = vrot.slane %v5710_v6, 4  ;;  %v5717_v4 = vsel %vm5219_vm12, %v5020_v28, -inf }
 0x47a   : > { %v5618_v25 = vmax.f32 %v5616_v17, %v5617_v60  ;;  %v5624_v19 = vrot.slane %v5623_v39, 1  ;;  %v5631_v10 = vrot.slane %v5630_v46, 1  ;;  %v5637_v13 = vmax.f32 %v5635_v63, %v5636_v31 }
 0x47b   : > { %v5699_v49 = vrot.slane %v5698_v22, 2  ;;  %v5705_v34 = vmax.f32 %v5703_v58, %v5704_v48  ;;  %v5712_v32 = vmax.f32 %v5710_v6, %v5711_v55  ;;  %v5718_v36 = vrot.slane %v5717_v4, 4 }
 0x47c   : > { %v5625_v44 = vmax.f32 %v5623_v39, %v5624_v19  ;;  %v9095_v41 = vmax.f32 %v5630_v46, %v5631_v10  ;;  %v5638_v5 = vrot.slane %v5637_v13, 1  ;;  %v5001_v27 = vrot.slane %v4987_v52, %v7664_v57 }
 0x47d   : > { %v5700_v3 = vmax.f32 %v5698_v22, %v5699_v49  ;;  %v5706_v53 = vrot.slane %v5705_v34, 2  ;;  %v5713_v20 = vrot.slane %v5712_v32, 2  ;;  %v5719_v0 = vmax.f32 %v5717_v4, %v5718_v36 }
 0x47e   : > { %v9098_v1 = vmax.f32 %v5637_v13, %v5638_v5  ;;  %v9101_v17 = vsel %vm3537_vm3, %v5625_v44, %v5618_v25  ;;  %v5002_v63 = vcombine.high %v4994_v23, %v4994_v23  ;;  %v5003_v28 = vcombine.high %v5001_v27, %v5001_v27 }
 0x47f   : > { %v5701_v58 = vrot.slane %v5700_v3, 1  ;;  %v5707_v55 = vmax.f32 %v5705_v34, %v5706_v53  ;;  %v5714_v6 = vmax.f32 %v5712_v32, %v5713_v20  ;;  %v5720_v60 = vrot.slane %v5719_v0, 2 }
 0x480   : > { %9622 = vst [vmem:[#allocation28_spill] sm:$0xff] %v9098_v1  ;;  %v5668_v39 = vsel %vm5219_vm12, %v4994_v23, -inf  ;;  %v5675_v46 = vsel %vm5219_vm12, %v5002_v63, -inf  ;;  %v5682_v52 = vsel %vm5219_vm12, %v5001_v27, -inf  ;;  %v5689_v31 = vsel %vm5219_vm12, %v5003_v28, -inf }
 0x481   : > { %v5702_v36 = vmax.f32 %v5700_v3, %v5701_v58  ;;  %v5708_v13 = vrot.slane %v5707_v55, 1  ;;  %v5715_v22 = vrot.slane %v5714_v6, 1  ;;  %v5721_v48 = vmax.f32 %v5719_v0, %v5720_v60 }
 0x482   : > { %v5669_v4 = vrot.slane %v5668_v39, 4  ;;  %v5676_v25 = vrot.slane %v5675_v46, 4  ;;  %v5683_v19 = vrot.slane %v5682_v52, 4  ;;  %v5690_v10 = vrot.slane %v5689_v31, 4 }
 0x483   : > { %v5709_v49 = vmax.f32 %v5707_v55, %v5708_v13  ;;  %v9107_v34 = vmax.f32 %v5714_v6, %v5715_v22  ;;  %v5722_v32 = vrot.slane %v5721_v48, 1  ;;  %v4662_v23 = vadd.f32 %v9070_v54, %v8876_v7 }
 0x484   : > { %v5670_v44 = vmax.f32 %v5668_v39, %v5669_v4  ;;  %v5677_v5 = vmax.f32 %v5675_v46, %v5676_v25  ;;  %v5684_v27 = vmax.f32 %v5682_v52, %v5683_v19  ;;  %v5691_v53 = vmax.f32 %v5689_v31, %v5690_v10 }
 0x485   : > { %9623 = vst [vmem:[#allocation29_spill] sm:$0xff] %v9107_v34  ;;  %v9111_v20 = vmax.f32 %v5721_v48, %v5722_v32  ;;  %v9114_v3 = vsel %vm3537_vm3, %v5709_v49, %v5702_v36  ;;  %v4686_v0 = vmax.f32 %v4662_v23, 0.0  ;;  %v4661_v63 = vadd.f32 %v9070_v54, %v8880_v56 }
 0x486   : > { %9625 = vst [vmem:[#allocation31_spill] sm:$0xff] %v9114_v3  ;;  %v5671_v28 = vrot.slane %v5670_v44, 2  ;;  %v5678_v58 = vrot.slane %v5677_v5, 2  ;;  %v5685_v55 = vrot.slane %v5684_v27, 2  ;;  %v5692_v6 = vrot.slane %v5691_v53, 2 }
 0x487   : > { %9624 = vst [vmem:[#allocation30_spill] sm:$0xff] %v9111_v20  ;;  %v5038_v60 = vcombine.high %v4686_v0, %v4686_v0  ;;  %v5045_v7 = vrot.slane %v4686_v0, %v7664_v57  ;;  %v4685_v39 = vmax.f32 %v4661_v63, 0.0  ;;  %v4664_v46 = vadd.f32 %v9070_v54, %v8894_v50 }
 0x488   : > { %v5672_v52 = vmax.f32 %v5670_v44, %v5671_v28  ;;  %v5679_v31 = vmax.f32 %v5677_v5, %v5678_v58  ;;  %v5686_v13 = vmax.f32 %v5684_v27, %v5685_v55  ;;  %v5693_v36 = vmax.f32 %v5691_v53, %v5692_v6 }
 0x489   : > { %v5052_v22 = vrot.slane %v5038_v60, %v7664_v57  ;;  %v5053_v48 = vcombine.high %v5045_v7, %v5045_v7  ;;  %v5752_v56 = vsel %vm5219_vm12, %v5045_v7, -inf  ;;  %v5021_v4 = vcombine.high %v4685_v39, %v4685_v39 }
 0x48a   : > { %v5673_v25 = vrot.slane %v5672_v52, 1  ;;  %v5680_v19 = vrot.slane %v5679_v31, 1  ;;  %v5687_v10 = vrot.slane %v5686_v13, 1  ;;  %v5694_v49 = vrot.slane %v5693_v36, 1 }
 0x48b   : > { %v5054_v32 = vcombine.high %v5052_v22, %v5052_v22  ;;  %v5753_v23 = vrot.slane %v5752_v56, 4  ;;  %v5759_v0 = vsel %vm5219_vm12, %v5053_v48, -inf  ;;  %v5766_v50 = vsel %vm5219_vm12, %v5052_v22, -inf }
 0x48c   : > { %v5674_v44 = vmax.f32 %v5672_v52, %v5673_v25  ;;  %v5681_v5 = vmax.f32 %v5679_v31, %v5680_v19  ;;  %v9125_v27 = vmax.f32 %v5686_v13, %v5687_v10  ;;  %v9127_v53 = vmax.f32 %v5693_v36, %v5694_v49 }
 0x48d   : > { %v5754_v63 = vmax.f32 %v5752_v56, %v5753_v23  ;;  %v5760_v28 = vrot.slane %v5759_v0, 4  ;;  %v5767_v58 = vrot.slane %v5766_v50, 4  ;;  %v5773_v55 = vsel %vm5219_vm12, %v5054_v32, -inf }
 0x48e   : > { %9626 = vst [vmem:[#allocation32_spill] sm:$0xff] %v9125_v27  ;;  %9627 = vst [vmem:[#allocation33_spill] sm:$0xff] %v9127_v53  ;;  %v9131_v6 = vsel %vm3537_vm3, %v5681_v5, %v5674_v44  ;;  %v5774_v60 = vrot.slane %v5773_v55, 4  ;;  %v5028_v7 = vrot.slane %v4685_v39, %v7664_v57  ;;  %v5035_v48 = vrot.slane %v5021_v4, %v7664_v57 }
 0x48f   : > { %9628 = vst [vmem:[#allocation34_spill] sm:$0xff] %v9131_v6  ;;  %v5755_v22 = vrot.slane %v5754_v63, 2  ;;  %v5761_v52 = vmax.f32 %v5759_v0, %v5760_v28  ;;  %v5768_v31 = vmax.f32 %v5766_v50, %v5767_v58  ;;  %v4688_v13 = vmax.f32 %v4664_v46, 0.0 }
 0x490   : > { %v5775_v25 = vmax.f32 %v5773_v55, %v5774_v60  ;;  %v5036_v36 = vcombine.high %v5028_v7, %v5028_v7  ;;  %v5037_v19 = vcombine.high %v5035_v48, %v5035_v48  ;;  %v5724_v56 = vsel %vm5219_vm12, %v5028_v7, -inf }
 0x491   : > { %v5756_v10 = vmax.f32 %v5754_v63, %v5755_v22  ;;  %v5762_v49 = vrot.slane %v5761_v52, 2  ;;  %v5769_v32 = vrot.slane %v5768_v31, 2  ;;  %v5725_v23 = vrot.slane %v5724_v56, 4 }
 0x492   : > { %v5776_v44 = vrot.slane %v5775_v25, 2  ;;  %v5731_v5 = vsel %vm5219_vm12, %v5036_v36, -inf  ;;  %v5738_v39 = vsel %vm5219_vm12, %v5035_v48, -inf  ;;  %v5745_v4 = vsel %vm5219_vm12, %v5037_v19, -inf }
 0x493   : > { %v5757_v20 = vrot.slane %v5756_v10, 1  ;;  %v5763_v0 = vmax.f32 %v5761_v52, %v5762_v49  ;;  %v5770_v50 = vmax.f32 %v5768_v31, %v5769_v32  ;;  %v5726_v46 = vmax.f32 %v5724_v56, %v5725_v23 }
 0x494   : > { %v5777_v28 = vmax.f32 %v5775_v25, %v5776_v44  ;;  %v5732_v58 = vrot.slane %v5731_v5, 4  ;;  %v5739_v55 = vrot.slane %v5738_v39, 4  ;;  %v5746_v60 = vrot.slane %v5745_v4, 4 }
 0x495   : > { %v5758_v7 = vmax.f32 %v5756_v10, %v5757_v20  ;;  %v5764_v63 = vrot.slane %v5763_v0, 1  ;;  %v5771_v22 = vrot.slane %v5770_v50, 1  ;;  %v5727_v53 = vrot.slane %v5726_v46, 2 }
 0x496   : > { %v5778_v34 = vrot.slane %v5777_v28, 1  ;;  %v5733_v3 = vmax.f32 %v5731_v5, %v5732_v58  ;;  %v5740_v27 = vmax.f32 %v5738_v39, %v5739_v55  ;;  %v5747_v36 = vmax.f32 %v5745_v4, %v5746_v60 }
 0x497   : > { %v5765_v6 = vmax.f32 %v5763_v0, %v5764_v63  ;;  %v9139_v48 = vmax.f32 %v5770_v50, %v5771_v22  ;;  %v5728_v19 = vmax.f32 %v5726_v46, %v5727_v53  ;;  %v5072_v1 = vcombine.high %v4688_v13, %v4688_v13 }
 0x498   : > { %v9141_v52 = vmax.f32 %v5777_v28, %v5778_v34  ;;  %v5734_v31 = vrot.slane %v5733_v3, 2  ;;  %v5741_v25 = vrot.slane %v5740_v27, 2  ;;  %v5748_v56 = vrot.slane %v5747_v36, 2 }
 0x499   : > { %9629 = vst [vmem:[#allocation35_spill] sm:$0xff] %v9139_v48  ;;  %v9144_v49 = vsel %vm3537_vm3, %v5765_v6, %v5758_v7  ;;  %v5729_v20 = vrot.slane %v5728_v19, 1  ;;  %v5079_v10 = vrot.slane %v4688_v13, %v7664_v57  ;;  %v5086_v32 = vrot.slane %v5072_v1, %v7664_v57 }
 0x49a   : > { %9630 = vst [vmem:[#allocation36_spill] sm:$0xff] %v9141_v52  ;;  %9631 = vst [vmem:[#allocation37_spill] sm:$0xff] %v9144_v49  ;;  %v5735_v23 = vmax.f32 %v5733_v3, %v5734_v31  ;;  %v5742_v44 = vmax.f32 %v5740_v27, %v5741_v25  ;;  %v5749_v5 = vmax.f32 %v5747_v36, %v5748_v56 }
 0x49b   : > { %v4663_v53 = vadd.f32 %v9070_v54, %v8910_v15  ;;  %v5730_v39 = vmax.f32 %v5728_v19, %v5729_v20  ;;  %v5087_v34 = vcombine.high %v5079_v10, %v5079_v10  ;;  %v5088_v4 = vcombine.high %v5086_v32, %v5086_v32 }
 0x49c   : > { %v5808_v0 = vsel %vm5219_vm12, %v5079_v10, -inf  ;;  %v5736_v50 = vrot.slane %v5735_v23, 1  ;;  %v5743_v46 = vrot.slane %v5742_v44, 1  ;;  %v5750_v6 = vrot.slane %v5749_v5, 1 }
 0x49d   : > { %v5809_v28 = vrot.slane %v5808_v0, 4  ;;  %v5815_v58 = vsel %vm5219_vm12, %v5087_v34, -inf  ;;  %v5822_v13 = vsel %vm5219_vm12, %v5086_v32, -inf  ;;  %v5829_v1 = vsel %vm5219_vm12, %v5088_v4, -inf }
 0x49e   : > { %v4687_v3 = vmax.f32 %v4663_v53, 0.0  ;;  %v5737_v27 = vmax.f32 %v5735_v23, %v5736_v50  ;;  %v9154_v55 = vmax.f32 %v5742_v44, %v5743_v46  ;;  %v9156_v15 = vmax.f32 %v5749_v5, %v5750_v6 }
 0x49f   : > { %v5810_v60 = vmax.f32 %v5808_v0, %v5809_v28  ;;  %v5816_v7 = vrot.slane %v5815_v58, 4  ;;  %v5823_v63 = vrot.slane %v5822_v13, 4  ;;  %v5830_v22 = vrot.slane %v5829_v1, 4 }
 0x4a0   : > { %9632 = vst [vmem:[#allocation38_spill] sm:$0xff] %v9156_v15  ;;  %v5055_v36 = vcombine.high %v4687_v3, %v4687_v3  ;;  %v9159_v19 = vsel %vm3537_vm3, %v5737_v27, %v5730_v39  ;;  %v5062_v25 = vrot.slane %v4687_v3, %v7664_v57  ;;  %v4666_v56 = vadd.f32 %v9070_v54, %v8927_v8 }
 0x4a1   : > { %v5811_v31 = vrot.slane %v5810_v60, 2  ;;  %v5817_v20 = vmax.f32 %v5815_v58, %v5816_v7  ;;  %v5824_v10 = vmax.f32 %v5822_v13, %v5823_v63  ;;  %v5831_v32 = vmax.f32 %v5829_v1, %v5830_v22 }
 0x4a2   : > { %v5069_v23 = vrot.slane %v5055_v36, %v7664_v57  ;;  %v5070_v5 = vcombine.high %v5062_v25, %v5062_v25  ;;  %v5780_v53 = vsel %vm5219_vm12, %v5062_v25, -inf  ;;  %v4690_v34 = vmax.f32 %v4666_v56, 0.0 }
 0x4a3   : > { %v5812_v44 = vmax.f32 %v5810_v60, %v5811_v31  ;;  %v5818_v4 = vrot.slane %v5817_v20, 2  ;;  %v5825_v0 = vrot.slane %v5824_v10, 2  ;;  %v5832_v39 = vrot.slane %v5831_v32, 2 }
 0x4a4   : > { %v5071_v50 = vcombine.high %v5069_v23, %v5069_v23  ;;  %v5781_v6 = vrot.slane %v5780_v53, 4  ;;  %v5787_v28 = vsel %vm5219_vm12, %v5070_v5, -inf  ;;  %v5794_v8 = vsel %vm5219_vm12, %v5069_v23, -inf }
 0x4a5   : > { %v5813_v46 = vrot.slane %v5812_v44, 1  ;;  %v5819_v58 = vmax.f32 %v5817_v20, %v5818_v4  ;;  %v5826_v13 = vmax.f32 %v5824_v10, %v5825_v0  ;;  %v5833_v1 = vmax.f32 %v5831_v32, %v5832_v39 }
 0x4a6   : > { %v5788_v3 = vrot.slane %v5787_v28, 4  ;;  %v5782_v60 = vmax.f32 %v5780_v53, %v5781_v6  ;;  %v5795_v7 = vrot.slane %v5794_v8, 4  ;;  %v5801_v63 = vsel %vm5219_vm12, %v5071_v50, -inf }
 0x4a7   : > { %v5814_v27 = vmax.f32 %v5812_v44, %v5813_v46  ;;  %v5820_v22 = vrot.slane %v5819_v58, 1  ;;  %v5827_v36 = vrot.slane %v5826_v13, 1  ;;  %v5834_v31 = vrot.slane %v5833_v1, 1 }
 0x4a8   : > { %v5789_v25 = vmax.f32 %v5787_v28, %v5788_v3  ;;  %v5783_v56 = vrot.slane %v5782_v60, 2  ;;  %v5796_v52 = vmax.f32 %v5794_v8, %v5795_v7  ;;  %v5802_v15 = vrot.slane %v5801_v63, 4 }
 0x4a9   : > { %v5106_v48 = vcombine.high %v4690_v34, %v4690_v34  ;;  %v5821_v5 = vmax.f32 %v5819_v58, %v5820_v22  ;;  %v9169_v49 = vmax.f32 %v5826_v13, %v5827_v36  ;;  %v9171_v20 = vmax.f32 %v5833_v1, %v5834_v31 }
 0x4aa   : > { %v5790_v10 = vrot.slane %v5789_v25, 2  ;;  %v5784_v32 = vmax.f32 %v5782_v60, %v5783_v56  ;;  %v5797_v23 = vrot.slane %v5796_v52, 2  ;;  %v5803_v44 = vmax.f32 %v5801_v63, %v5802_v15 }
 0x4ab   : > { %v5113_v53 = vrot.slane %v4690_v34, %v7664_v57  ;;  %v9175_v4 = vsel %vm3537_vm3, %v5821_v5, %v5814_v27  ;;  %v5120_v39 = vrot.slane %v5106_v48, %v7664_v57  ;;  %v4665_v50 = vadd.f32 %v9070_v54, %v8949_v2 }
 0x4ac   : > { %v5791_v0 = vmax.f32 %v5789_v25, %v5790_v10  ;;  %v5785_v46 = vrot.slane %v5784_v32, 1  ;;  %v5798_v6 = vmax.f32 %v5796_v52, %v5797_v23  ;;  %v5804_v28 = vrot.slane %v5803_v44, 2 }
 0x4ad   : > { %v5121_v8 = vcombine.high %v5113_v53, %v5113_v53  ;;  %v5122_v13 = vcombine.high %v5120_v39, %v5120_v39  ;;  %v5864_v1 = vsel %vm5219_vm12, %v5113_v53, -inf  ;;  %v5878_v15 = vsel %vm5219_vm12, %v5120_v39, -inf }
 0x4ae   : > { %v5792_v58 = vrot.slane %v5791_v0, 1  ;;  %v5786_v34 = vmax.f32 %v5784_v32, %v5785_v46  ;;  %v5799_v3 = vrot.slane %v5798_v6, 1  ;;  %v5805_v27 = vmax.f32 %v5803_v44, %v5804_v28 }
 0x4af   : > { %v5865_v60 = vrot.slane %v5864_v1, 4  ;;  %v5871_v48 = vsel %vm5219_vm12, %v5121_v8, -inf  ;;  %v5879_v63 = vrot.slane %v5878_v15, 4  ;;  %v5885_v2 = vsel %vm5219_vm12, %v5122_v13, -inf }
 0x4b0   : > { %v5793_v7 = vmax.f32 %v5791_v0, %v5792_v58  ;;  %v9184_v54 = vmax.f32 %v5798_v6, %v5799_v3  ;;  %v5806_v52 = vrot.slane %v5805_v27, 1  ;;  %v5872_v36 = vrot.slane %v5871_v48, 4 }
 0x4b1   : > { %v5866_v22 = vmax.f32 %v5864_v1, %v5865_v60  ;;  %v5880_v25 = vmax.f32 %v5878_v15, %v5879_v63  ;;  %v5886_v56 = vrot.slane %v5885_v2, 4  ;;  %v4689_v5 = vmax.f32 %v4665_v50, 0.0 }
 0x4b2   : > { %v9187_v31 = vsel %vm3537_vm3, %v5793_v7, %v5786_v34  ;;  %v9189_v10 = vmax.f32 %v5805_v27, %v5806_v52  ;;  %v5873_v23 = vmax.f32 %v5871_v48, %v5872_v36  ;;  %v5989_v44 = vsel %vm3539_vm4, %v8843_v38, %v8852_v62 }
 0x4b3   : > { %v5867_v32 = vrot.slane %v5866_v22, 2  ;;  %v5881_v53 = vrot.slane %v5880_v25, 2  ;;  %v5887_v0 = vmax.f32 %v5885_v2, %v5886_v56  ;;  %v5089_v39 = vcombine.high %v4689_v5, %v4689_v5 }
 0x4b4   : > { %v5096_v46 = vrot.slane %v4689_v5, %v7664_v57  ;;  %v5874_v28 = vrot.slane %v5873_v23, 2  ;;  %v9197_v8 = vsel %vm3541_vm5, %v8849_v11, %v5989_v44  ;;  %v5992_v50 = vsel %vm3539_vm4, %v8826_v16, %v8839_v30 }
 0x4b5   : > { %v5868_v6 = vmax.f32 %v5866_v22, %v5867_v32  ;;  %v5882_v58 = vmax.f32 %v5880_v25, %v5881_v53  ;;  %v5888_v13 = vrot.slane %v5887_v0, 2  ;;  %v5103_v1 = vrot.slane %v5089_v39, %v7664_v57 }
 0x4b6   : > { %v5104_v38 = vcombine.high %v5096_v46, %v5096_v46  ;;  %v5875_v15 = vmax.f32 %v5873_v23, %v5874_v28  ;;  %v5836_v34 = vsel %vm5219_vm12, %v5096_v46, -inf  ;;  %v5993_v3 = vsel %vm3541_vm5, %v8836_v26, %v5992_v50 }
 0x4b7   : > { %v5869_v62 = vrot.slane %v5868_v6, 1  ;;  %v5883_v27 = vrot.slane %v5882_v58, 1  ;;  %v5889_v60 = vmax.f32 %v5887_v0, %v5888_v13  ;;  %v5105_v11 = vcombine.high %v5103_v1, %v5103_v1 }
 0x4b8   : > { %v5837_v7 = vrot.slane %v5836_v34, 4  ;;  %v5876_v63 = vrot.slane %v5875_v15, 1  ;;  %v5843_v16 = vsel %vm5219_vm12, %v5104_v38, -inf  ;;  %v5850_v30 = vsel %vm5219_vm12, %v5103_v1, -inf  ;;  %v9633_v1 = vld [vmem:[#allocation7_spill] sm:$0xff] }
 0x4b9   : > { %v5870_v48 = vmax.f32 %v5868_v6, %v5869_v62  ;;  %v9208_v2 = vmax.f32 %v5882_v58, %v5883_v27  ;;  %v5890_v52 = vrot.slane %v5889_v60, 1  ;;  %v5844_v36 = vrot.slane %v5843_v16, 4  ;;  %v9635_v27 = vld [vmem:[#allocation8_spill] sm:$0xff] }
 0x4ba   : > { %v5838_v22 = vmax.f32 %v5836_v34, %v5837_v7  ;;  %v5877_v25 = vmax.f32 %v5875_v15, %v5876_v63  ;;  %v5851_v56 = vrot.slane %v5850_v30, 4  ;;  %v5857_v5 = vsel %vm5219_vm12, %v5105_v11, -inf  ;;  %v9634_v15 = vld [vmem:[#allocation9_spill] sm:$0xff]  ;;  %v9637_v11 = vld [vmem:[#allocation10_spill] sm:$0xff] }
 0x4bb   : > { %v5995_v26 = vsel %vm3539_vm4, %v8892_v14, %v8897_v9  ;;  %v9214_v32 = vmax.f32 %v5889_v60, %v5890_v52  ;;  %v5845_v44 = vmax.f32 %v5843_v16, %v5844_v36  ;;  %v5858_v53 = vrot.slane %v5857_v5, 4 }
 0x4bc   : > { %v5839_v23 = vrot.slane %v5838_v22, 2  ;;  %v9217_v0 = vsel %vm3537_vm3, %v5877_v25, %v5870_v48  ;;  %v5852_v39 = vmax.f32 %v5850_v30, %v5851_v56  ;;  %v5996_v46 = vsel %vm3541_vm5, %v8901_v40, %v5995_v26 }
 0x4bd   : > { %v5998_v6 = vsel %vm3539_vm4, %v8874_v21, %v8883_v29  ;;  %v5846_v50 = vrot.slane %v5845_v44, 2  ;;  %v5859_v58 = vmax.f32 %v5857_v5, %v5858_v53  ;;  %v6001_v13 = vsel %vm3539_vm4, %v8923_v59, %v8936_v12  ;;  %v9636_v12 = vld [vmem:[#allocation12_spill] sm:$0xff] }
 0x4be   : > { %v5840_v28 = vmax.f32 %v5838_v22, %v5839_v23  ;;  %v5999_v14 = vsel %vm3541_vm5, %v8878_v43, %v5998_v6  ;;  %v5853_v9 = vrot.slane %v5852_v39, 2  ;;  %v6004_v38 = vsel %vm3539_vm4, %v9633_v1, %v8917_v47  ;;  %v9639_v6 = vld [vmem:[#allocation16_spill] sm:$0xff] }
 0x4bf   : > { %v6007_v40 = vsel %vm3539_vm4, %v8967_v42, %v8974_v51  ;;  %v5847_v29 = vmax.f32 %v5845_v44, %v5846_v50  ;;  %v5860_v62 = vrot.slane %v5859_v58, 2  ;;  %v6002_v34 = vsel %vm3541_vm5, %v9634_v15, %v6001_v13  ;;  %v9638_v51 = vld [vmem:[#allocation11_spill] sm:$0xff]  ;;  %v9640_v50 = vld [vmem:[#allocation14_spill] sm:$0xff] }
 0x4c0   : > { %v5841_v21 = vrot.slane %v5840_v28, 1  ;;  %v5854_v43 = vmax.f32 %v5852_v39, %v5853_v9  ;;  %v6005_v60 = vsel %vm3541_vm5, %v9635_v27, %v6004_v38  ;;  %v6008_v59 = vsel %vm3541_vm5, %v8971_v37, %v6007_v40  ;;  %v9642_v38 = vld [vmem:[#allocation17_spill] sm:$0xff]  ;;  %v9645_v15 = vld [vmem:[#allocation18_spill] sm:$0xff] }
 0x4c1   : > { %v6010_v47 = vsel %vm3539_vm4, %v9637_v11, %v9636_v12  ;;  %v5848_v48 = vrot.slane %v5847_v29, 1  ;;  %v5861_v42 = vmax.f32 %v5859_v58, %v5860_v62  ;;  %v6084_v30 = vcombine.low %v9197_v8, %v5996_v46  ;;  %v9641_v58 = vld [vmem:[#allocation13_spill] sm:$0xff]  ;;  %v9649_v12 = vld [vmem:[#allocation19_spill] sm:$0xff] }
 0x4c2   : > { %v5842_v7 = vmax.f32 %v5840_v28, %v5841_v21  ;;  %v6011_v63 = vsel %vm3541_vm5, %v9638_v51, %v6010_v47  ;;  %v5855_v16 = vrot.slane %v5854_v43, 1  ;;  %v6092_v52 = vcombine.low %v5993_v3, %v5999_v14  ;;  %v9643_v21 = vld [vmem:[#allocation15_spill] sm:$0xff]  ;;  %v9650_v47 = vld [vmem:[#allocation24_spill] sm:$0xff] }
 0x4c3   : > { %v6100_v22 = vcombine.low %v6002_v34, %v6008_v59  ;;  %v5849_v36 = vmax.f32 %v5847_v29, %v5848_v48  ;;  %v5862_v25 = vrot.slane %v5861_v42, 1  ;;  %v6108_v56 = vcombine.low %v6005_v60, %v6011_v63  ;;  %v9648_v60 = vld [vmem:[#allocation6_spill] sm:$0xff] }
 0x4c4   : > { %v9247_v5 = vmax.f32 %v5854_v43, %v5855_v16  ;;  %v6091_v37 = vrot.slane %v6084_v30, %v7664_v57  ;;  %v6099_v26 = vrot.slane %v6092_v52, %v7664_v57  ;;  %v7443_v3 = vmov 1934713408  }
 0x4c5   : > { %v6107_v23 = vrot.slane %v6100_v22, %v7664_v57  ;;  %v9252_v44 = vmax.f32 %v5861_v42, %v5862_v25  ;;  %v9255_v53 = vsel %vm3537_vm3, %v5849_v36, %v5842_v7  ;;  %v6115_v8 = vrot.slane %v6108_v56, %v7664_v57  ;;  %v9651_v7 = vld [vmem:[#allocation23_spill] sm:$0xff]  ;;  %v9653_v42 = vld [vmem:[#allocation25_spill] sm:$0xff]  ;;  %v9654_v22 = vld [vmem:[#allocation28_spill] sm:$0xff] }
 0x4c6   : > { %v6119_v39 = vunpack.c.l.s4 %v7443_v3  ;;  %v6117_v46 = vcombine.high %v6091_v37, %v6099_v26  ;;  %v6013_v28 = vsel %vm3539_vm4, %v9639_v6, %v9006_v33  ;;  %v6016_v14 = vsel %vm3539_vm4, %v9641_v58, %v9640_v50  ;;  %v9644_v33 = vld [vmem:[#allocation20_spill] sm:$0xff]  ;;  %v9655_v25 = vld [vmem:[#allocation27_spill] sm:$0xff] }
 0x4c7   : > { %v6019_v9 = vsel %vm3539_vm4, %v9029_v35, %v9034_v18  ;;  %v6133_v1 = vcombine.high %v6107_v23, %v6115_v8  ;;  %v6014_v40 = vsel %vm3541_vm5, %v9642_v38, %v6013_v28  ;;  %v6017_v29 = vsel %vm3541_vm5, %v9643_v21, %v6016_v14  ;;  %v9646_v35 = vld [vmem:[#allocation22_spill] sm:$0xff]  ;;  %v9647_v18 = vld [vmem:[#allocation21_spill] sm:$0xff]  ;;  %v9657_v21 = vld [vmem:[#allocation32_spill] sm:$0xff] }
 0x4c8   : > { %v6120_v13 = vunpack.c.0.s8 %v6119_v39  ;;  %v6020_v62 = vsel %vm3541_vm5, %v9031_v24, %v6019_v9  ;;  %v6022_v34 = vsel %vm3539_vm4, %v9645_v15, %v9644_v33  ;;  %v6025_v43 = vsel %vm3539_vm4, %v9059_v45, %v9064_v61  ;;  %v9652_v61 = vld [vmem:[#allocation26_spill] sm:$0xff] }
 0x4c9   : > { %v6028_v27 = vsel %vm3539_vm4, %v9647_v18, %v9646_v35  ;;  %v6023_v11 = vsel %vm3541_vm5, %v9649_v12, %v6022_v34  ;;  %v6026_v24 = vsel %vm3541_vm5, %v9650_v47, %v6025_v43  ;;  %v6031_v45 = vsel %vm3539_vm4, %v9095_v41, %v9101_v17  ;;  %v9660_v35 = vld [vmem:[#allocation33_spill] sm:$0xff] }
 0x4ca   : > { %v9283_v59 = vsub.s32 %v6120_v13, %v9648_v60  ;;  %v6029_v48 = vsel %vm3541_vm5, %v9651_v7, %v6028_v27  ;;  %v6034_v51 = vsel %vm3539_vm4, %v9653_v42, %v9652_v61  ;;  %v6152_v63 = vcombine.low %v6014_v40, %v6020_v62  ;;  %v9656_v40 = vld [vmem:[#allocation34_spill] sm:$0xff]  ;;  %v9663_v7 = vld [vmem:[#allocation35_spill] sm:$0xff]  ;;  %v9665_v42 = vld [vmem:[#allocation36_spill] sm:$0xff] }
 0x4cb   : > { %v6160_v16 = vcombine.low %v6017_v29, %v6023_v11  ;;  %v6032_v36 = vsel %vm3541_vm5, %v9654_v22, %v6031_v45  ;;  %v6035_v56 = vsel %vm3541_vm5, %v9655_v25, %v6034_v51  ;;  %v6116_v50 = vcombine.low %v6091_v37, %v6099_v26  ;;  %v9658_v26 = vld [vmem:[#allocation31_spill] sm:$0xff]  ;;  %v9661_v27 = vld [vmem:[#allocation30_spill] sm:$0xff] }
 0x4cc   : > { %v6131_v30 = vrot.slane %v6117_v46, %v9283_v59  ;;  %v6147_v52 = vrot.slane %v6133_v1, %v9283_v59  ;;  %v6159_v3 = vrot.slane %v6152_v63, %v7664_v57  ;;  %v6168_v17 = vcombine.low %v6026_v24, %v6032_v36  ;;  %v9662_v24 = vld [vmem:[#allocation37_spill] sm:$0xff]  ;;  %v9664_v45 = vld [vmem:[#allocation38_spill] sm:$0xff] }
 0x4cd   : > { %v6167_v41 = vrot.slane %v6160_v16, %v7664_v57  ;;  %v6176_v39 = vcombine.low %v6029_v48, %v6035_v56  ;;  %v6132_v58 = vcombine.low %v6107_v23, %v6115_v8  ;;  %v9309_v1 = vrot.slane %v6116_v50, %v9283_v59  ;;  %v9659_v23 = vld [vmem:[#allocation29_spill] sm:$0xff] }
 0x4ce   : > { %v6151_v6 = vcombine.high %v6131_v30, %v6147_v52  ;;  %v6150_v28 = vcombine.low %v6131_v30, %v6147_v52  ;;  %v6175_v46 = vrot.slane %v6168_v17, %v7664_v57  ;;  %v6037_v37 = vsel %vm3539_vm4, %v9657_v21, %v9656_v40  ;;  %v6341_v40 = vld [vmem:[%s9590_s5 + $0x28] sm:$0xff] }
 0x4cf   : > { %v6183_v14 = vrot.slane %v6176_v39, %v7664_v57  ;;  %v6185_v9 = vcombine.high %v6159_v3, %v6167_v41  ;;  %v6184_v13 = vcombine.low %v6159_v3, %v6167_v41  ;;  %v9312_v38 = vrot.slane %v6132_v58, %v9283_v59  ;;  %v6338_v3 = vld [vmem:[%s9590_s5 + $0x10] sm:$0xff]  ;;  %v6339_v41 = vld [vmem:[%s9590_s5 + $0x18] sm:$0xff] }
 0x4d0   : > { %6315 = vrot.lane.b32.xlu1 %v6151_v6, %s7444_s28  ;;  %v6040_v8 = vsel %vm3539_vm4, %v9659_v23, %v9658_v26  ;;  %v6038_v18 = vsel %vm3541_vm5, %v9660_v35, %v6037_v37  ;;  %v6043_v47 = vsel %vm3539_vm4, %v9154_v55, %v9159_v19  ;;  %v6046_v48 = vsel %vm3539_vm4, %v9663_v7, %v9662_v24  ;;  %v6347_v24 = vld [vmem:[%s9590_s5 + $0x58] sm:$0xff] }
 0x4d1   : > { %v6199_v29 = vrot.slane %v6185_v9, %v9283_v59  ;;  %v6201_v62 = vcombine.high %v6175_v46, %v6183_v14  ;;  %v9322_v33 = vrot.slane %v6184_v13, %v9283_v59  ;;  %v6200_v15 = vcombine.low %v6175_v46, %v6183_v14  ;;  %v6340_v13 = vld [vmem:[%s9590_s5 + $0x20] sm:$0xff] }
 0x4d2   : > { %v6148_v34 = vcombine.low %v9309_v1, %v9312_v38  ;;  %v6149_v43 = vcombine.high %v9309_v1, %v9312_v38  ;;  %v6041_v60 = vsel %vm3541_vm5, %v9661_v27, %v6040_v8  ;;  %v6044_v61 = vsel %vm3541_vm5, %v9664_v45, %v6043_v47  ;;  %v6344_v27 = vld [vmem:[%s9590_s5 + $0x40] sm:$0xff]  ;;  %v6346_v47 = vld [vmem:[%s9590_s5 + $0x50] sm:$0xff]  ;;  %v6349_v45 = vld [vmem:[%s9590_s5 + $0x68] sm:$0xff] }
 0x4d3   : > { %v6215_v12 = vrot.slane %v6201_v62, %v9283_v59  ;;  %v9334_v11 = vrot.slane %v6200_v15, %v9283_v59  ;;  %v6047_v51 = vsel %vm3541_vm5, %v9665_v42, %v6046_v48  ;;  %v6049_v63 = vsel %vm3539_vm4, %v9184_v54, %v9187_v31  ;;  %v6337_v31 = vld [vmem:[%s9590_s5 + $0x8] sm:$0xff]  ;;  %v6348_v48 = vld [vmem:[%s9590_s5 + $0x60] sm:$0xff]  ;;  %v6350_v42 = vld [vmem:[%s9590_s5 + $0x70] sm:$0xff] }
 0x4d4   : > { %v6052_v16 = vsel %vm3539_vm4, %v9169_v49, %v9175_v4  ;;  %v6050_v22 = vsel %vm3541_vm5, %v9189_v10, %v6049_v63  ;;  %v6055_v54 = vsel %vm3539_vm4, %v9247_v5, %v9255_v53  ;;  %v6058_v49 = vsel %vm3539_vm4, %v9208_v2, %v9217_v0  ;;  %v6336_v4 = vld [vmem:[%s9590_s5] sm:$0xff] }
 0x4d5   : > { %v6219_v30 = vcombine.high %v6199_v29, %v6215_v12  ;;  %v6217_v55 = vcombine.high %v9322_v33, %v9334_v11  ;;  %v6216_v19 = vcombine.low %v9322_v33, %v9334_v11  ;;  %v6218_v52 = vcombine.low %v6199_v29, %v6215_v12  ;;  %v6446_v33 = vld [vmem:[%s9592_s7 + $0x20] sm:$0xff]  ;;  %v6447_v11 = vld [vmem:[%s9592_s7 + $0x28] sm:$0xff] }
 0x4d6   : > { %v6053_v36 = vsel %vm3541_vm5, %v9171_v20, %v6052_v16  ;;  %v6056_v25 = vsel %vm3541_vm5, %v9252_v44, %v6055_v54  ;;  %v6059_v5 = vsel %vm3541_vm5, %v9214_v32, %v6058_v49  ;;  %v6220_v53 = vcombine.low %v6038_v18, %v6044_v61 }
 0x4d7   : > { %6317 = vrot.lane.b32.xlu1 %v6219_v30, %s7444_s28  ;;  %v7363_v10 = vpack.i.bf16 %v6217_v55, %v6149_v43  ;;  %v7368_v20 = vpack.i.bf16 %v6218_v52, %v6150_v28  ;;  %v6228_v2 = vcombine.low %v6041_v60, %v6047_v51  ;;  %v6236_v0 = vcombine.low %v6050_v22, %v6056_v25  ;;  %v6342_v43 = vld [vmem:[%s9590_s5 + $0x30] sm:$0xff]  ;;  %v6345_v60 = vld [vmem:[%s9590_s5 + $0x48] sm:$0xff]  ;;  %v6351_v51 = vld [vmem:[%s9590_s5 + $0x78] sm:$0xff] }
 0x4d8   : > { %v6244_v56 = vcombine.low %v6053_v36, %v6059_v5  ;;  %v7218_v17 = vpack.c.bf16 %v6337_v31, %v6336_v4  ;;  %v6227_v44 = vrot.slane %v6220_v53, %v7664_v57  ;;  %v7446_v28 = vmov 0.0|0.0   ;;  %v6442_v52 = vld [vmem:[%s9592_s7] sm:$0xff]  ;;  %v6443_v22 = vld [vmem:[%s9592_s7 + $0x8] sm:$0xff]  ;;  %v6444_v5 = vld [vmem:[%s9592_s7 + $0x10] sm:$0xff] }
 0x4d9   : > { %7364 = vrot.lane.b32.xlu0 %v7363_v10, %s7445_s25  ;;  %v6235_v32 = vrot.slane %v6228_v2, %v7664_v57  ;;  %v6243_v39 = vrot.slane %v6236_v0, %v7664_v57  ;;  %7217 = vmatprep.subr.bf16.mxu0 %v7446_v28  ;;  %v7221_v50 = vpack.c.bf16 %v6339_v41, %v6338_v3  ;;  %v9666_v23 = vmov 0.0   ;;  %v6445_v53 = vld [vmem:[%s9592_s7 + $0x18] sm:$0xff] }
 0x4da   : > { %v6251_v6 = vrot.slane %v6244_v56, %v7664_v57  ;;  %7219 = vmatpush3.bf16.msra.mxu0 %v7218_v17  ;;  %7155 = vmatprep.mubr.msk.f32.mxu0 %vm7448_vm13, %v9666_v23  ;;  %v7224_v8 = vpack.c.bf16 %v6341_v40, %v6340_v13  ;;  %v7230_v12 = vpack.c.bf16 %v6345_v60, %v6344_v27  ;;  %v6453_v13 = vld [vmem:[%s9592_s7 + $0x58] sm:$0xff] }
 0x4db   : > { %v6253_v58 = vcombine.high %v6227_v44, %v6235_v32  ;;  %v6252_v14 = vcombine.low %v6227_v44, %v6235_v32  ;;  %7220 = vmatprep.subr.bf16.mxu0 %v7446_v28  ;;  %v7233_v7 = vpack.c.bf16 %v6347_v24, %v6346_v47  ;;  %v7236_v61 = vpack.c.bf16 %v6349_v45, %v6348_v48  ;;  %v6758_v48 = vld [vmem:[%s9593_s8] ss:$0 sm:$0xff] }
 0x4dc   : > { %v6269_v46 = vcombine.high %v6243_v39, %v6251_v6  ;;  %v6268_v9 = vcombine.low %v6243_v39, %v6251_v6  ;;  %v7239_v63 = vpack.c.bf16 %v6351_v51, %v6350_v42  ;;  %v7245_v3 = vpack.c.bf16 %v6445_v53, %v6444_v5  ;;  %v6448_v39 = vld [vmem:[%s9592_s7 + $0x30] sm:$0xff]  ;;  %v6449_v6 = vld [vmem:[%s9592_s7 + $0x38] sm:$0xff] }
 0x4dd   : > { %7369 = vrot.lane.b32.xlu0 %v7368_v20, %s7447_s16  ;;  %v6267_v57 = vrot.slane %v6253_v58, %v9283_v59  ;;  %v9399_v37 = vrot.slane %v6252_v14, %v9283_v59  ;;  %v7242_v20 = vpack.c.bf16 %v6443_v22, %v6442_v52  ;;  %v7248_v32 = vpack.c.bf16 %v6447_v11, %v6446_v33  ;;  %v6450_v58 = vld [vmem:[%s9592_s7 + $0x40] sm:$0xff] }
 0x4de   : > { %v6283_v21 = vrot.slane %v6269_v46, %v9283_v59  ;;  %v9402_v26 = vrot.slane %v6268_v9, %v9283_v59  ;;  %7222 = vmatpush3.bf16.msra.mxu0 %v7221_v50  ;;  %v6343_v59 = vld [vmem:[%s9590_s5 + $0x38] sm:$0xff]  ;;  %v7251_v50 = vpack.c.bf16 %v6449_v6, %v6448_v39  ;;  %v6451_v46 = vld [vmem:[%s9592_s7 + $0x48] sm:$0xff]  ;;  %v6452_v9 = vld [vmem:[%s9592_s7 + $0x50] sm:$0xff] }
 0x4df   : > { %7223 = vmatprep.subr.bf16.mxu0 %v7446_v28  ;;  %v7227_v18 = vpack.c.bf16 %v6343_v59, %v6342_v43  ;;  %v7254_v14 = vpack.c.bf16 %v6451_v46, %v6450_v58  ;;  %v7257_v40 = vpack.c.bf16 %v6453_v13, %v6452_v9 }
 0x4e0   : > { %v6286_v29 = vcombine.low %v6267_v57, %v6283_v21  ;;  %v6285_v62 = vcombine.high %v9399_v37, %v9402_v26  ;;  %v6287_v15 = vcombine.high %v6267_v57, %v6283_v21  ;;  %v6284_v35 = vcombine.low %v9399_v37, %v9402_v26  ;;  %v6454_v57 = vld [vmem:[%s9592_s7 + $0x60] sm:$0xff]  ;;  %v6455_v21 = vld [vmem:[%s9592_s7 + $0x68] sm:$0xff]  ;;  %v6456_v26 = vld [vmem:[%s9592_s7 + $0x70] sm:$0xff] }
 0x4e1   : > { %v7260_v37 = vpack.c.bf16 %v6455_v21, %v6454_v57 }
 0x4e2   : > { %6307 = vrot.lane.b32.xlu1 %v6286_v29, %s7447_s16  ;;  %6295 = vrot.lane.b32.xlu0 %v6285_v62, %s7445_s25  ;;  %v6757_v62 = vld [vmem:[%s9591_s6] ss:$0 sm:$0xff]  ;;  %s328_s16 = scalar_lea.vmem [#allocation3], %s7313_s29  ;;  %s7381_s29 = sshll.u32 %s7449_s13, 4  ;;  %s7382_s29 = int_to_ptr.vmem [resolvable:$false] %s7381_s29 }
 0x4e3   : > { %7225 = vmatpush3.bf16.msra.mxu0 %v7224_v8  ;;  %v6457_v8 = vld [vmem:[%s9592_s7 + $0x78] sm:$0xff]  ;;  %s6562_s17 = sshll.u32 %s328_s16, 4  ;;  %s7383_s14 = scalar_lea.vmem %s7382_s29, 768  ;;  %s9537_s17 = int_to_ptr.vmem [resolvable:$true] %s6562_s17 }
 0x4e4   : > { %7226 = vmatprep.subr.bf16.mxu0 %v7446_v28  ;;  %v7263_v29 = vpack.c.bf16 %v6457_v8, %v6456_v26  ;;  %s7377_s26 = scalar_lea.vmem %s9537_s17, 384  ;;  %p7384_p0 = scmp.lt.s32.totalorder %s9537_s17, %s7382_s29 }
 0x4e5   : > { %p7378_p11 = scmp.ne.s32.totalorder %s9537_s17, %s7377_s26  ;;  %p7385_p1 = scmp.lt.s32.totalorder %s7383_s14, %s7377_s26 }
 0x4e6   : > { %6319 = vrot.lane.b32.xlu0 %v6287_v15, %s7444_s28 }
 0x4e7   : > { %7228 = vmatpush3.bf16.msra.mxu0 %v7227_v18  ;;  %p7379_p12 = pnand %p7378_p11, %p7540_p5  ;;  %p7386_p2 = por %p7385_p1, %p7384_p0 }
 0x4e8   : > { %7229 = vmatprep.subr.bf16.mxu0 %v7446_v28 }
 0x4e9   : > { %p7380_p13 = pneg %p7379_p12 }
 0x4eb   : > { %7231 = vmatpush3.bf16.msra.mxu0 %v7230_v12  ;;  %p7387_p3 = pnand %p7386_p2, %p7380_p13 }
 0x4ec   : > { %7232 = vmatprep.subr.bf16.mxu0 %v7446_v28 }
 0x4ef   : > { %7234 = vmatpush3.bf16.msra.mxu0 %v7233_v7 }
 0x4f0   : > { %7235 = vmatprep.subr.bf16.mxu0 %v7446_v28 }
 0x4f3   : > { %7237 = vmatpush3.bf16.msra.mxu0 %v7236_v61 }
 0x4f4   : > { %7238 = vmatprep.subr.bf16.mxu0 %v7446_v28 }
 0x4f7   : > { %7240 = vmatpush3.bf16.msra.mxu0 %v7239_v63 }
 0x4f8   : > { %7241 = vmatprep.subr.bf16.mxu0 %v7446_v28 }
 0x542   : > { %v6316_v30 = vpop.permute.xlu1 %6315 }
 0x549   : > { %v6318_v31 = vpop.permute.xlu1 %6317 }
 0x54b   : > { %v7365_v16 = vpop.permute.xlu0 %7364 }
 0x54c   : > { %v7366_v55 = vunpack.i.l.bf16 %v7365_v16  ;;  %v7367_v36 = vunpack.i.h.bf16 %v7365_v16 }
 0x54e   : > { %v6325_v10 = vsel %vm6324_vm14, %v6148_v34, %v7366_v55  ;;  %v6326_v1 = vsel %vm6324_vm14, %v6216_v19, %v7367_v36 }
 0x54f   : > { %v7370_v54 = vpop.permute.xlu0 %7369 }
 0x550   : > { %v7372_v49 = vunpack.i.h.bf16 %v7370_v54  ;;  %v7371_v4 = vunpack.i.l.bf16 %v7370_v54 }
 0x552   : > { %v6329_v25 = vsel %vm6328_vm15, %v6325_v10, %v7371_v4  ;;  %v6330_v38 = vsel %vm6328_vm15, %v6326_v1, %v7372_v49 }
 0x553   : > { %v6333_v2 = vsel %vm6332_vm0, %v6329_v25, %v6316_v30  ;;  %v6334_v19 = vsel %vm6332_vm0, %v6330_v38, %v6318_v31 }
 0x554   : > { %7156 = vmatmul.mubr.f32.vlgmr.msra.gmra.mrb[48].mxu0 %v6333_v2  ;;  %v6296_v34 = vpop.permute.xlu0 %6295  ;;  %v6308_v0 = vpop.permute.xlu1 %6307 }
 0x555   : > { %7158 = vmatprep.mubr.msk.f32.mxu0 %vm7448_vm13, %v9666_v23  ;;  %v6327_v56 = vsel %vm6324_vm14, %v6284_v35, %v6296_v34  ;;  %7243 = vmatpush3.bf16.msra.mxu0 %v7242_v20 }
 0x556   : > { %7244 = vmatprep.subr.bf16.mxu0 %v7446_v28  ;;  %v6331_v17 = vsel %vm6328_vm15, %v6327_v56, %v6308_v0 }
 0x558   : > { %7159 = vmatmul.mubr.f32.gmra.mrb[50].mxu0 %v6334_v19  ;;  %v6320_v41 = vpop.permute.xlu0 %6319 }
 0x559   : > { %7161 = vmatprep.mubr.msk.f32.mxu0 %vm7448_vm13, %v9666_v23  ;;  %v6335_v44 = vsel %vm6332_vm0, %v6331_v17, %v6320_v41  ;;  %7246 = vmatpush3.bf16.msra.mxu0 %v7245_v3 }
 0x55a   : > { %7247 = vmatprep.subr.bf16.mxu0 %v7446_v28 }
 0x55c   : > { %7162 = vmatmul.mubr.f32.gmra.mrb[52].mxu0 %v6335_v44 }
 0x55d   : > { %7249 = vmatpush3.bf16.msra.mxu0 %v7248_v32  ;;  %7196 = vmatprep.mubr.msk.f32.mxu0 %vm7448_vm13, %v9666_v23 }
 0x55e   : > { %7250 = vmatprep.subr.bf16.mxu0 %v7446_v28 }
 0x561   : > { %7252 = vmatpush3.bf16.msra.mxu0 %v7251_v50 }
 0x562   : > { %7253 = vmatprep.subr.bf16.mxu0 %v7446_v28 }
 0x565   : > { %7255 = vmatpush3.bf16.msra.mxu0 %v7254_v14 }
 0x566   : > { %7256 = vmatprep.subr.bf16.mxu0 %v7446_v28 }
 0x569   : > { %7258 = vmatpush3.bf16.msra.mxu0 %v7257_v40 }
 0x56a   : > { %7259 = vmatprep.subr.bf16.mxu0 %v7446_v28 }
 0x56d   : > { %7261 = vmatpush3.bf16.msra.mxu0 %v7260_v37 }
 0x56e   : > { %7262 = vmatprep.subr.bf16.mxu0 %v7446_v28 }
 0x571   : > { %7264 = vmatpush3.bf16.msra.mxu0 %v7263_v29 }
 0x627   : > { %v6425_v15 = vpop.f32.mrb[48].mxu0 }
 0x628   : > { %v6426_v43 = vadd.f32 %v6757_v62, %v6425_v15  ;;  %v7157_v59 = vpop.f32.mrb[49].mxu0 }
 0x62a   : > { %v6439_v35 = vmax.f32 %v6426_v43, 0.0 }
 0x62b   : > { %v6430_v28 = vpop.f32.mrb[50].mxu0 }
 0x62c   : > { %v6431_v18 = vadd.f32 %v6757_v62, %v6430_v28  ;;  %v7160_v27 = vpop.f32.mrb[51].mxu0  ;;  %7197 = vmatmul.mubr.f32.vlgmr.msra.gmra.mrb[54].mxu0 %v6439_v35 }
 0x62d   : > { %7199 = vmatprep.mubr.msk.f32.mxu0 %vm7448_vm13, %v9666_v23 }
 0x62e   : > { %v6440_v60 = vmax.f32 %v6431_v18, 0.0 }
 0x62f   : > { %v6435_v12 = vpop.f32.mrb[52].mxu0 }
 0x630   : > { %7200 = vmatmul.mubr.f32.gmra.mrb[56].mxu0 %v6440_v60  ;;  %v6436_v47 = vadd.f32 %v6757_v62, %v6435_v12  ;;  %v7163_v24 = vpop.f32.mrb[53].mxu0 }
 0x631   : > { %7202 = vmatprep.mubr.msk.f32.mxu0 %vm7448_vm13, %v9666_v23 }
 0x632   : > { %v6441_v7 = vmax.f32 %v6436_v47, 0.0 }
 0x634   : > { %7203 = vmatmul.mubr.f32.gmra.mrb[58].mxu0 %v6441_v7 }
 0x6ff   : > { %v6531_v45 = vpop.f32.mrb[54].mxu0 }
 0x700   : > { %v6532_v61 = vadd.f32 %v6758_v48, %v6531_v45  ;;  %v7198_v42 = vpop.f32.mrb[55].mxu0 }
 0x702   : > { %6545 = vst [vmem:[%s328_s16] sm:$0xff] %v6532_v61 }
 0x703   : > { %v6536_v51 = vpop.f32.mrb[56].mxu0 }
 0x704   : > { %v6537_v63 = vadd.f32 %v6758_v48, %v6536_v51  ;;  %v7201_v16 = vpop.f32.mrb[57].mxu0 }
 0x706   : > { %6546 = vst [vmem:[%s328_s16 + $0x8] sm:$0xff] %v6537_v63 }
 0x707   : > { %v6541_v23 = vpop.f32.mrb[58].mxu0 }
 0x708   : > { %v6542_v30 = vadd.f32 %v6758_v48, %v6541_v23  ;;  %v7204_v55 = vpop.f32.mrb[59].mxu0 }
 0x70a   : > { %6547 = vst [vmem:[%s328_s16 + $0x10] sm:$0xff] %v6542_v30 }
 0x70b   : > { %7390 = shalt.err (!%p7387_p3)
}
 0x70c   : > { %s7391_s27 = scalar_lea.hbm %s9542_s23, 384  ;;  %s7395_s21 = scalar_lea.hbm %s9594_s9, 768 }
 0x70d   : > { %p7392_p4 = scmp.ne.s32.totalorder %s9542_s23, %s7391_s27  ;;  %p7396_p9 = scmp.lt.u32.totalorder %s9542_s23, %s9594_s9 }
 0x70e   : > { %p7397_p10 = scmp.lt.u32.totalorder %s7395_s21, %s7391_s27  ;;  %p7399_p12 = scmp.lt.u32.totalorder %s7391_s27, %s9542_s23 }
 0x70f   : > { %p7393_p7 = pnand %p7392_p4, %p7540_p5 }
 0x710   : > { %p7398_p11 = por %p7397_p10, %p7396_p9 }
 0x711   : > { %p7394_p8 = pneg %p7393_p7 }
 0x712   : > { %p7400_p13 = por %p7399_p12, %p7398_p11 }
 0x714   : > { %p7401_p0 = pnand %p7400_p13, %p7394_p8 }
 0x716   : > { %7404 = shalt.err (!%p7401_p0)
}
 0x717   : > { %s7450_s26 = smov 128   ;;  %s7451_s13 = smov 8  }
 0x718   : > { %7314 = dma.vmem_to_hbm [thread:$0]  (%p7540_p5), %s9537_s17, 384, %s9542_s23, %s9544_s24, %s7450_s26, %s7450_s26, %s7451_s13  }
 0x719 PF: > { %p7320_p1 = scmp.ge.s32.totalorder %s7439_s12, 2  ;;  %s6577_s29 = sand.u32 1, %s7427_s30  }
 0x71a   : > { %s6578_s14 = scalar_lea.sflag [#allocation4], %s6577_s29 }
 0x71b   : > { %p7317_p2 = pnand %p7320_p1, %p7544_p6 }
 0x71d   : > { %7422 = dma.done.wait (!%p7317_p2), %s6578_s14, 384  }
 0x71e   : > { %7424 = vsyncadd (!%p7317_p2), %s6578_s14, 4294966912  ;;  %p19_p3 = scmp.ge.s32.totalorder %s7527_s15, 4   ;;  %s9667_s30 = smov %s7431_s10 }
 0x71f   : > { %s9668_s10 = smov %s7435_s11  ;;  %s9669_s11 = smov %s7538_s18 }
 0x720   : > { %s9670_s12 = smov %s7527_s15  ;;  %21 = sbr.rel (!%p19_p3) target bundleno = 3 (0x3), region = 93 }
 0x727   :  { %6583 = vsyncpa [#allocation4], 1 }
 0x728   :  { %6585 = vsyncpa [#allocation4 + $0x1], 1 }

</bundles_post_ra>
